<compile_context>
chip_gen: v7x
topology: tpu7x:2x2x1
jax: 0.10.0
libtpu: 0.0.40
codegen_flags: <defaults>
</compile_context>

<pallas_src>
import jax
import jax.numpy as jnp
from jax.experimental import pallas as pl
from jax.experimental.pallas import tpu as pltpu

EPS = 1e-5
_VMEM_LIMIT = 32 * 1024 * 1024  # safe scoped-VMEM request on v5e / v6e / v7x


# ---------------------------------------------------------------------------
# Kernel 1: 3x3 conv (stride 1, pad 1) on one zero-padded batch element (NHWC),
# expressed as 9 shifted (H*W, Cin) @ (Cin, Cout) MXU matmuls, with fused
# per-channel sum / sum-of-squares so the following BatchNorm stats are free.
# ---------------------------------------------------------------------------
def _conv3x3_kernel(xp_ref, w_ref, b_ref, y_ref, s_ref, ss_ref):
    # xp_ref: (1, H+2, W+2, Cin)   padded input tile (one batch element)
    # w_ref : (9*Cin, Cout)        taps stacked row-major over (ky, kx)
    # b_ref : (1, Cout)            conv bias
    # y_ref : (1, H*W, Cout)       raw conv output (pre-BN)
    # s_ref, ss_ref: (1, 1, Cout)  per-channel sum / sum-of-squares of this tile
    _, hp, wp, cin = xp_ref.shape
    h, w = hp - 2, wp - 2
    cout = y_ref.shape[-1]

    xp = xp_ref[0]          # (H+2, W+2, Cin)
    wk = w_ref[...]         # (9*Cin, Cout)

    acc = jnp.zeros((h * w, cout), jnp.float32)
    for k in range(9):      # static unroll over the 9 taps
        ky, kx = k // 3, k % 3
        patch = xp[ky:ky + h, kx:kx + w, :].reshape(h * w, cin)
        acc = acc + jnp.dot(patch, wk[k * cin:(k + 1) * cin, :],
                            preferred_element_type=jnp.float32)
    acc = acc + b_ref[...]  # (1, Cout) broadcast

    y_ref[0] = acc.astype(y_ref.dtype)
    s_ref[0] = jnp.sum(acc, axis=0, keepdims=True)
    ss_ref[0] = jnp.sum(acc * acc, axis=0, keepdims=True)


def _conv3x3_stats(xp, w_flat, b_row):
    """xp: (N, H+2, W+2, Cin) padded; w_flat: (9*Cin, Cout); b_row: (1, Cout)."""
    n, hp, wp, cin = xp.shape
    h, wd = hp - 2, wp - 2
    cout = w_flat.shape[-1]
    return pl.pallas_call(
        _conv3x3_kernel,
        out_shape=(
            jax.ShapeDtypeStruct((n, h * wd, cout), jnp.float32),
            jax.ShapeDtypeStruct((n, 1, cout), jnp.float32),
            jax.ShapeDtypeStruct((n, 1, cout), jnp.float32),
        ),
        grid_spec=pltpu.PrefetchScalarGridSpec(
            num_scalar_prefetch=0,
            grid=(n,),
            in_specs=[
                pl.BlockSpec((1, hp, wp, cin), lambda i: (i, 0, 0, 0)),
                pl.BlockSpec((9 * cin, cout), lambda i: (0, 0)),
                pl.BlockSpec((1, cout), lambda i: (0, 0)),
            ],
            out_specs=(
                pl.BlockSpec((1, h * wd, cout), lambda i: (i, 0, 0)),
                pl.BlockSpec((1, 1, cout), lambda i: (i, 0, 0)),
                pl.BlockSpec((1, 1, cout), lambda i: (i, 0, 0)),
            ),
        ),
        compiler_params=pltpu.CompilerParams(
            dimension_semantics=("parallel",),
            vmem_limit_bytes=_VMEM_LIMIT,
        ),
    )(xp, w_flat, b_row)


# ---------------------------------------------------------------------------
# Kernel 2/3: fused BN affine (+ optional residual add) + ReLU, on a lane-dense
# (rows, C) 2-D view.  scale = gamma*rsqrt(var+eps), shift = beta - mean*scale
# are folded per channel in the wrapper -> one FMA + max per element.
# ---------------------------------------------------------------------------
def _bn_act_kernel(y_ref, scale_ref, shift_ref, o_ref):
    o_ref[...] = jnp.maximum(
        y_ref[...] * scale_ref[...] + shift_ref[...], 0.0
    ).astype(o_ref.dtype)


def _bn_add_act_kernel(y_ref, x_ref, scale_ref, shift_ref, o_ref):
    o_ref[...] = jnp.maximum(
        x_ref[...] + y_ref[...] * scale_ref[...] + shift_ref[...], 0.0
    ).astype(o_ref.dtype)


def _pick_row_block(total, target=1024):
    if total <= target:
        return total
    for cand in range(target, 7, -1):
        if cand % 8 == 0 and total % cand == 0:
            return cand
    return total


def _elementwise_call(kernel, arrays, scale, shift):
    total, c = arrays[0].shape
    rows = _pick_row_block(total)
    row_spec = pl.BlockSpec((rows, c), lambda i: (i, 0))
    vec_spec = pl.BlockSpec((1, c), lambda i: (0, 0))
    return pl.pallas_call(
        kernel,
        out_shape=jax.ShapeDtypeStruct((total, c), arrays[0].dtype),
        grid_spec=pltpu.PrefetchScalarGridSpec(
            num_scalar_prefetch=0,
            grid=(total // rows,),
            in_specs=[row_spec] * len(arrays) + [vec_spec, vec_spec],
            out_specs=row_spec,
        ),
        compiler_params=pltpu.CompilerParams(
            dimension_semantics=("parallel",),
            vmem_limit_bytes=_VMEM_LIMIT,
        ),
    )(*arrays, scale, shift)


# ---------------------------------------------------------------------------
# BatchNorm stats finalization: tiny O(C) per-channel math done in the wrapper.
# ---------------------------------------------------------------------------
def _bn_scale_shift(s, ss, gamma, beta, count, eps=EPS):
    total = jnp.sum(s, axis=(0, 1))        # (C,)
    total_sq = jnp.sum(ss, axis=(0, 1))    # (C,)
    mean = total / count
    var = total_sq / count - mean * mean   # biased variance (training-mode BN)
    scale = gamma * jax.lax.rsqrt(var + eps)
    shift = beta - mean * scale
    return scale.reshape(1, -1), shift.reshape(1, -1)


# ---------------------------------------------------------------------------
# Full ResNetBlock forward (downsample=False): relu(x + bn2(conv2(relu(bn1(conv1(x))))))
# ---------------------------------------------------------------------------
def resnet_block_forward(x_nchw, params, eps=EPS):
    w1, b1, g1, be1, w2, b2, g2, be2 = params
    n, c, h, w = x_nchw.shape
    count = n * h * w

    x = jnp.transpose(x_nchw, (0, 2, 3, 1)).astype(jnp.float32)   # NHWC

    # conv1 (+ bn1 partial stats, fused into the conv kernel)
    xp = jnp.pad(x, ((0, 0), (1, 1), (1, 1), (0, 0)))
    y1, s1, ss1 = _conv3x3_stats(xp, w1.reshape(9 * c, -1), b1.reshape(1, -1))
    c1 = y1.shape[-1]
    scale1, shift1 = _bn_scale_shift(s1, ss1, g1, be1, count, eps)

    # bn1 affine + relu (fused elementwise kernel)
    a1 = _elementwise_call(_bn_act_kernel, [y1.reshape(n * h * w, c1)],
                           scale1, shift1)
    a1 = a1.reshape(n, h, w, c1)

    # conv2 (+ bn2 partial stats)
    a1p = jnp.pad(a1, ((0, 0), (1, 1), (1, 1), (0, 0)))
    y2, s2, ss2 = _conv3x3_stats(a1p, w2.reshape(9 * c1, -1), b2.reshape(1, -1))
    c2 = y2.shape[-1]
    scale2, shift2 = _bn_scale_shift(s2, ss2, g2, be2, count, eps)

    # bn2 affine + residual add + relu (fused elementwise kernel)
    out2d = _elementwise_call(
        _bn_add_act_kernel,
        [y2.reshape(n * h * w, c2), x.reshape(n * h * w, c)],
        scale2, shift2)
    out = out2d.reshape(n, h, w, c2)
    return jnp.transpose(out, (0, 3, 1, 2))                        # back to NCHW


# ---------------------------------------------------------------------------
# Pure-JAX reference (training-mode BatchNorm, same semantics) for validation.
# ---------------------------------------------------------------------------
def _reference_forward(x_nchw, params, eps=EPS):
    w1, b1, g1, be1, w2, b2, g2, be2 = params

    def conv(x, wgt, b):
        y = jax.lax.conv_general_dilated(
            x, wgt, window_strides=(1, 1), padding="SAME",
            dimension_numbers=("NHWC", "HWIO", "NHWC"),
            precision=jax.lax.Precision.HIGHEST)
        return y + b

    def bn(y, gamma, beta):
        mean = jnp.mean(y, axis=(0, 1, 2))
        var = jnp.mean((y - mean) ** 2, axis=(0, 1, 2))
        return gamma * (y - mean) * jax.lax.rsqrt(var + eps) + beta

    x = jnp.transpose(x_nchw, (0, 2, 3, 1))
    h1 = jax.nn.relu(bn(conv(x, w1, b1), g1, be1))
    h2 = bn(conv(h1, w2, b2), g2, be2)
    out = jax.nn.relu(x + h2)
    return jnp.transpose(out, (0, 3, 1, 2))


if __name__ == "__main__":
    key = jax.random.PRNGKey(0)
    kx, kw1, kb1, kw2, kb2, kg1, kg2 = jax.random.split(key, 7)

    # downsample=False => in_channels == out_channels for the identity skip.
    n, c, h, w = 2, 32, 16, 16
    x = jax.random.normal(kx, (n, c, h, w), dtype=jnp.float32)

    w1 = 0.1 * jax.random.normal(kw1, (3, 3, c, c), dtype=jnp.float32)   # HWIO
    b1 = 0.1 * jax.random.normal(kb1, (c,), dtype=jnp.float32)
    g1 = 1.0 + 0.1 * jax.random.normal(kg1, (c,), dtype=jnp.float32)
    be1 = jnp.full((c,), 0.05, dtype=jnp.float32)

    w2 = 0.1 * jax.random.normal(kw2, (3, 3, c, c), dtype=jnp.float32)   # HWIO
    b2 = 0.1 * jax.random.normal(kb2, (c,), dtype=jnp.float32)
    g2 = 1.0 + 0.1 * jax.random.normal(kg2, (c,), dtype=jnp.float32)
    be2 = jnp.full((c,), -0.05, dtype=jnp.float32)

    params = (w1, b1, g1, be1, w2, b2, g2, be2)

    fwd = jax.jit(resnet_block_forward)
    y = fwd(x, params)
    jax.block_until_ready(y)

    y_ref = _reference_forward(x, params)
    assert y.shape == x.shape
    # Tolerance covers MXU f32 pass precision and the one-pass E[x^2]-mean^2 variance.
    assert jnp.allclose(y, y_ref, atol=2e-2, rtol=2e-2), (
        "mismatch vs reference, max abs err = "
        f"{float(jnp.max(jnp.abs(y - y_ref)))}")

    print("KERNEL_OK")
</pallas_src>

<mosaic_0001>
module attributes {stable_mosaic.version = 11 : i64} {
  func.func @_conv3x3_kernel(%arg0: i32, %arg1: memref<1x18x18x32xf32, #tpu.memory_space<vmem>>, %arg2: memref<288x32xf32, #tpu.memory_space<vmem>>, %arg3: memref<1x32xf32, #tpu.memory_space<vmem>>, %arg4: memref<1x256x32xf32, #tpu.memory_space<vmem>>, %arg5: memref<1x1x32xf32, #tpu.memory_space<vmem>>, %arg6: memref<1x1x32xf32, #tpu.memory_space<vmem>>) attributes {dimension_semantics = [#tpu.dimension_semantics<parallel>], iteration_bounds = array<i64: 2>, scalar_prefetch = 0 : i64, scratch_operands = 0 : i64, tpu.core_type = #tpu.core_type<tc>, window_params = [{transform_indices = @transform_0, window_bounds = array<i64: 1, 18, 18, 32>}, {pipeline_mode = #tpu.pipeline_mode<synchronous>, transform_indices = @transform_1, window_bounds = array<i64: 288, 32>}, {pipeline_mode = #tpu.pipeline_mode<synchronous>, transform_indices = @transform_2, window_bounds = array<i64: 1, 32>}, {transform_indices = @transform_3, window_bounds = array<i64: 1, 256, 32>}, {transform_indices = @transform_4, window_bounds = array<i64: 1, 1, 32>}, {transform_indices = @transform_5, window_bounds = array<i64: 1, 1, 32>}]} {
    %c0 = arith.constant 0 : index
    %c0_0 = arith.constant 0 : index
    %c0_1 = arith.constant 0 : index
    %c0_2 = arith.constant 0 : index
    %0 = vector.load %arg1[%c0, %c0_0, %c0_1, %c0_2] : memref<1x18x18x32xf32, #tpu.memory_space<vmem>>, vector<1x18x18x32xf32>
    %1 = vector.shape_cast %0 : vector<1x18x18x32xf32> to vector<18x18x32xf32>
    %c0_3 = arith.constant 0 : index
    %c0_4 = arith.constant 0 : index
    %2 = vector.load %arg2[%c0_3, %c0_4] : memref<288x32xf32, #tpu.memory_space<vmem>>, vector<288x32xf32>
    %cst = arith.constant 0.000000e+00 : f32
    %3 = vector.broadcast %cst : f32 to vector<256x32xf32>
    %4 = vector.extract_strided_slice %1 {offsets = [0, 0, 0], sizes = [16, 16, 32], strides = [1, 1, 1]} : vector<18x18x32xf32> to vector<16x16x32xf32>
    %5 = vector.shape_cast %4 : vector<16x16x32xf32> to vector<256x32xf32>
    %6 = vector.extract_strided_slice %2 {offsets = [0, 0], sizes = [32, 32], strides = [1, 1]} : vector<288x32xf32> to vector<32x32xf32>
    %cst_5 = arith.constant dense<0.000000e+00> : vector<256x32xf32>
    %7 = tpu.matmul %5, %6, %cst_5 {dimension_numbers = #tpu.dot_dimension_numbers<[1], [0], [0], [1], [0, 0, 1, 1], [], []>} : vector<256x32xf32>, vector<32x32xf32>, vector<256x32xf32> -> vector<256x32xf32>
    %8 = arith.addf %3, %7 : vector<256x32xf32>
    %9 = vector.extract_strided_slice %1 {offsets = [0, 1, 0], sizes = [16, 16, 32], strides = [1, 1, 1]} : vector<18x18x32xf32> to vector<16x16x32xf32>
    %10 = vector.shape_cast %9 : vector<16x16x32xf32> to vector<256x32xf32>
    %11 = vector.extract_strided_slice %2 {offsets = [32, 0], sizes = [32, 32], strides = [1, 1]} : vector<288x32xf32> to vector<32x32xf32>
    %cst_6 = arith.constant dense<0.000000e+00> : vector<256x32xf32>
    %12 = tpu.matmul %10, %11, %cst_6 {dimension_numbers = #tpu.dot_dimension_numbers<[1], [0], [0], [1], [0, 0, 1, 1], [], []>} : vector<256x32xf32>, vector<32x32xf32>, vector<256x32xf32> -> vector<256x32xf32>
    %13 = arith.addf %8, %12 : vector<256x32xf32>
    %14 = vector.extract_strided_slice %1 {offsets = [0, 2, 0], sizes = [16, 16, 32], strides = [1, 1, 1]} : vector<18x18x32xf32> to vector<16x16x32xf32>
    %15 = vector.shape_cast %14 : vector<16x16x32xf32> to vector<256x32xf32>
    %16 = vector.extract_strided_slice %2 {offsets = [64, 0], sizes = [32, 32], strides = [1, 1]} : vector<288x32xf32> to vector<32x32xf32>
    %cst_7 = arith.constant dense<0.000000e+00> : vector<256x32xf32>
    %17 = tpu.matmul %15, %16, %cst_7 {dimension_numbers = #tpu.dot_dimension_numbers<[1], [0], [0], [1], [0, 0, 1, 1], [], []>} : vector<256x32xf32>, vector<32x32xf32>, vector<256x32xf32> -> vector<256x32xf32>
    %18 = arith.addf %13, %17 : vector<256x32xf32>
    %19 = vector.extract_strided_slice %1 {offsets = [1, 0, 0], sizes = [16, 16, 32], strides = [1, 1, 1]} : vector<18x18x32xf32> to vector<16x16x32xf32>
    %20 = vector.shape_cast %19 : vector<16x16x32xf32> to vector<256x32xf32>
    %21 = vector.extract_strided_slice %2 {offsets = [96, 0], sizes = [32, 32], strides = [1, 1]} : vector<288x32xf32> to vector<32x32xf32>
    %cst_8 = arith.constant dense<0.000000e+00> : vector<256x32xf32>
    %22 = tpu.matmul %20, %21, %cst_8 {dimension_numbers = #tpu.dot_dimension_numbers<[1], [0], [0], [1], [0, 0, 1, 1], [], []>} : vector<256x32xf32>, vector<32x32xf32>, vector<256x32xf32> -> vector<256x32xf32>
    %23 = arith.addf %18, %22 : vector<256x32xf32>
    %24 = vector.extract_strided_slice %1 {offsets = [1, 1, 0], sizes = [16, 16, 32], strides = [1, 1, 1]} : vector<18x18x32xf32> to vector<16x16x32xf32>
    %25 = vector.shape_cast %24 : vector<16x16x32xf32> to vector<256x32xf32>
    %26 = vector.extract_strided_slice %2 {offsets = [128, 0], sizes = [32, 32], strides = [1, 1]} : vector<288x32xf32> to vector<32x32xf32>
    %cst_9 = arith.constant dense<0.000000e+00> : vector<256x32xf32>
    %27 = tpu.matmul %25, %26, %cst_9 {dimension_numbers = #tpu.dot_dimension_numbers<[1], [0], [0], [1], [0, 0, 1, 1], [], []>} : vector<256x32xf32>, vector<32x32xf32>, vector<256x32xf32> -> vector<256x32xf32>
    %28 = arith.addf %23, %27 : vector<256x32xf32>
    %29 = vector.extract_strided_slice %1 {offsets = [1, 2, 0], sizes = [16, 16, 32], strides = [1, 1, 1]} : vector<18x18x32xf32> to vector<16x16x32xf32>
    %30 = vector.shape_cast %29 : vector<16x16x32xf32> to vector<256x32xf32>
    %31 = vector.extract_strided_slice %2 {offsets = [160, 0], sizes = [32, 32], strides = [1, 1]} : vector<288x32xf32> to vector<32x32xf32>
    %cst_10 = arith.constant dense<0.000000e+00> : vector<256x32xf32>
    %32 = tpu.matmul %30, %31, %cst_10 {dimension_numbers = #tpu.dot_dimension_numbers<[1], [0], [0], [1], [0, 0, 1, 1], [], []>} : vector<256x32xf32>, vector<32x32xf32>, vector<256x32xf32> -> vector<256x32xf32>
    %33 = arith.addf %28, %32 : vector<256x32xf32>
    %34 = vector.extract_strided_slice %1 {offsets = [2, 0, 0], sizes = [16, 16, 32], strides = [1, 1, 1]} : vector<18x18x32xf32> to vector<16x16x32xf32>
    %35 = vector.shape_cast %34 : vector<16x16x32xf32> to vector<256x32xf32>
    %36 = vector.extract_strided_slice %2 {offsets = [192, 0], sizes = [32, 32], strides = [1, 1]} : vector<288x32xf32> to vector<32x32xf32>
    %cst_11 = arith.constant dense<0.000000e+00> : vector<256x32xf32>
    %37 = tpu.matmul %35, %36, %cst_11 {dimension_numbers = #tpu.dot_dimension_numbers<[1], [0], [0], [1], [0, 0, 1, 1], [], []>} : vector<256x32xf32>, vector<32x32xf32>, vector<256x32xf32> -> vector<256x32xf32>
    %38 = arith.addf %33, %37 : vector<256x32xf32>
    %39 = vector.extract_strided_slice %1 {offsets = [2, 1, 0], sizes = [16, 16, 32], strides = [1, 1, 1]} : vector<18x18x32xf32> to vector<16x16x32xf32>
    %40 = vector.shape_cast %39 : vector<16x16x32xf32> to vector<256x32xf32>
    %41 = vector.extract_strided_slice %2 {offsets = [224, 0], sizes = [32, 32], strides = [1, 1]} : vector<288x32xf32> to vector<32x32xf32>
    %cst_12 = arith.constant dense<0.000000e+00> : vector<256x32xf32>
    %42 = tpu.matmul %40, %41, %cst_12 {dimension_numbers = #tpu.dot_dimension_numbers<[1], [0], [0], [1], [0, 0, 1, 1], [], []>} : vector<256x32xf32>, vector<32x32xf32>, vector<256x32xf32> -> vector<256x32xf32>
    %43 = arith.addf %38, %42 : vector<256x32xf32>
    %44 = vector.extract_strided_slice %1 {offsets = [2, 2, 0], sizes = [16, 16, 32], strides = [1, 1, 1]} : vector<18x18x32xf32> to vector<16x16x32xf32>
    %45 = vector.shape_cast %44 : vector<16x16x32xf32> to vector<256x32xf32>
    %46 = vector.extract_strided_slice %2 {offsets = [256, 0], sizes = [32, 32], strides = [1, 1]} : vector<288x32xf32> to vector<32x32xf32>
    %cst_13 = arith.constant dense<0.000000e+00> : vector<256x32xf32>
    %47 = tpu.matmul %45, %46, %cst_13 {dimension_numbers = #tpu.dot_dimension_numbers<[1], [0], [0], [1], [0, 0, 1, 1], [], []>} : vector<256x32xf32>, vector<32x32xf32>, vector<256x32xf32> -> vector<256x32xf32>
    %48 = arith.addf %43, %47 : vector<256x32xf32>
    %c0_14 = arith.constant 0 : index
    %c0_15 = arith.constant 0 : index
    %49 = vector.load %arg3[%c0_14, %c0_15] : memref<1x32xf32, #tpu.memory_space<vmem>>, vector<1x32xf32>
    %50 = vector.broadcast %49 : vector<1x32xf32> to vector<256x32xf32>
    %51 = arith.addf %48, %50 : vector<256x32xf32>
    %c0_16 = arith.constant 0 : index
    %c0_17 = arith.constant 0 : index
    %c0_18 = arith.constant 0 : index
    %52 = vector.load %arg4[%c0_16, %c0_17, %c0_18] : memref<1x256x32xf32, #tpu.memory_space<vmem>>, vector<1x256x32xf32>
    %53 = vector.shape_cast %52 : vector<1x256x32xf32> to vector<256x32xf32>
    %54 = vector.shape_cast %51 : vector<256x32xf32> to vector<1x256x32xf32>
    tpu.vector_store %arg4[%c0_16, %c0_17, %c0_18], %54 {strides = array<i32>} : memref<1x256x32xf32, #tpu.memory_space<vmem>>, vector<1x256x32xf32>,
    %cst_19 = arith.constant dense<0.000000e+00> : vector<32xf32>
    %55 = vector.multi_reduction <add>, %51, %cst_19 [0] : vector<256x32xf32> to vector<32xf32>
    %56 = vector.shape_cast %55 : vector<32xf32> to vector<1x32xf32>
    %c0_20 = arith.constant 0 : index
    %c0_21 = arith.constant 0 : index
    %c0_22 = arith.constant 0 : index
    %57 = vector.load %arg5[%c0_20, %c0_21, %c0_22] : memref<1x1x32xf32, #tpu.memory_space<vmem>>, vector<1x1x32xf32>
    %58 = vector.shape_cast %57 : vector<1x1x32xf32> to vector<1x32xf32>
    %59 = vector.shape_cast %56 : vector<1x32xf32> to vector<1x1x32xf32>
    tpu.vector_store %arg5[%c0_20, %c0_21, %c0_22], %59 {strides = array<i32>} : memref<1x1x32xf32, #tpu.memory_space<vmem>>, vector<1x1x32xf32>,
    %60 = arith.mulf %51, %51 : vector<256x32xf32>
    %cst_23 = arith.constant dense<0.000000e+00> : vector<32xf32>
    %61 = vector.multi_reduction <add>, %60, %cst_23 [0] : vector<256x32xf32> to vector<32xf32>
    %62 = vector.shape_cast %61 : vector<32xf32> to vector<1x32xf32>
    %c0_24 = arith.constant 0 : index
    %c0_25 = arith.constant 0 : index
    %c0_26 = arith.constant 0 : index
    %63 = vector.load %arg6[%c0_24, %c0_25, %c0_26] : memref<1x1x32xf32, #tpu.memory_space<vmem>>, vector<1x1x32xf32>
    %64 = vector.shape_cast %63 : vector<1x1x32xf32> to vector<1x32xf32>
    %65 = vector.shape_cast %62 : vector<1x32xf32> to vector<1x1x32xf32>
    tpu.vector_store %arg6[%c0_24, %c0_25, %c0_26], %65 {strides = array<i32>} : memref<1x1x32xf32, #tpu.memory_space<vmem>>, vector<1x1x32xf32>,
    return
  }
  func.func @transform_0(%arg0: i32) -> (i32, i32, i32, i32) {
    %c0_i32 = arith.constant 0 : i32
    %c0_i32_0 = arith.constant 0 : i32
    %c0_i32_1 = arith.constant 0 : i32
    %c0_i32_2 = arith.constant 0 : i32
    return %arg0, %c0_i32, %c0_i32_0, %c0_i32_1 : i32, i32, i32, i32
  }
  func.func @transform_1(%arg0: i32) -> (i32, i32) {
    %c0_i32 = arith.constant 0 : i32
    %c0_i32_0 = arith.constant 0 : i32
    %c0_i32_1 = arith.constant 0 : i32
    return %c0_i32, %c0_i32_0 : i32, i32
  }
  func.func @transform_2(%arg0: i32) -> (i32, i32) {
    %c0_i32 = arith.constant 0 : i32
    %c0_i32_0 = arith.constant 0 : i32
    %c0_i32_1 = arith.constant 0 : i32
    return %c0_i32, %c0_i32_0 : i32, i32
  }
  func.func @transform_3(%arg0: i32) -> (i32, i32, i32) {
    %c0_i32 = arith.constant 0 : i32
    %c0_i32_0 = arith.constant 0 : i32
    %c0_i32_1 = arith.constant 0 : i32
    return %arg0, %c0_i32, %c0_i32_0 : i32, i32, i32
  }
  func.func @transform_4(%arg0: i32) -> (i32, i32, i32) {
    %c0_i32 = arith.constant 0 : i32
    %c0_i32_0 = arith.constant 0 : i32
    %c0_i32_1 = arith.constant 0 : i32
    return %arg0, %c0_i32, %c0_i32_0 : i32, i32, i32
  }
  func.func @transform_5(%arg0: i32) -> (i32, i32, i32) {
    %c0_i32 = arith.constant 0 : i32
    %c0_i32_0 = arith.constant 0 : i32
    %c0_i32_1 = arith.constant 0 : i32
    return %arg0, %c0_i32, %c0_i32_0 : i32, i32, i32
  }
}

module attributes {stable_mosaic.version = 11 : i64} {
  func.func @_bn_act_kernel(%arg0: i32, %arg1: memref<512x32xf32, #tpu.memory_space<vmem>>, %arg2: memref<1x32xf32, #tpu.memory_space<vmem>>, %arg3: memref<1x32xf32, #tpu.memory_space<vmem>>, %arg4: memref<512x32xf32, #tpu.memory_space<vmem>>) attributes {dimension_semantics = [#tpu.dimension_semantics<parallel>], iteration_bounds = array<i64: 1>, scalar_prefetch = 0 : i64, scratch_operands = 0 : i64, tpu.core_type = #tpu.core_type<tc>, window_params = [{transform_indices = @transform_0, window_bounds = array<i64: 512, 32>}, {pipeline_mode = #tpu.pipeline_mode<synchronous>, transform_indices = @transform_1, window_bounds = array<i64: 1, 32>}, {pipeline_mode = #tpu.pipeline_mode<synchronous>, transform_indices = @transform_2, window_bounds = array<i64: 1, 32>}, {transform_indices = @transform_3, window_bounds = array<i64: 512, 32>}]} {
    %c0 = arith.constant 0 : index
    %c0_0 = arith.constant 0 : index
    %0 = vector.load %arg1[%c0, %c0_0] : memref<512x32xf32, #tpu.memory_space<vmem>>, vector<512x32xf32>
    %c0_1 = arith.constant 0 : index
    %c0_2 = arith.constant 0 : index
    %1 = vector.load %arg2[%c0_1, %c0_2] : memref<1x32xf32, #tpu.memory_space<vmem>>, vector<1x32xf32>
    %2 = vector.broadcast %1 : vector<1x32xf32> to vector<512x32xf32>
    %3 = arith.mulf %0, %2 : vector<512x32xf32>
    %c0_3 = arith.constant 0 : index
    %c0_4 = arith.constant 0 : index
    %4 = vector.load %arg3[%c0_3, %c0_4] : memref<1x32xf32, #tpu.memory_space<vmem>>, vector<1x32xf32>
    %5 = vector.broadcast %4 : vector<1x32xf32> to vector<512x32xf32>
    %6 = arith.addf %3, %5 : vector<512x32xf32>
    %cst = arith.constant 0.000000e+00 : f32
    %7 = vector.broadcast %cst : f32 to vector<512x32xf32>
    %8 = arith.maximumf %6, %7 : vector<512x32xf32>
    %c0_5 = arith.constant 0 : index
    %c0_6 = arith.constant 0 : index
    %9 = vector.load %arg4[%c0_5, %c0_6] : memref<512x32xf32, #tpu.memory_space<vmem>>, vector<512x32xf32>
    tpu.vector_store %arg4[%c0_5, %c0_6], %8 {strides = array<i32>} : memref<512x32xf32, #tpu.memory_space<vmem>>, vector<512x32xf32>,
    return
  }
  func.func @transform_0(%arg0: i32) -> (i32, i32) {
    %c0_i32 = arith.constant 0 : i32
    %c0_i32_0 = arith.constant 0 : i32
    return %arg0, %c0_i32 : i32, i32
  }
  func.func @transform_1(%arg0: i32) -> (i32, i32) {
    %c0_i32 = arith.constant 0 : i32
    %c0_i32_0 = arith.constant 0 : i32
    %c0_i32_1 = arith.constant 0 : i32
    return %c0_i32, %c0_i32_0 : i32, i32
  }
  func.func @transform_2(%arg0: i32) -> (i32, i32) {
    %c0_i32 = arith.constant 0 : i32
    %c0_i32_0 = arith.constant 0 : i32
    %c0_i32_1 = arith.constant 0 : i32
    return %c0_i32, %c0_i32_0 : i32, i32
  }
  func.func @transform_3(%arg0: i32) -> (i32, i32) {
    %c0_i32 = arith.constant 0 : i32
    %c0_i32_0 = arith.constant 0 : i32
    return %arg0, %c0_i32 : i32, i32
  }
}

module attributes {stable_mosaic.version = 11 : i64} {
  func.func @_bn_add_act_kernel(%arg0: i32, %arg1: memref<512x32xf32, #tpu.memory_space<vmem>>, %arg2: memref<512x32xf32, #tpu.memory_space<vmem>>, %arg3: memref<1x32xf32, #tpu.memory_space<vmem>>, %arg4: memref<1x32xf32, #tpu.memory_space<vmem>>, %arg5: memref<512x32xf32, #tpu.memory_space<vmem>>) attributes {dimension_semantics = [#tpu.dimension_semantics<parallel>], iteration_bounds = array<i64: 1>, scalar_prefetch = 0 : i64, scratch_operands = 0 : i64, tpu.core_type = #tpu.core_type<tc>, window_params = [{transform_indices = @transform_0, window_bounds = array<i64: 512, 32>}, {transform_indices = @transform_1, window_bounds = array<i64: 512, 32>}, {pipeline_mode = #tpu.pipeline_mode<synchronous>, transform_indices = @transform_2, window_bounds = array<i64: 1, 32>}, {pipeline_mode = #tpu.pipeline_mode<synchronous>, transform_indices = @transform_3, window_bounds = array<i64: 1, 32>}, {transform_indices = @transform_4, window_bounds = array<i64: 512, 32>}]} {
    %c0 = arith.constant 0 : index
    %c0_0 = arith.constant 0 : index
    %0 = vector.load %arg2[%c0, %c0_0] : memref<512x32xf32, #tpu.memory_space<vmem>>, vector<512x32xf32>
    %c0_1 = arith.constant 0 : index
    %c0_2 = arith.constant 0 : index
    %1 = vector.load %arg1[%c0_1, %c0_2] : memref<512x32xf32, #tpu.memory_space<vmem>>, vector<512x32xf32>
    %c0_3 = arith.constant 0 : index
    %c0_4 = arith.constant 0 : index
    %2 = vector.load %arg3[%c0_3, %c0_4] : memref<1x32xf32, #tpu.memory_space<vmem>>, vector<1x32xf32>
    %3 = vector.broadcast %2 : vector<1x32xf32> to vector<512x32xf32>
    %4 = arith.mulf %1, %3 : vector<512x32xf32>
    %5 = arith.addf %0, %4 : vector<512x32xf32>
    %c0_5 = arith.constant 0 : index
    %c0_6 = arith.constant 0 : index
    %6 = vector.load %arg4[%c0_5, %c0_6] : memref<1x32xf32, #tpu.memory_space<vmem>>, vector<1x32xf32>
    %7 = vector.broadcast %6 : vector<1x32xf32> to vector<512x32xf32>
    %8 = arith.addf %5, %7 : vector<512x32xf32>
    %cst = arith.constant 0.000000e+00 : f32
    %9 = vector.broadcast %cst : f32 to vector<512x32xf32>
    %10 = arith.maximumf %8, %9 : vector<512x32xf32>
    %c0_7 = arith.constant 0 : index
    %c0_8 = arith.constant 0 : index
    %11 = vector.load %arg5[%c0_7, %c0_8] : memref<512x32xf32, #tpu.memory_space<vmem>>, vector<512x32xf32>
    tpu.vector_store %arg5[%c0_7, %c0_8], %10 {strides = array<i32>} : memref<512x32xf32, #tpu.memory_space<vmem>>, vector<512x32xf32>,
    return
  }
  func.func @transform_0(%arg0: i32) -> (i32, i32) {
    %c0_i32 = arith.constant 0 : i32
    %c0_i32_0 = arith.constant 0 : i32
    return %arg0, %c0_i32 : i32, i32
  }
  func.func @transform_1(%arg0: i32) -> (i32, i32) {
    %c0_i32 = arith.constant 0 : i32
    %c0_i32_0 = arith.constant 0 : i32
    return %arg0, %c0_i32 : i32, i32
  }
  func.func @transform_2(%arg0: i32) -> (i32, i32) {
    %c0_i32 = arith.constant 0 : i32
    %c0_i32_0 = arith.constant 0 : i32
    %c0_i32_1 = arith.constant 0 : i32
    return %c0_i32, %c0_i32_0 : i32, i32
  }
  func.func @transform_3(%arg0: i32) -> (i32, i32) {
    %c0_i32 = arith.constant 0 : i32
    %c0_i32_0 = arith.constant 0 : i32
    %c0_i32_1 = arith.constant 0 : i32
    return %c0_i32, %c0_i32_0 : i32, i32
  }
  func.func @transform_4(%arg0: i32) -> (i32, i32) {
    %c0_i32 = arith.constant 0 : i32
    %c0_i32_0 = arith.constant 0 : i32
    return %arg0, %c0_i32 : i32, i32
  }
}

</mosaic_0001>

<bundles_post_ra>
// kernel: resnet_block_forward.5
= control target key start
LH: loop header
LB: loop body
LE: loop exit
PB: predicated region body
PF: predicated region fallthrough
CT: control target
= control target key end

     0   :  { %vm284_vm0 = vcmask 261120   ;;  %s961_s0 = inlined_call_operand.vmem [shape: f32[512,32], index: 0, kind: input, shape index: {}]   ;;  %s962_s1 = inlined_call_operand.vmem [shape: f32[1,32], index: 1, kind: input, shape index: {}]   ;;  %s963_s2 = inlined_call_operand.vmem [shape: f32[1,32], index: 2, kind: input, shape index: {}]   ;;  %s964_s3 = inlined_call_operand.vmem [shape: f32[512,32], index: 3, kind: output, shape index: {}]  }
   0x1   :  { %v14_v0 = vld [vmem:[%s961_s0] sm:$0xff]  ;;  %v15_v4 = vld [vmem:[%s961_s0 + $0x8] sm:$0xff]  ;;  %v16_v5 = vld [vmem:[%s961_s0 + $0x10] sm:$0xff] }
   0x2   :  { %v381_v1 = vld [vmem:[%s962_s1] ss:$0 sm:$0xff]  ;;  %v17_v6 = vld [vmem:[%s961_s0 + $0x18] sm:$0xff]  ;;  %v19_v11 = vld [vmem:[%s961_s0 + $0x28] sm:$0xff] }
   0x3   :  { %v386_v2 = vld [vmem:[%s963_s2] ss:$0 sm:$0xff]  ;;  %v85_v3 = vmul.f32 %v381_v1, %v14_v0  ;;  %v86_v7 = vmul.f32 %v381_v1, %v15_v4  ;;  %v87_v8 = vmul.f32 %v381_v1, %v16_v5  ;;  %v88_v9 = vmul.f32 %v381_v1, %v17_v6  ;;  %v20_v12 = vld [vmem:[%s961_s0 + $0x30] sm:$0xff]  ;;  %v21_v17 = vld [vmem:[%s961_s0 + $0x38] sm:$0xff] }
   0x4   :  { %v18_v10 = vld [vmem:[%s961_s0 + $0x20] sm:$0xff]  ;;  %v90_v15 = vmul.f32 %v381_v1, %v19_v11  ;;  %v91_v16 = vmul.f32 %v381_v1, %v20_v12  ;;  %v92_v21 = vmul.f32 %v381_v1, %v21_v17  ;;  %v23_v27 = vld [vmem:[%s961_s0 + $0x48] sm:$0xff]  ;;  %v24_v28 = vld [vmem:[%s961_s0 + $0x50] sm:$0xff] }
   0x5   :  { %v156_v13 = vadd.f32 %v386_v2, %v85_v3  ;;  %v89_v14 = vmul.f32 %v381_v1, %v18_v10  ;;  %v157_v18 = vadd.f32 %v386_v2, %v86_v7  ;;  %v158_v19 = vadd.f32 %v386_v2, %v87_v8  ;;  %v22_v22 = vld [vmem:[%s961_s0 + $0x40] sm:$0xff]  ;;  %v25_v29 = vld [vmem:[%s961_s0 + $0x58] sm:$0xff]  ;;  %v27_v35 = vld [vmem:[%s961_s0 + $0x68] sm:$0xff] }
   0x6   :  { %v159_v20 = vadd.f32 %v386_v2, %v88_v9  ;;  %v161_v25 = vadd.f32 %v386_v2, %v90_v15  ;;  %v162_v26 = vadd.f32 %v386_v2, %v91_v16  ;;  %v163_v33 = vadd.f32 %v386_v2, %v92_v21  ;;  %v26_v34 = vld [vmem:[%s961_s0 + $0x60] sm:$0xff]  ;;  %v28_v36 = vld [vmem:[%s961_s0 + $0x70] sm:$0xff]  ;;  %v29_v41 = vld [vmem:[%s961_s0 + $0x78] sm:$0xff] }
   0x7   :  { %v220_v23 = vmax.f32 %v156_v13, 0.0  ;;  %v160_v24 = vadd.f32 %v386_v2, %v89_v14  ;;  %v221_v30 = vmax.f32 %v157_v18, 0.0  ;;  %v222_v31 = vmax.f32 %v158_v19, 0.0  ;;  %v30_v54 = vld [vmem:[%s961_s0 + $0x80] sm:$0xff]  ;;  %v31_v59 = vld [vmem:[%s961_s0 + $0x88] sm:$0xff]  ;;  %v32_v60 = vld [vmem:[%s961_s0 + $0x90] sm:$0xff] }
   0x8   :  { %v223_v32 = vmax.f32 %v159_v20, 0.0  ;;  %v225_v38 = vmax.f32 %v161_v25, 0.0  ;;  %v226_v39 = vmax.f32 %v162_v26, 0.0  ;;  %v93_v40 = vmul.f32 %v381_v1, %v22_v22  ;;  %v33_v61 = vld [vmem:[%s961_s0 + $0x98] sm:$0xff]  ;;  %v34_v4 = vld [vmem:[%s961_s0 + $0xa0] sm:$0xff]  ;;  %v35_v5 = vld [vmem:[%s961_s0 + $0xa8] sm:$0xff] }
   0x9   :  { %285 = vst.msk [vmem:[%s964_s3] sm:$0xff] %vm284_vm0, %v220_v23  ;;  %v224_v37 = vmax.f32 %v160_v24, 0.0  ;;  %286 = vst.msk [vmem:[%s964_s3 + $0x8] sm:$0xff] %vm284_vm0, %v221_v30  ;;  %v227_v42 = vmax.f32 %v163_v33, 0.0  ;;  %v94_v43 = vmul.f32 %v381_v1, %v23_v27  ;;  %v95_v44 = vmul.f32 %v381_v1, %v24_v28  ;;  %v36_v6 = vld [vmem:[%s961_s0 + $0xb0] sm:$0xff]  ;;  %v37_v11 = vld [vmem:[%s961_s0 + $0xb8] sm:$0xff] }
   0xa   :  { %287 = vst.msk [vmem:[%s964_s3 + $0x10] sm:$0xff] %vm284_vm0, %v222_v31  ;;  %288 = vst.msk [vmem:[%s964_s3 + $0x18] sm:$0xff] %vm284_vm0, %v223_v32  ;;  %v96_v45 = vmul.f32 %v381_v1, %v25_v29  ;;  %v164_v46 = vadd.f32 %v386_v2, %v93_v40  ;;  %v97_v47 = vmul.f32 %v381_v1, %v26_v34  ;;  %v38_v24 = vld [vmem:[%s961_s0 + $0xc0] sm:$0xff]  ;;  %v39_v29 = vld [vmem:[%s961_s0 + $0xc8] sm:$0xff] }
   0xb   :  { %289 = vst.msk [vmem:[%s964_s3 + $0x20] sm:$0xff] %vm284_vm0, %v224_v37  ;;  %290 = vst.msk [vmem:[%s964_s3 + $0x28] sm:$0xff] %vm284_vm0, %v225_v38  ;;  %v98_v48 = vmul.f32 %v381_v1, %v27_v35  ;;  %v99_v49 = vmul.f32 %v381_v1, %v28_v36  ;;  %v165_v50 = vadd.f32 %v386_v2, %v94_v43  ;;  %v40_v30 = vld [vmem:[%s961_s0 + $0xd0] sm:$0xff]  ;;  %v41_v31 = vld [vmem:[%s961_s0 + $0xd8] sm:$0xff] }
   0xc   :  { %291 = vst.msk [vmem:[%s964_s3 + $0x30] sm:$0xff] %vm284_vm0, %v226_v39  ;;  %292 = vst.msk [vmem:[%s964_s3 + $0x38] sm:$0xff] %vm284_vm0, %v227_v42  ;;  %v166_v51 = vadd.f32 %v386_v2, %v95_v44  ;;  %v167_v52 = vadd.f32 %v386_v2, %v96_v45  ;;  %v100_v53 = vmul.f32 %v381_v1, %v29_v41  ;;  %v228_v55 = vmax.f32 %v164_v46, 0.0  ;;  %v42_v36 = vld [vmem:[%s961_s0 + $0xe0] sm:$0xff]  ;;  %v43_v37 = vld [vmem:[%s961_s0 + $0xe8] sm:$0xff] }
   0xd   :  { %v168_v56 = vadd.f32 %v386_v2, %v97_v47  ;;  %v169_v57 = vadd.f32 %v386_v2, %v98_v48  ;;  %v170_v58 = vadd.f32 %v386_v2, %v99_v49  ;;  %v229_v62 = vmax.f32 %v165_v50, 0.0  ;;  %v44_v38 = vld [vmem:[%s961_s0 + $0xf0] sm:$0xff]  ;;  %v45_v43 = vld [vmem:[%s961_s0 + $0xf8] sm:$0xff] }
   0xe   :  { %v230_v63 = vmax.f32 %v166_v51, 0.0  ;;  %v231_v0 = vmax.f32 %v167_v52, 0.0  ;;  %v171_v3 = vadd.f32 %v386_v2, %v100_v53  ;;  %293 = vst.msk [vmem:[%s964_s3 + $0x40] sm:$0xff] %vm284_vm0, %v228_v55  ;;  %v101_v10 = vmul.f32 %v381_v1, %v30_v54 }
   0xf   :  { %v232_v7 = vmax.f32 %v168_v56, 0.0  ;;  %v233_v8 = vmax.f32 %v169_v57, 0.0  ;;  %v234_v9 = vmax.f32 %v170_v58, 0.0  ;;  %294 = vst.msk [vmem:[%s964_s3 + $0x48] sm:$0xff] %vm284_vm0, %v229_v62  ;;  %v102_v13 = vmul.f32 %v381_v1, %v31_v59  ;;  %v46_v56 = vld [vmem:[%s961_s0 + $0x100] sm:$0xff]  ;;  %v48_v62 = vld [vmem:[%s961_s0 + $0x110] sm:$0xff] }
  0x10   :  { %295 = vst.msk [vmem:[%s964_s3 + $0x50] sm:$0xff] %vm284_vm0, %v230_v63  ;;  %296 = vst.msk [vmem:[%s964_s3 + $0x58] sm:$0xff] %vm284_vm0, %v231_v0  ;;  %v235_v12 = vmax.f32 %v171_v3, 0.0  ;;  %v103_v14 = vmul.f32 %v381_v1, %v32_v60  ;;  %v104_v15 = vmul.f32 %v381_v1, %v33_v61  ;;  %v172_v16 = vadd.f32 %v386_v2, %v101_v10  ;;  %v47_v61 = vld [vmem:[%s961_s0 + $0x108] sm:$0xff]  ;;  %v49_v63 = vld [vmem:[%s961_s0 + $0x118] sm:$0xff] }
  0x11   :  { %297 = vst.msk [vmem:[%s964_s3 + $0x60] sm:$0xff] %vm284_vm0, %v232_v7  ;;  %298 = vst.msk [vmem:[%s964_s3 + $0x68] sm:$0xff] %vm284_vm0, %v233_v8  ;;  %v105_v17 = vmul.f32 %v381_v1, %v34_v4  ;;  %v106_v18 = vmul.f32 %v381_v1, %v35_v5  ;;  %v107_v19 = vmul.f32 %v381_v1, %v36_v6  ;;  %v50_v6 = vld [vmem:[%s961_s0 + $0x120] sm:$0xff]  ;;  %v51_v7 = vld [vmem:[%s961_s0 + $0x128] sm:$0xff] }
  0x12   :  { %299 = vst.msk [vmem:[%s964_s3 + $0x70] sm:$0xff] %vm284_vm0, %v234_v9  ;;  %300 = vst.msk [vmem:[%s964_s3 + $0x78] sm:$0xff] %vm284_vm0, %v235_v12  ;;  %v173_v20 = vadd.f32 %v386_v2, %v102_v13  ;;  %v174_v21 = vadd.f32 %v386_v2, %v103_v14  ;;  %v175_v22 = vadd.f32 %v386_v2, %v104_v15  ;;  %v236_v25 = vmax.f32 %v172_v16, 0.0  ;;  %v52_v8 = vld [vmem:[%s961_s0 + $0x130] sm:$0xff]  ;;  %v53_v13 = vld [vmem:[%s961_s0 + $0x138] sm:$0xff] }
  0x13   :  { %v108_v23 = vmul.f32 %v381_v1, %v37_v11  ;;  %v176_v26 = vadd.f32 %v386_v2, %v105_v17  ;;  %v177_v27 = vadd.f32 %v386_v2, %v106_v18  ;;  %v178_v28 = vadd.f32 %v386_v2, %v107_v19 }
  0x14   :  { %v237_v32 = vmax.f32 %v173_v20, 0.0  ;;  %v238_v33 = vmax.f32 %v174_v21, 0.0  ;;  %v239_v34 = vmax.f32 %v175_v22, 0.0  ;;  %301 = vst.msk [vmem:[%s964_s3 + $0x80] sm:$0xff] %vm284_vm0, %v236_v25  ;;  %v109_v42 = vmul.f32 %v381_v1, %v38_v24 }
  0x15   :  { %v179_v35 = vadd.f32 %v386_v2, %v108_v23  ;;  %v240_v39 = vmax.f32 %v176_v26, 0.0  ;;  %v241_v40 = vmax.f32 %v177_v27, 0.0  ;;  %v242_v41 = vmax.f32 %v178_v28, 0.0  ;;  %v54_v26 = vld [vmem:[%s961_s0 + $0x140] sm:$0xff] }
  0x16   :  { %302 = vst.msk [vmem:[%s964_s3 + $0x88] sm:$0xff] %vm284_vm0, %v237_v32  ;;  %303 = vst.msk [vmem:[%s964_s3 + $0x90] sm:$0xff] %vm284_vm0, %v238_v33  ;;  %v110_v45 = vmul.f32 %v381_v1, %v39_v29  ;;  %v111_v46 = vmul.f32 %v381_v1, %v40_v30  ;;  %v112_v47 = vmul.f32 %v381_v1, %v41_v31  ;;  %v55_v31 = vld [vmem:[%s961_s0 + $0x148] sm:$0xff]  ;;  %v56_v32 = vld [vmem:[%s961_s0 + $0x150] sm:$0xff] }
  0x17   :  { %304 = vst.msk [vmem:[%s964_s3 + $0x98] sm:$0xff] %vm284_vm0, %v239_v34  ;;  %v243_v44 = vmax.f32 %v179_v35, 0.0  ;;  %305 = vst.msk [vmem:[%s964_s3 + $0xa0] sm:$0xff] %vm284_vm0, %v240_v39  ;;  %v180_v48 = vadd.f32 %v386_v2, %v109_v42  ;;  %v113_v49 = vmul.f32 %v381_v1, %v42_v36  ;;  %v114_v50 = vmul.f32 %v381_v1, %v43_v37  ;;  %v57_v33 = vld [vmem:[%s961_s0 + $0x158] sm:$0xff]  ;;  %v59_v39 = vld [vmem:[%s961_s0 + $0x168] sm:$0xff] }
  0x18   :  { %306 = vst.msk [vmem:[%s964_s3 + $0xa8] sm:$0xff] %vm284_vm0, %v241_v40  ;;  %307 = vst.msk [vmem:[%s964_s3 + $0xb0] sm:$0xff] %vm284_vm0, %v242_v41  ;;  %v115_v51 = vmul.f32 %v381_v1, %v44_v38  ;;  %v181_v52 = vadd.f32 %v386_v2, %v110_v45  ;;  %v182_v53 = vadd.f32 %v386_v2, %v111_v46  ;;  %v58_v38 = vld [vmem:[%s961_s0 + $0x160] sm:$0xff]  ;;  %v60_v40 = vld [vmem:[%s961_s0 + $0x170] sm:$0xff] }
  0x19   :  { %308 = vst.msk [vmem:[%s964_s3 + $0xb8] sm:$0xff] %vm284_vm0, %v243_v44  ;;  %v183_v54 = vadd.f32 %v386_v2, %v112_v47  ;;  %v116_v55 = vmul.f32 %v381_v1, %v45_v43  ;;  %v244_v57 = vmax.f32 %v180_v48, 0.0  ;;  %v184_v58 = vadd.f32 %v386_v2, %v113_v49  ;;  %v61_v45 = vld [vmem:[%s961_s0 + $0x178] sm:$0xff] }
  0x1a   :  { %v185_v59 = vadd.f32 %v386_v2, %v114_v50  ;;  %v186_v60 = vadd.f32 %v386_v2, %v115_v51  ;;  %v245_v0 = vmax.f32 %v181_v52, 0.0  ;;  %v246_v3 = vmax.f32 %v182_v53, 0.0 }
  0x1b   :  { %v247_v4 = vmax.f32 %v183_v54, 0.0  ;;  %v187_v5 = vadd.f32 %v386_v2, %v116_v55  ;;  %309 = vst.msk [vmem:[%s964_s3 + $0xc0] sm:$0xff] %vm284_vm0, %v244_v57  ;;  %v248_v9 = vmax.f32 %v184_v58, 0.0  ;;  %v117_v12 = vmul.f32 %v381_v1, %v46_v56  ;;  %v62_v58 = vld [vmem:[%s961_s0 + $0x180] sm:$0xff] }
  0x1c   :  { %v249_v10 = vmax.f32 %v185_v59, 0.0  ;;  %v250_v11 = vmax.f32 %v186_v60, 0.0  ;;  %310 = vst.msk [vmem:[%s964_s3 + $0xc8] sm:$0xff] %vm284_vm0, %v245_v0  ;;  %311 = vst.msk [vmem:[%s964_s3 + $0xd0] sm:$0xff] %vm284_vm0, %v246_v3  ;;  %v118_v15 = vmul.f32 %v381_v1, %v47_v61  ;;  %v119_v16 = vmul.f32 %v381_v1, %v48_v62  ;;  %v64_v0 = vld [vmem:[%s961_s0 + $0x190] sm:$0xff]  ;;  %v65_v3 = vld [vmem:[%s961_s0 + $0x198] sm:$0xff] }
  0x1d   :  { %312 = vst.msk [vmem:[%s964_s3 + $0xd8] sm:$0xff] %vm284_vm0, %v247_v4  ;;  %v251_v14 = vmax.f32 %v187_v5, 0.0  ;;  %v120_v17 = vmul.f32 %v381_v1, %v49_v63  ;;  %313 = vst.msk [vmem:[%s964_s3 + $0xe0] sm:$0xff] %vm284_vm0, %v248_v9  ;;  %v188_v18 = vadd.f32 %v386_v2, %v117_v12  ;;  %v121_v19 = vmul.f32 %v381_v1, %v50_v6  ;;  %v63_v63 = vld [vmem:[%s961_s0 + $0x188] sm:$0xff] }
  0x1e   :  { %314 = vst.msk [vmem:[%s964_s3 + $0xe8] sm:$0xff] %vm284_vm0, %v249_v10  ;;  %315 = vst.msk [vmem:[%s964_s3 + $0xf0] sm:$0xff] %vm284_vm0, %v250_v11  ;;  %v122_v20 = vmul.f32 %v381_v1, %v51_v7  ;;  %v123_v21 = vmul.f32 %v381_v1, %v52_v8  ;;  %v189_v22 = vadd.f32 %v386_v2, %v118_v15  ;;  %v66_v8 = vld [vmem:[%s961_s0 + $0x1a0] sm:$0xff]  ;;  %v67_v9 = vld [vmem:[%s961_s0 + $0x1a8] sm:$0xff] }
  0x1f   :  { %316 = vst.msk [vmem:[%s964_s3 + $0xf8] sm:$0xff] %vm284_vm0, %v251_v14  ;;  %v190_v23 = vadd.f32 %v386_v2, %v119_v16  ;;  %v191_v24 = vadd.f32 %v386_v2, %v120_v17  ;;  %v124_v25 = vmul.f32 %v381_v1, %v53_v13  ;;  %v252_v27 = vmax.f32 %v188_v18, 0.0  ;;  %v68_v10 = vld [vmem:[%s961_s0 + $0x1b0] sm:$0xff]  ;;  %v69_v15 = vld [vmem:[%s961_s0 + $0x1b8] sm:$0xff] }
  0x20   :  { %v192_v28 = vadd.f32 %v386_v2, %v121_v19  ;;  %v193_v29 = vadd.f32 %v386_v2, %v122_v20  ;;  %v194_v30 = vadd.f32 %v386_v2, %v123_v21  ;;  %v253_v34 = vmax.f32 %v189_v22, 0.0 }
  0x21   :  { %v254_v35 = vmax.f32 %v190_v23, 0.0  ;;  %v255_v36 = vmax.f32 %v191_v24, 0.0  ;;  %v195_v37 = vadd.f32 %v386_v2, %v124_v25  ;;  %317 = vst.msk [vmem:[%s964_s3 + $0x100] sm:$0xff] %vm284_vm0, %v252_v27  ;;  %v125_v44 = vmul.f32 %v381_v1, %v54_v26 }
  0x22   :  { %v256_v41 = vmax.f32 %v192_v28, 0.0  ;;  %v257_v42 = vmax.f32 %v193_v29, 0.0  ;;  %v258_v43 = vmax.f32 %v194_v30, 0.0  ;;  %318 = vst.msk [vmem:[%s964_s3 + $0x108] sm:$0xff] %vm284_vm0, %v253_v34  ;;  %v126_v47 = vmul.f32 %v381_v1, %v55_v31  ;;  %v70_v28 = vld [vmem:[%s961_s0 + $0x1c0] sm:$0xff]  ;;  %v72_v34 = vld [vmem:[%s961_s0 + $0x1d0] sm:$0xff] }
  0x23   :  { %319 = vst.msk [vmem:[%s964_s3 + $0x110] sm:$0xff] %vm284_vm0, %v254_v35  ;;  %320 = vst.msk [vmem:[%s964_s3 + $0x118] sm:$0xff] %vm284_vm0, %v255_v36  ;;  %v259_v46 = vmax.f32 %v195_v37, 0.0  ;;  %v127_v48 = vmul.f32 %v381_v1, %v56_v32  ;;  %v128_v49 = vmul.f32 %v381_v1, %v57_v33  ;;  %v196_v50 = vadd.f32 %v386_v2, %v125_v44  ;;  %v71_v33 = vld [vmem:[%s961_s0 + $0x1c8] sm:$0xff]  ;;  %v73_v35 = vld [vmem:[%s961_s0 + $0x1d8] sm:$0xff] }
  0x24   :  { %321 = vst.msk [vmem:[%s964_s3 + $0x120] sm:$0xff] %vm284_vm0, %v256_v41  ;;  %322 = vst.msk [vmem:[%s964_s3 + $0x128] sm:$0xff] %vm284_vm0, %v257_v42  ;;  %v129_v51 = vmul.f32 %v381_v1, %v58_v38  ;;  %v130_v52 = vmul.f32 %v381_v1, %v59_v39  ;;  %v131_v53 = vmul.f32 %v381_v1, %v60_v40  ;;  %v74_v40 = vld [vmem:[%s961_s0 + $0x1e0] sm:$0xff]  ;;  %v75_v41 = vld [vmem:[%s961_s0 + $0x1e8] sm:$0xff] }
  0x25   :  { %323 = vst.msk [vmem:[%s964_s3 + $0x130] sm:$0xff] %vm284_vm0, %v258_v43  ;;  %324 = vst.msk [vmem:[%s964_s3 + $0x138] sm:$0xff] %vm284_vm0, %v259_v46  ;;  %v197_v54 = vadd.f32 %v386_v2, %v126_v47  ;;  %v198_v55 = vadd.f32 %v386_v2, %v127_v48  ;;  %v199_v56 = vadd.f32 %v386_v2, %v128_v49  ;;  %v260_v59 = vmax.f32 %v196_v50, 0.0  ;;  %v76_v42 = vld [vmem:[%s961_s0 + $0x1f0] sm:$0xff]  ;;  %v77_v47 = vld [vmem:[%s961_s0 + $0x1f8] sm:$0xff] }
  0x26   :  { %v132_v57 = vmul.f32 %v381_v1, %v61_v45  ;;  %v200_v60 = vadd.f32 %v386_v2, %v129_v51  ;;  %v201_v61 = vadd.f32 %v386_v2, %v130_v52  ;;  %v202_v62 = vadd.f32 %v386_v2, %v131_v53 }
  0x27   :  { %v261_v4 = vmax.f32 %v197_v54, 0.0  ;;  %v262_v5 = vmax.f32 %v198_v55, 0.0  ;;  %v263_v6 = vmax.f32 %v199_v56, 0.0  ;;  %325 = vst.msk [vmem:[%s964_s3 + $0x140] sm:$0xff] %vm284_vm0, %v260_v59  ;;  %v133_v14 = vmul.f32 %v381_v1, %v62_v58 }
  0x28   :  { %v203_v7 = vadd.f32 %v386_v2, %v132_v57  ;;  %v264_v11 = vmax.f32 %v200_v60, 0.0  ;;  %v265_v12 = vmax.f32 %v201_v61, 0.0  ;;  %v266_v13 = vmax.f32 %v202_v62, 0.0 }
  0x29   :  { %326 = vst.msk [vmem:[%s964_s3 + $0x148] sm:$0xff] %vm284_vm0, %v261_v4  ;;  %327 = vst.msk [vmem:[%s964_s3 + $0x150] sm:$0xff] %vm284_vm0, %v262_v5  ;;  %v134_v17 = vmul.f32 %v381_v1, %v63_v63  ;;  %v135_v18 = vmul.f32 %v381_v1, %v64_v0  ;;  %v136_v19 = vmul.f32 %v381_v1, %v65_v3 }
  0x2a   :  { %328 = vst.msk [vmem:[%s964_s3 + $0x158] sm:$0xff] %vm284_vm0, %v263_v6  ;;  %v267_v16 = vmax.f32 %v203_v7, 0.0  ;;  %329 = vst.msk [vmem:[%s964_s3 + $0x160] sm:$0xff] %vm284_vm0, %v264_v11  ;;  %v204_v20 = vadd.f32 %v386_v2, %v133_v14  ;;  %v137_v21 = vmul.f32 %v381_v1, %v66_v8  ;;  %v138_v22 = vmul.f32 %v381_v1, %v67_v9 }
  0x2b   :  { %330 = vst.msk [vmem:[%s964_s3 + $0x168] sm:$0xff] %vm284_vm0, %v265_v12  ;;  %331 = vst.msk [vmem:[%s964_s3 + $0x170] sm:$0xff] %vm284_vm0, %v266_v13  ;;  %v139_v23 = vmul.f32 %v381_v1, %v68_v10  ;;  %v205_v24 = vadd.f32 %v386_v2, %v134_v17  ;;  %v206_v25 = vadd.f32 %v386_v2, %v135_v18 }
  0x2c   :  { %332 = vst.msk [vmem:[%s964_s3 + $0x178] sm:$0xff] %vm284_vm0, %v267_v16  ;;  %v207_v26 = vadd.f32 %v386_v2, %v136_v19  ;;  %v140_v27 = vmul.f32 %v381_v1, %v69_v15  ;;  %v268_v29 = vmax.f32 %v204_v20, 0.0  ;;  %v208_v30 = vadd.f32 %v386_v2, %v137_v21 }
  0x2d   :  { %v209_v31 = vadd.f32 %v386_v2, %v138_v22  ;;  %v210_v32 = vadd.f32 %v386_v2, %v139_v23  ;;  %v269_v36 = vmax.f32 %v205_v24, 0.0  ;;  %v270_v37 = vmax.f32 %v206_v25, 0.0 }
  0x2e   :  { %v271_v38 = vmax.f32 %v207_v26, 0.0  ;;  %v211_v39 = vadd.f32 %v386_v2, %v140_v27  ;;  %333 = vst.msk [vmem:[%s964_s3 + $0x180] sm:$0xff] %vm284_vm0, %v268_v29  ;;  %v272_v43 = vmax.f32 %v208_v30, 0.0  ;;  %v141_v46 = vmul.f32 %v381_v1, %v70_v28 }
  0x2f   :  { %v273_v44 = vmax.f32 %v209_v31, 0.0  ;;  %v274_v45 = vmax.f32 %v210_v32, 0.0  ;;  %334 = vst.msk [vmem:[%s964_s3 + $0x188] sm:$0xff] %vm284_vm0, %v269_v36  ;;  %335 = vst.msk [vmem:[%s964_s3 + $0x190] sm:$0xff] %vm284_vm0, %v270_v37  ;;  %v142_v49 = vmul.f32 %v381_v1, %v71_v33  ;;  %v143_v50 = vmul.f32 %v381_v1, %v72_v34 }
  0x30   :  { %336 = vst.msk [vmem:[%s964_s3 + $0x198] sm:$0xff] %vm284_vm0, %v271_v38  ;;  %v275_v48 = vmax.f32 %v211_v39, 0.0  ;;  %v144_v51 = vmul.f32 %v381_v1, %v73_v35  ;;  %337 = vst.msk [vmem:[%s964_s3 + $0x1a0] sm:$0xff] %vm284_vm0, %v272_v43  ;;  %v212_v52 = vadd.f32 %v386_v2, %v141_v46  ;;  %v145_v53 = vmul.f32 %v381_v1, %v74_v40 }
  0x31   :  { %338 = vst.msk [vmem:[%s964_s3 + $0x1a8] sm:$0xff] %vm284_vm0, %v273_v44  ;;  %339 = vst.msk [vmem:[%s964_s3 + $0x1b0] sm:$0xff] %vm284_vm0, %v274_v45  ;;  %v146_v54 = vmul.f32 %v381_v1, %v75_v41  ;;  %v147_v55 = vmul.f32 %v381_v1, %v76_v42  ;;  %v213_v56 = vadd.f32 %v386_v2, %v142_v49 }
  0x32   :  { %340 = vst.msk [vmem:[%s964_s3 + $0x1b8] sm:$0xff] %vm284_vm0, %v275_v48  ;;  %v214_v57 = vadd.f32 %v386_v2, %v143_v50  ;;  %v215_v58 = vadd.f32 %v386_v2, %v144_v51  ;;  %v148_v59 = vmul.f32 %v381_v1, %v77_v47  ;;  %v276_v60 = vmax.f32 %v212_v52, 0.0 }
  0x33   :  { %v216_v61 = vadd.f32 %v386_v2, %v145_v53  ;;  %v217_v62 = vadd.f32 %v386_v2, %v146_v54  ;;  %v218_v63 = vadd.f32 %v386_v2, %v147_v55  ;;  %v277_v0 = vmax.f32 %v213_v56, 0.0 }
  0x34   :  { %v278_v3 = vmax.f32 %v214_v57, 0.0  ;;  %v279_v4 = vmax.f32 %v215_v58, 0.0  ;;  %v219_v5 = vadd.f32 %v386_v2, %v148_v59  ;;  %341 = vst.msk [vmem:[%s964_s3 + $0x1c0] sm:$0xff] %vm284_vm0, %v276_v60 }
  0x35   :  { %v280_v6 = vmax.f32 %v216_v61, 0.0  ;;  %v281_v7 = vmax.f32 %v217_v62, 0.0  ;;  %v282_v1 = vmax.f32 %v218_v63, 0.0  ;;  %342 = vst.msk [vmem:[%s964_s3 + $0x1c8] sm:$0xff] %vm284_vm0, %v277_v0 }
  0x36   :  { %343 = vst.msk [vmem:[%s964_s3 + $0x1d0] sm:$0xff] %vm284_vm0, %v278_v3  ;;  %344 = vst.msk [vmem:[%s964_s3 + $0x1d8] sm:$0xff] %vm284_vm0, %v279_v4  ;;  %v283_v2 = vmax.f32 %v219_v5, 0.0 }
  0x37   :  { %345 = vst.msk [vmem:[%s964_s3 + $0x1e0] sm:$0xff] %vm284_vm0, %v280_v6  ;;  %346 = vst.msk [vmem:[%s964_s3 + $0x1e8] sm:$0xff] %vm284_vm0, %v281_v7 }
  0x38   :  { %347 = vst.msk [vmem:[%s964_s3 + $0x1f0] sm:$0xff] %vm284_vm0, %v282_v1  ;;  %348 = vst.msk [vmem:[%s964_s3 + $0x1f8] sm:$0xff] %vm284_vm0, %v283_v2 }

// kernel: resnet_block_forward.7
= control target key start
LH: loop header
LB: loop body
LE: loop exit
PB: predicated region body
PF: predicated region fallthrough
CT: control target
= control target key end

     0   :  { %vm416_vm0 = vcmask 261120   ;;  %s1152_s0 = inlined_call_operand.vmem [shape: f32[512,32], index: 0, kind: input, shape index: {}]   ;;  %s1153_s1 = inlined_call_operand.vmem [shape: f32[512,32], index: 1, kind: input, shape index: {}]   ;;  %s1154_s2 = inlined_call_operand.vmem [shape: f32[1,32], index: 2, kind: input, shape index: {}]   ;;  %s1155_s3 = inlined_call_operand.vmem [shape: f32[1,32], index: 3, kind: input, shape index: {}]   ;;  %s1156_s4 = inlined_call_operand.hbm [shape: f32[512,32], index: 4, kind: output, shape index: {}]  }
   0x1   :  { %v18_v0 = vld [vmem:[%s1153_s1] sm:$0xff]  ;;  %v19_v5 = vld [vmem:[%s1153_s1 + $0x8] sm:$0xff]  ;;  %v20_v8 = vld [vmem:[%s1153_s1 + $0x10] sm:$0xff] }
   0x2   :  { %v82_v1 = vld [vmem:[%s1152_s0] sm:$0xff]  ;;  %v83_v6 = vld [vmem:[%s1152_s0 + $0x8] sm:$0xff]  ;;  %v84_v9 = vld [vmem:[%s1152_s0 + $0x10] sm:$0xff] }
   0x3   :  { %v563_v2 = vld [vmem:[%s1154_s2] ss:$0 sm:$0xff]  ;;  %v21_v10 = vld [vmem:[%s1153_s1 + $0x18] sm:$0xff]  ;;  %v23_v19 = vld [vmem:[%s1153_s1 + $0x28] sm:$0xff] }
   0x4   :  { %v153_v3 = vmul.f32 %v563_v2, %v82_v1  ;;  %v569_v4 = vld [vmem:[%s1155_s3] ss:$0 sm:$0xff]  ;;  %v154_v7 = vmul.f32 %v563_v2, %v83_v6  ;;  %v155_v12 = vmul.f32 %v563_v2, %v84_v9  ;;  %v85_v13 = vld [vmem:[%s1152_s0 + $0x18] sm:$0xff]  ;;  %v87_v20 = vld [vmem:[%s1152_s0 + $0x28] sm:$0xff] }
   0x5   :  { %v22_v14 = vld [vmem:[%s1153_s1 + $0x20] sm:$0xff]  ;;  %v156_v17 = vmul.f32 %v563_v2, %v85_v13  ;;  %v158_v23 = vmul.f32 %v563_v2, %v87_v20  ;;  %v24_v24 = vld [vmem:[%s1153_s1 + $0x30] sm:$0xff]  ;;  %v89_v26 = vld [vmem:[%s1152_s0 + $0x38] sm:$0xff] }
   0x6   :  { %v217_v11 = vadd.f32 %v153_v3, %v18_v0  ;;  %v86_v15 = vld [vmem:[%s1152_s0 + $0x20] sm:$0xff]  ;;  %v218_v16 = vadd.f32 %v154_v7, %v19_v5  ;;  %v219_v22 = vadd.f32 %v155_v12, %v20_v8  ;;  %v88_v25 = vld [vmem:[%s1152_s0 + $0x30] sm:$0xff]  ;;  %v25_v31 = vld [vmem:[%s1153_s1 + $0x38] sm:$0xff]  ;;  %v160_v36 = vmul.f32 %v563_v2, %v89_v26 }
   0x7   :  { %v157_v18 = vmul.f32 %v563_v2, %v86_v15  ;;  %v220_v28 = vadd.f32 %v156_v17, %v21_v10  ;;  %v159_v30 = vmul.f32 %v563_v2, %v88_v25  ;;  %v90_v32 = vld [vmem:[%s1152_s0 + $0x40] sm:$0xff]  ;;  %v222_v35 = vadd.f32 %v158_v23, %v23_v19  ;;  %v91_v37 = vld [vmem:[%s1152_s0 + $0x48] sm:$0xff]  ;;  %v92_v43 = vld [vmem:[%s1152_s0 + $0x50] sm:$0xff] }
   0x8   :  { %v288_v21 = vadd.f32 %v569_v4, %v217_v11  ;;  %v289_v27 = vadd.f32 %v569_v4, %v218_v16  ;;  %v290_v34 = vadd.f32 %v569_v4, %v219_v22  ;;  %v26_v42 = vld [vmem:[%s1153_s1 + $0x40] sm:$0xff]  ;;  %v224_v46 = vadd.f32 %v160_v36, %v25_v31  ;;  %v27_v48 = vld [vmem:[%s1153_s1 + $0x48] sm:$0xff]  ;;  %v93_v49 = vld [vmem:[%s1152_s0 + $0x58] sm:$0xff] }
   0x9   :  { %v221_v29 = vadd.f32 %v157_v18, %v22_v14  ;;  %v291_v39 = vadd.f32 %v569_v4, %v220_v28  ;;  %v223_v41 = vadd.f32 %v159_v30, %v24_v24  ;;  %v293_v45 = vadd.f32 %v569_v4, %v222_v35  ;;  %v94_v50 = vld [vmem:[%s1152_s0 + $0x60] sm:$0xff]  ;;  %v28_v55 = vld [vmem:[%s1153_s1 + $0x50] sm:$0xff]  ;;  %v95_v56 = vld [vmem:[%s1152_s0 + $0x68] sm:$0xff] }
   0xa   :  { %v352_v33 = vmax.f32 %v288_v21, 0.0  ;;  %v353_v38 = vmax.f32 %v289_v27, 0.0  ;;  %v354_v44 = vmax.f32 %v290_v34, 0.0  ;;  %v161_v47 = vmul.f32 %v563_v2, %v90_v32  ;;  %v29_v61 = vld [vmem:[%s1153_s1 + $0x58] sm:$0xff]  ;;  %v30_v62 = vld [vmem:[%s1153_s1 + $0x60] sm:$0xff]  ;;  %v96_v63 = vld [vmem:[%s1152_s0 + $0x70] sm:$0xff] }
   0xb   :  { %v292_v40 = vadd.f32 %v569_v4, %v221_v29  ;;  %v355_v51 = vmax.f32 %v291_v39, 0.0  ;;  %v294_v53 = vadd.f32 %v569_v4, %v223_v41  ;;  %v162_v54 = vmul.f32 %v563_v2, %v91_v37  ;;  %v31_v6 = vld [vmem:[%s1153_s1 + $0x68] sm:$0xff]  ;;  %v97_v7 = vld [vmem:[%s1152_s0 + $0x78] sm:$0xff]  ;;  %v32_v12 = vld [vmem:[%s1153_s1 + $0x70] sm:$0xff] }
   0xc   :  { %417 = vst.msk [vmem:[#allocation2] sm:$0xff] %vm416_vm0, %v352_v33  ;;  %418 = vst.msk [vmem:[#allocation2 + $0x8] sm:$0xff] %vm416_vm0, %v353_v38  ;;  %v357_v57 = vmax.f32 %v293_v45, 0.0  ;;  %v295_v58 = vadd.f32 %v569_v4, %v224_v46  ;;  %v225_v59 = vadd.f32 %v161_v47, %v26_v42  ;;  %v163_v60 = vmul.f32 %v563_v2, %v92_v43  ;;  %v33_v17 = vld [vmem:[%s1153_s1 + $0x78] sm:$0xff]  ;;  %v98_v18 = vld [vmem:[%s1152_s0 + $0x80] sm:$0xff] }
   0xd   :  { %v356_v52 = vmax.f32 %v292_v40, 0.0  ;;  %419 = vst.msk [vmem:[#allocation2 + $0x10] sm:$0xff] %vm416_vm0, %v354_v44  ;;  %420 = vst.msk [vmem:[#allocation2 + $0x18] sm:$0xff] %vm416_vm0, %v355_v51  ;;  %v358_v0 = vmax.f32 %v294_v53, 0.0  ;;  %v226_v1 = vadd.f32 %v162_v54, %v27_v48  ;;  %v164_v3 = vmul.f32 %v563_v2, %v93_v49  ;;  %v99_v23 = vld [vmem:[%s1152_s0 + $0x88] sm:$0xff]  ;;  %v34_v28 = vld [vmem:[%s1153_s1 + $0x80] sm:$0xff] }
   0xe   :  { %v165_v5 = vmul.f32 %v563_v2, %v94_v50  ;;  %422 = vst.msk [vmem:[#allocation2 + $0x28] sm:$0xff] %vm416_vm0, %v357_v57  ;;  %v359_v8 = vmax.f32 %v295_v58, 0.0  ;;  %v296_v9 = vadd.f32 %v569_v4, %v225_v59  ;;  %v227_v10 = vadd.f32 %v163_v60, %v28_v55  ;;  %v100_v29 = vld [vmem:[%s1152_s0 + $0x90] sm:$0xff]  ;;  %v35_v34 = vld [vmem:[%s1153_s1 + $0x88] sm:$0xff]  ;;  %v101_v35 = vld [vmem:[%s1152_s0 + $0x98] sm:$0xff] }
   0xf   :  { %421 = vst.msk [vmem:[#allocation2 + $0x20] sm:$0xff] %vm416_vm0, %v356_v52  ;;  %v166_v11 = vmul.f32 %v563_v2, %v95_v56  ;;  %423 = vst.msk [vmem:[#allocation2 + $0x30] sm:$0xff] %vm416_vm0, %v358_v0  ;;  %v297_v13 = vadd.f32 %v569_v4, %v226_v1  ;;  %v228_v14 = vadd.f32 %v164_v3, %v29_v61  ;;  %v102_v36 = vld [vmem:[%s1152_s0 + $0xa0] sm:$0xff]  ;;  %v36_v41 = vld [vmem:[%s1153_s1 + $0x90] sm:$0xff] }
  0x10   :  { %v229_v15 = vadd.f32 %v165_v5, %v30_v62  ;;  %v167_v16 = vmul.f32 %v563_v2, %v96_v63  ;;  %424 = vst.msk [vmem:[#allocation2 + $0x38] sm:$0xff] %vm416_vm0, %v359_v8  ;;  %v360_v19 = vmax.f32 %v296_v9, 0.0  ;;  %v298_v20 = vadd.f32 %v569_v4, %v227_v10  ;;  %v103_v42 = vld [vmem:[%s1152_s0 + $0xa8] sm:$0xff]  ;;  %v37_v47 = vld [vmem:[%s1153_s1 + $0x98] sm:$0xff]  ;;  %v38_v48 = vld [vmem:[%s1153_s1 + $0xa0] sm:$0xff] }
  0x11   :  { %v230_v21 = vadd.f32 %v166_v11, %v31_v6  ;;  %v168_v22 = vmul.f32 %v563_v2, %v97_v7  ;;  %v361_v24 = vmax.f32 %v297_v13, 0.0  ;;  %v299_v25 = vadd.f32 %v569_v4, %v228_v14  ;;  %v104_v49 = vld [vmem:[%s1152_s0 + $0xb0] sm:$0xff]  ;;  %v39_v54 = vld [vmem:[%s1153_s1 + $0xa8] sm:$0xff]  ;;  %v105_v55 = vld [vmem:[%s1152_s0 + $0xb8] sm:$0xff] }
  0x12   :  { %v300_v26 = vadd.f32 %v569_v4, %v229_v15  ;;  %v231_v27 = vadd.f32 %v167_v16, %v32_v12  ;;  %425 = vst.msk [vmem:[#allocation2 + $0x40] sm:$0xff] %vm416_vm0, %v360_v19  ;;  %v362_v30 = vmax.f32 %v298_v20, 0.0  ;;  %v169_v33 = vmul.f32 %v563_v2, %v98_v18  ;;  %v40_v60 = vld [vmem:[%s1153_s1 + $0xb0] sm:$0xff]  ;;  %v41_v1 = vld [vmem:[%s1153_s1 + $0xb8] sm:$0xff]  ;;  %v106_v3 = vld [vmem:[%s1152_s0 + $0xc0] sm:$0xff] }
  0x13   :  { %v301_v31 = vadd.f32 %v569_v4, %v230_v21  ;;  %v232_v32 = vadd.f32 %v168_v22, %v33_v17  ;;  %426 = vst.msk [vmem:[#allocation2 + $0x48] sm:$0xff] %vm416_vm0, %v361_v24  ;;  %v363_v37 = vmax.f32 %v299_v25, 0.0  ;;  %v170_v40 = vmul.f32 %v563_v2, %v99_v23  ;;  %v107_v9 = vld [vmem:[%s1152_s0 + $0xc8] sm:$0xff]  ;;  %v42_v14 = vld [vmem:[%s1153_s1 + $0xc0] sm:$0xff]  ;;  %v108_v15 = vld [vmem:[%s1152_s0 + $0xd0] sm:$0xff] }
  0x14   :  { %v364_v38 = vmax.f32 %v300_v26, 0.0  ;;  %v302_v39 = vadd.f32 %v569_v4, %v231_v27  ;;  %427 = vst.msk [vmem:[#allocation2 + $0x50] sm:$0xff] %vm416_vm0, %v362_v30  ;;  %v233_v45 = vadd.f32 %v169_v33, %v34_v28  ;;  %v171_v46 = vmul.f32 %v563_v2, %v100_v29  ;;  %v43_v20 = vld [vmem:[%s1153_s1 + $0xc8] sm:$0xff]  ;;  %v109_v21 = vld [vmem:[%s1152_s0 + $0xd8] sm:$0xff]  ;;  %v110_v22 = vld [vmem:[%s1152_s0 + $0xe0] sm:$0xff] }
  0x15   :  { %v365_v43 = vmax.f32 %v301_v31, 0.0  ;;  %v303_v44 = vadd.f32 %v569_v4, %v232_v32  ;;  %428 = vst.msk [vmem:[#allocation2 + $0x58] sm:$0xff] %vm416_vm0, %v363_v37  ;;  %v234_v51 = vadd.f32 %v170_v40, %v35_v34  ;;  %v172_v52 = vmul.f32 %v563_v2, %v101_v35  ;;  %v44_v27 = vld [vmem:[%s1153_s1 + $0xd0] sm:$0xff]  ;;  %v111_v28 = vld [vmem:[%s1152_s0 + $0xe8] sm:$0xff]  ;;  %v45_v33 = vld [vmem:[%s1153_s1 + $0xd8] sm:$0xff] }
  0x16   :  { %429 = vst.msk [vmem:[#allocation2 + $0x60] sm:$0xff] %vm416_vm0, %v364_v38  ;;  %v366_v50 = vmax.f32 %v302_v39, 0.0  ;;  %v173_v53 = vmul.f32 %v563_v2, %v102_v36  ;;  %v304_v57 = vadd.f32 %v569_v4, %v233_v45  ;;  %v235_v58 = vadd.f32 %v171_v46, %v36_v41  ;;  %v46_v34 = vld [vmem:[%s1153_s1 + $0xe0] sm:$0xff]  ;;  %v112_v35 = vld [vmem:[%s1152_s0 + $0xf0] sm:$0xff]  ;;  %v47_v40 = vld [vmem:[%s1153_s1 + $0xe8] sm:$0xff] }
  0x17   :  { %430 = vst.msk [vmem:[#allocation2 + $0x68] sm:$0xff] %vm416_vm0, %v365_v43  ;;  %v367_v56 = vmax.f32 %v303_v44, 0.0  ;;  %v174_v59 = vmul.f32 %v563_v2, %v103_v42  ;;  %v305_v61 = vadd.f32 %v569_v4, %v234_v51  ;;  %v236_v62 = vadd.f32 %v172_v52, %v37_v47  ;;  %v113_v41 = vld [vmem:[%s1152_s0 + $0xf8] sm:$0xff]  ;;  %v48_v46 = vld [vmem:[%s1153_s1 + $0xf0] sm:$0xff]  ;;  %v114_v52 = vld [vmem:[%s1152_s0 + $0x100] sm:$0xff] }
  0x18   :  { %431 = vst.msk [vmem:[#allocation2 + $0x70] sm:$0xff] %vm416_vm0, %v366_v50  ;;  %v237_v63 = vadd.f32 %v173_v53, %v38_v48  ;;  %v175_v0 = vmul.f32 %v563_v2, %v104_v49  ;;  %v368_v5 = vmax.f32 %v304_v57, 0.0  ;;  %v306_v6 = vadd.f32 %v569_v4, %v235_v58  ;;  %v49_v51 = vld [vmem:[%s1153_s1 + $0xf8] sm:$0xff]  ;;  %v115_v57 = vld [vmem:[%s1152_s0 + $0x108] sm:$0xff] }
  0x19   :  { %432 = vst.msk [vmem:[#allocation2 + $0x78] sm:$0xff] %vm416_vm0, %v367_v56  ;;  %v238_v7 = vadd.f32 %v174_v59, %v39_v54  ;;  %v176_v8 = vmul.f32 %v563_v2, %v105_v55  ;;  %v369_v10 = vmax.f32 %v305_v61, 0.0  ;;  %v307_v11 = vadd.f32 %v569_v4, %v236_v62  ;;  %v50_v62 = vld [vmem:[%s1153_s1 + $0x100] sm:$0xff] }
  0x1a   :  { %v308_v12 = vadd.f32 %v569_v4, %v237_v63  ;;  %v239_v13 = vadd.f32 %v175_v0, %v40_v60  ;;  %433 = vst.msk [vmem:[#allocation2 + $0x80] sm:$0xff] %vm416_vm0, %v368_v5  ;;  %v370_v16 = vmax.f32 %v306_v6, 0.0  ;;  %v177_v19 = vmul.f32 %v563_v2, %v106_v3  ;;  %v116_v63 = vld [vmem:[%s1152_s0 + $0x110] sm:$0xff]  ;;  %v51_v6 = vld [vmem:[%s1153_s1 + $0x108] sm:$0xff] }
  0x1b   :  { %v309_v17 = vadd.f32 %v569_v4, %v238_v7  ;;  %v240_v18 = vadd.f32 %v176_v8, %v41_v1  ;;  %434 = vst.msk [vmem:[#allocation2 + $0x88] sm:$0xff] %vm416_vm0, %v369_v10  ;;  %v371_v23 = vmax.f32 %v307_v11, 0.0  ;;  %v178_v26 = vmul.f32 %v563_v2, %v107_v9  ;;  %v117_v7 = vld [vmem:[%s1152_s0 + $0x118] sm:$0xff]  ;;  %v118_v8 = vld [vmem:[%s1152_s0 + $0x120] sm:$0xff] }
  0x1c   :  { %v372_v24 = vmax.f32 %v308_v12, 0.0  ;;  %v310_v25 = vadd.f32 %v569_v4, %v239_v13  ;;  %435 = vst.msk [vmem:[#allocation2 + $0x90] sm:$0xff] %vm416_vm0, %v370_v16  ;;  %v241_v31 = vadd.f32 %v177_v19, %v42_v14  ;;  %v179_v32 = vmul.f32 %v563_v2, %v108_v15  ;;  %v52_v13 = vld [vmem:[%s1153_s1 + $0x110] sm:$0xff]  ;;  %v119_v14 = vld [vmem:[%s1152_s0 + $0x128] sm:$0xff]  ;;  %v53_v19 = vld [vmem:[%s1153_s1 + $0x118] sm:$0xff] }
  0x1d   :  { %v373_v29 = vmax.f32 %v309_v17, 0.0  ;;  %v311_v30 = vadd.f32 %v569_v4, %v240_v18  ;;  %436 = vst.msk [vmem:[#allocation2 + $0x98] sm:$0xff] %vm416_vm0, %v371_v23  ;;  %v242_v37 = vadd.f32 %v178_v26, %v43_v20  ;;  %v180_v38 = vmul.f32 %v563_v2, %v109_v21  ;;  %v54_v20 = vld [vmem:[%s1153_s1 + $0x120] sm:$0xff]  ;;  %v120_v21 = vld [vmem:[%s1152_s0 + $0x130] sm:$0xff]  ;;  %v55_v26 = vld [vmem:[%s1153_s1 + $0x128] sm:$0xff] }
  0x1e   :  { %437 = vst.msk [vmem:[#allocation2 + $0xa0] sm:$0xff] %vm416_vm0, %v372_v24  ;;  %v374_v36 = vmax.f32 %v310_v25, 0.0  ;;  %v181_v39 = vmul.f32 %v563_v2, %v110_v22  ;;  %v312_v43 = vadd.f32 %v569_v4, %v241_v31  ;;  %v243_v44 = vadd.f32 %v179_v32, %v44_v27  ;;  %v121_v27 = vld [vmem:[%s1152_s0 + $0x138] sm:$0xff]  ;;  %v56_v32 = vld [vmem:[%s1153_s1 + $0x130] sm:$0xff] }
  0x1f   :  { %438 = vst.msk [vmem:[#allocation2 + $0xa8] sm:$0xff] %vm416_vm0, %v373_v29  ;;  %v375_v42 = vmax.f32 %v311_v30, 0.0  ;;  %v182_v45 = vmul.f32 %v563_v2, %v111_v28  ;;  %v313_v47 = vadd.f32 %v569_v4, %v242_v37  ;;  %v244_v48 = vadd.f32 %v180_v38, %v45_v33  ;;  %v57_v37 = vld [vmem:[%s1153_s1 + $0x138] sm:$0xff]  ;;  %v122_v38 = vld [vmem:[%s1152_s0 + $0x140] sm:$0xff] }
  0x20   :  { %439 = vst.msk [vmem:[#allocation2 + $0xb0] sm:$0xff] %vm416_vm0, %v374_v36  ;;  %v245_v49 = vadd.f32 %v181_v39, %v46_v34  ;;  %v183_v50 = vmul.f32 %v563_v2, %v112_v35  ;;  %v376_v53 = vmax.f32 %v312_v43, 0.0  ;;  %v314_v54 = vadd.f32 %v569_v4, %v243_v44  ;;  %v123_v43 = vld [vmem:[%s1152_s0 + $0x148] sm:$0xff] }
  0x21   :  { %440 = vst.msk [vmem:[#allocation2 + $0xb8] sm:$0xff] %vm416_vm0, %v375_v42  ;;  %v246_v55 = vadd.f32 %v182_v45, %v47_v40  ;;  %v184_v56 = vmul.f32 %v563_v2, %v113_v41  ;;  %v377_v58 = vmax.f32 %v313_v47, 0.0  ;;  %v315_v59 = vadd.f32 %v569_v4, %v244_v48  ;;  %v58_v48 = vld [vmem:[%s1153_s1 + $0x140] sm:$0xff] }
  0x22   :  { %v316_v60 = vadd.f32 %v569_v4, %v245_v49  ;;  %v247_v61 = vadd.f32 %v183_v50, %v48_v46  ;;  %441 = vst.msk [vmem:[#allocation2 + $0xc0] sm:$0xff] %vm416_vm0, %v376_v53  ;;  %v378_v0 = vmax.f32 %v314_v54, 0.0  ;;  %v185_v5 = vmul.f32 %v563_v2, %v114_v52  ;;  %v124_v49 = vld [vmem:[%s1152_s0 + $0x150] sm:$0xff]  ;;  %v59_v54 = vld [vmem:[%s1153_s1 + $0x148] sm:$0xff] }
  0x23   :  { %v317_v1 = vadd.f32 %v569_v4, %v246_v55  ;;  %v248_v3 = vadd.f32 %v184_v56, %v49_v51  ;;  %442 = vst.msk [vmem:[#allocation2 + $0xc8] sm:$0xff] %vm416_vm0, %v377_v58  ;;  %v379_v9 = vmax.f32 %v315_v59, 0.0  ;;  %v186_v12 = vmul.f32 %v563_v2, %v115_v57  ;;  %v125_v55 = vld [vmem:[%s1152_s0 + $0x158] sm:$0xff]  ;;  %v126_v56 = vld [vmem:[%s1152_s0 + $0x160] sm:$0xff] }
  0x24   :  { %v380_v10 = vmax.f32 %v316_v60, 0.0  ;;  %v318_v11 = vadd.f32 %v569_v4, %v247_v61  ;;  %443 = vst.msk [vmem:[#allocation2 + $0xd0] sm:$0xff] %vm416_vm0, %v378_v0  ;;  %v249_v17 = vadd.f32 %v185_v5, %v50_v62  ;;  %v187_v18 = vmul.f32 %v563_v2, %v116_v63  ;;  %v60_v61 = vld [vmem:[%s1153_s1 + $0x150] sm:$0xff]  ;;  %v61_v62 = vld [vmem:[%s1153_s1 + $0x158] sm:$0xff]  ;;  %v127_v63 = vld [vmem:[%s1152_s0 + $0x168] sm:$0xff] }
  0x25   :  { %v381_v15 = vmax.f32 %v317_v1, 0.0  ;;  %v319_v16 = vadd.f32 %v569_v4, %v248_v3  ;;  %444 = vst.msk [vmem:[#allocation2 + $0xd8] sm:$0xff] %vm416_vm0, %v379_v9  ;;  %v250_v23 = vadd.f32 %v186_v12, %v51_v6  ;;  %v188_v24 = vmul.f32 %v563_v2, %v117_v7  ;;  %v62_v6 = vld [vmem:[%s1153_s1 + $0x160] sm:$0xff]  ;;  %v128_v7 = vld [vmem:[%s1152_s0 + $0x170] sm:$0xff] }
  0x26   :  { %445 = vst.msk [vmem:[#allocation2 + $0xe0] sm:$0xff] %vm416_vm0, %v380_v10  ;;  %v382_v22 = vmax.f32 %v318_v11, 0.0  ;;  %v189_v25 = vmul.f32 %v563_v2, %v118_v8  ;;  %v320_v29 = vadd.f32 %v569_v4, %v249_v17  ;;  %v251_v30 = vadd.f32 %v187_v18, %v52_v13 }
  0x27   :  { %446 = vst.msk [vmem:[#allocation2 + $0xe8] sm:$0xff] %vm416_vm0, %v381_v15  ;;  %v383_v28 = vmax.f32 %v319_v16, 0.0  ;;  %v190_v31 = vmul.f32 %v563_v2, %v119_v14  ;;  %v321_v33 = vadd.f32 %v569_v4, %v250_v23  ;;  %v252_v34 = vadd.f32 %v188_v24, %v53_v19 }
  0x28   :  { %447 = vst.msk [vmem:[#allocation2 + $0xf0] sm:$0xff] %vm416_vm0, %v382_v22  ;;  %v253_v35 = vadd.f32 %v189_v25, %v54_v20  ;;  %v191_v36 = vmul.f32 %v563_v2, %v120_v21  ;;  %v384_v39 = vmax.f32 %v320_v29, 0.0  ;;  %v322_v40 = vadd.f32 %v569_v4, %v251_v30 }
  0x29   :  { %448 = vst.msk [vmem:[#allocation2 + $0xf8] sm:$0xff] %vm416_vm0, %v383_v28  ;;  %v254_v41 = vadd.f32 %v190_v31, %v55_v26  ;;  %v192_v42 = vmul.f32 %v563_v2, %v121_v27  ;;  %v385_v44 = vmax.f32 %v321_v33, 0.0  ;;  %v323_v45 = vadd.f32 %v569_v4, %v252_v34 }
  0x2a   :  { %v324_v46 = vadd.f32 %v569_v4, %v253_v35  ;;  %v255_v47 = vadd.f32 %v191_v36, %v56_v32  ;;  %449 = vst.msk [vmem:[#allocation2 + $0x100] sm:$0xff] %vm416_vm0, %v384_v39  ;;  %v386_v50 = vmax.f32 %v322_v40, 0.0  ;;  %v193_v53 = vmul.f32 %v563_v2, %v122_v38 }
  0x2b   :  { %v325_v51 = vadd.f32 %v569_v4, %v254_v41  ;;  %v256_v52 = vadd.f32 %v192_v42, %v57_v37  ;;  %450 = vst.msk [vmem:[#allocation2 + $0x108] sm:$0xff] %vm416_vm0, %v385_v44  ;;  %v387_v57 = vmax.f32 %v323_v45, 0.0  ;;  %v194_v60 = vmul.f32 %v563_v2, %v123_v43 }
  0x2c   :  { %v388_v58 = vmax.f32 %v324_v46, 0.0  ;;  %v326_v59 = vadd.f32 %v569_v4, %v255_v47  ;;  %451 = vst.msk [vmem:[#allocation2 + $0x110] sm:$0xff] %vm416_vm0, %v386_v50  ;;  %v257_v3 = vadd.f32 %v193_v53, %v58_v48  ;;  %v195_v5 = vmul.f32 %v563_v2, %v124_v49 }
  0x2d   :  { %v389_v0 = vmax.f32 %v325_v51, 0.0  ;;  %v327_v1 = vadd.f32 %v569_v4, %v256_v52 }
  0x2e   :  { %9 = vsyncpa [#allocation3], 0  ;;  %452 = vst.msk [vmem:[#allocation2 + $0x118] sm:$0xff] %vm416_vm0, %v387_v57  ;;  %v390_v8 = vmax.f32 %v326_v59, 0.0  ;;  %v258_v9 = vadd.f32 %v194_v60, %v59_v54  ;;  %v196_v10 = vmul.f32 %v563_v2, %v125_v55  ;;  %v197_v11 = vmul.f32 %v563_v2, %v126_v56  ;;  %v63_v12 = vld [vmem:[%s1153_s1 + $0x168] sm:$0xff]  ;;  %v129_v13 = vld [vmem:[%s1152_s0 + $0x178] sm:$0xff] }
  0x2f   :  { %453 = vst.msk [vmem:[#allocation2 + $0x120] sm:$0xff] %vm416_vm0, %v388_v58  ;;  %454 = vst.msk [vmem:[#allocation2 + $0x128] sm:$0xff] %vm416_vm0, %v389_v0  ;;  %v391_v14 = vmax.f32 %v327_v1, 0.0  ;;  %v328_v15 = vadd.f32 %v569_v4, %v257_v3  ;;  %v259_v16 = vadd.f32 %v195_v5, %v60_v61  ;;  %v198_v17 = vmul.f32 %v563_v2, %v127_v63  ;;  %v64_v18 = vld [vmem:[%s1153_s1 + $0x170] sm:$0xff]  ;;  %v65_v23 = vld [vmem:[%s1153_s1 + $0x178] sm:$0xff] }
  0x30   :  { %455 = vst.msk [vmem:[#allocation2 + $0x130] sm:$0xff] %vm416_vm0, %v390_v8  ;;  %v329_v19 = vadd.f32 %v569_v4, %v258_v9  ;;  %v260_v20 = vadd.f32 %v196_v10, %v61_v62  ;;  %v261_v21 = vadd.f32 %v197_v11, %v62_v6  ;;  %v199_v22 = vmul.f32 %v563_v2, %v128_v7  ;;  %v130_v24 = vld [vmem:[%s1152_s0 + $0x180] sm:$0xff]  ;;  %v131_v29 = vld [vmem:[%s1152_s0 + $0x188] sm:$0xff]  ;;  %v132_v35 = vld [vmem:[%s1152_s0 + $0x190] sm:$0xff] }
  0x31   :  { %456 = vst.msk [vmem:[#allocation2 + $0x138] sm:$0xff] %vm416_vm0, %v391_v14  ;;  %v392_v25 = vmax.f32 %v328_v15, 0.0  ;;  %v330_v26 = vadd.f32 %v569_v4, %v259_v16  ;;  %v262_v27 = vadd.f32 %v198_v17, %v63_v12  ;;  %v200_v28 = vmul.f32 %v563_v2, %v129_v13  ;;  %v66_v34 = vld [vmem:[%s1153_s1 + $0x180] sm:$0xff]  ;;  %v67_v40 = vld [vmem:[%s1153_s1 + $0x188] sm:$0xff]  ;;  %v133_v41 = vld [vmem:[%s1152_s0 + $0x198] sm:$0xff] }
  0x32   :  { %v393_v30 = vmax.f32 %v329_v19, 0.0  ;;  %v331_v31 = vadd.f32 %v569_v4, %v260_v20  ;;  %v332_v32 = vadd.f32 %v569_v4, %v261_v21  ;;  %v263_v33 = vadd.f32 %v199_v22, %v64_v18  ;;  %v134_v42 = vld [vmem:[%s1152_s0 + $0x1a0] sm:$0xff]  ;;  %v68_v47 = vld [vmem:[%s1153_s1 + $0x190] sm:$0xff]  ;;  %v135_v48 = vld [vmem:[%s1152_s0 + $0x1a8] sm:$0xff] }
  0x33   :  { %457 = vst.msk [vmem:[#allocation2 + $0x140] sm:$0xff] %vm416_vm0, %v392_v25  ;;  %v394_v36 = vmax.f32 %v330_v26, 0.0  ;;  %v333_v37 = vadd.f32 %v569_v4, %v262_v27  ;;  %v264_v38 = vadd.f32 %v200_v28, %v65_v23  ;;  %v201_v39 = vmul.f32 %v563_v2, %v130_v24  ;;  %v69_v53 = vld [vmem:[%s1153_s1 + $0x198] sm:$0xff]  ;;  %v70_v54 = vld [vmem:[%s1153_s1 + $0x1a0] sm:$0xff]  ;;  %v136_v55 = vld [vmem:[%s1152_s0 + $0x1b0] sm:$0xff] }
  0x34   :  { %458 = vst.msk [vmem:[#allocation2 + $0x148] sm:$0xff] %vm416_vm0, %v393_v30  ;;  %v395_v43 = vmax.f32 %v331_v31, 0.0  ;;  %v396_v44 = vmax.f32 %v332_v32, 0.0  ;;  %v334_v45 = vadd.f32 %v569_v4, %v263_v33  ;;  %v202_v46 = vmul.f32 %v563_v2, %v131_v29  ;;  %v71_v60 = vld [vmem:[%s1153_s1 + $0x1a8] sm:$0xff]  ;;  %v137_v61 = vld [vmem:[%s1152_s0 + $0x1b8] sm:$0xff]  ;;  %v72_v3 = vld [vmem:[%s1153_s1 + $0x1b0] sm:$0xff] }
  0x35   :  { %459 = vst.msk [vmem:[#allocation2 + $0x150] sm:$0xff] %vm416_vm0, %v394_v36  ;;  %v397_v49 = vmax.f32 %v333_v37, 0.0  ;;  %v335_v50 = vadd.f32 %v569_v4, %v264_v38  ;;  %v265_v51 = vadd.f32 %v201_v39, %v66_v34  ;;  %v203_v52 = vmul.f32 %v563_v2, %v132_v35  ;;  %v73_v9 = vld [vmem:[%s1153_s1 + $0x1b8] sm:$0xff]  ;;  %v138_v10 = vld [vmem:[%s1152_s0 + $0x1c0] sm:$0xff]  ;;  %v139_v15 = vld [vmem:[%s1152_s0 + $0x1c8] sm:$0xff] }
  0x36   :  { %460 = vst.msk [vmem:[#allocation2 + $0x158] sm:$0xff] %vm416_vm0, %v395_v43  ;;  %461 = vst.msk [vmem:[#allocation2 + $0x160] sm:$0xff] %vm416_vm0, %v396_v44  ;;  %v398_v56 = vmax.f32 %v334_v45, 0.0  ;;  %v266_v57 = vadd.f32 %v202_v46, %v67_v40  ;;  %v204_v58 = vmul.f32 %v563_v2, %v133_v41  ;;  %v205_v59 = vmul.f32 %v563_v2, %v134_v42  ;;  %v74_v20 = vld [vmem:[%s1153_s1 + $0x1c0] sm:$0xff]  ;;  %v140_v21 = vld [vmem:[%s1152_s0 + $0x1d0] sm:$0xff] }
  0x37   :  { %462 = vst.msk [vmem:[#allocation2 + $0x168] sm:$0xff] %vm416_vm0, %v397_v49  ;;  %v399_v62 = vmax.f32 %v335_v50, 0.0  ;;  %v336_v63 = vadd.f32 %v569_v4, %v265_v51  ;;  %v267_v0 = vadd.f32 %v203_v52, %v68_v47  ;;  %v206_v1 = vmul.f32 %v563_v2, %v135_v48  ;;  %v75_v26 = vld [vmem:[%s1153_s1 + $0x1c8] sm:$0xff]  ;;  %v141_v27 = vld [vmem:[%s1152_s0 + $0x1d8] sm:$0xff]  ;;  %v142_v28 = vld [vmem:[%s1152_s0 + $0x1e0] sm:$0xff] }
  0x38   :  { %463 = vst.msk [vmem:[#allocation2 + $0x170] sm:$0xff] %vm416_vm0, %v398_v56  ;;  %v337_v5 = vadd.f32 %v569_v4, %v266_v57  ;;  %v268_v6 = vadd.f32 %v204_v58, %v69_v53  ;;  %v269_v7 = vadd.f32 %v205_v59, %v70_v54  ;;  %v207_v8 = vmul.f32 %v563_v2, %v136_v55  ;;  %v76_v33 = vld [vmem:[%s1153_s1 + $0x1d0] sm:$0xff]  ;;  %v143_v34 = vld [vmem:[%s1152_s0 + $0x1e8] sm:$0xff]  ;;  %v77_v39 = vld [vmem:[%s1153_s1 + $0x1d8] sm:$0xff] }
  0x39   :  { %464 = vst.msk [vmem:[#allocation2 + $0x178] sm:$0xff] %vm416_vm0, %v399_v62  ;;  %v400_v11 = vmax.f32 %v336_v63, 0.0  ;;  %v338_v12 = vadd.f32 %v569_v4, %v267_v0  ;;  %v270_v13 = vadd.f32 %v206_v1, %v71_v60  ;;  %v208_v14 = vmul.f32 %v563_v2, %v137_v61  ;;  %v78_v40 = vld [vmem:[%s1153_s1 + $0x1e0] sm:$0xff]  ;;  %v144_v41 = vld [vmem:[%s1152_s0 + $0x1f0] sm:$0xff]  ;;  %v79_v46 = vld [vmem:[%s1153_s1 + $0x1e8] sm:$0xff] }
  0x3a   :  { %v401_v16 = vmax.f32 %v337_v5, 0.0  ;;  %v339_v17 = vadd.f32 %v569_v4, %v268_v6  ;;  %v340_v18 = vadd.f32 %v569_v4, %v269_v7  ;;  %v271_v19 = vadd.f32 %v207_v8, %v72_v3  ;;  %v145_v47 = vld [vmem:[%s1152_s0 + $0x1f8] sm:$0xff]  ;;  %v80_v52 = vld [vmem:[%s1153_s1 + $0x1f0] sm:$0xff] }
  0x3b   :  { %465 = vst.msk [vmem:[#allocation2 + $0x180] sm:$0xff] %vm416_vm0, %v400_v11  ;;  %v402_v22 = vmax.f32 %v338_v12, 0.0  ;;  %v341_v23 = vadd.f32 %v569_v4, %v270_v13  ;;  %v272_v24 = vadd.f32 %v208_v14, %v73_v9  ;;  %v209_v25 = vmul.f32 %v563_v2, %v138_v10  ;;  %v81_v57 = vld [vmem:[%s1153_s1 + $0x1f8] sm:$0xff]  ;;  %s526_s1 = smov [#allocation2]  }
  0x3c   :  { %466 = vst.msk [vmem:[#allocation2 + $0x188] sm:$0xff] %vm416_vm0, %v401_v16  ;;  %v403_v29 = vmax.f32 %v339_v17, 0.0  ;;  %v404_v30 = vmax.f32 %v340_v18, 0.0  ;;  %v342_v31 = vadd.f32 %v569_v4, %v271_v19  ;;  %v210_v32 = vmul.f32 %v563_v2, %v139_v15  ;;  %s486_s22 = sshll.u32 %s526_s1, 4  ;;  %s487_s22 = int_to_ptr.vmem [resolvable:$true] %s486_s22 }
  0x3d   :  { %467 = vst.msk [vmem:[#allocation2 + $0x190] sm:$0xff] %vm416_vm0, %v402_v22  ;;  %v405_v35 = vmax.f32 %v341_v23, 0.0  ;;  %v343_v36 = vadd.f32 %v569_v4, %v272_v24  ;;  %v273_v37 = vadd.f32 %v209_v25, %v74_v20  ;;  %v211_v38 = vmul.f32 %v563_v2, %v140_v21  ;;  %s502_s23 = scalar_lea.vmem %s487_s22, 8192  ;;  %p507_p1 = scmp.lt.s32.totalorder %s487_s22, %s487_s22 }
  0x3e   :  { %468 = vst.msk [vmem:[#allocation2 + $0x198] sm:$0xff] %vm416_vm0, %v403_v29  ;;  %469 = vst.msk [vmem:[#allocation2 + $0x1a0] sm:$0xff] %vm416_vm0, %v404_v30  ;;  %v406_v42 = vmax.f32 %v342_v31, 0.0  ;;  %v274_v43 = vadd.f32 %v210_v32, %v75_v26  ;;  %v212_v44 = vmul.f32 %v563_v2, %v141_v27  ;;  %v213_v45 = vmul.f32 %v563_v2, %v142_v28  ;;  %p503_p0 = scmp.ne.s32.totalorder %s487_s22, %s502_s23  ;;  %p508_p2 = scmp.lt.s32.totalorder %s502_s23, %s502_s23 }
  0x3f   :  { %470 = vst.msk [vmem:[#allocation2 + $0x1a8] sm:$0xff] %vm416_vm0, %v405_v35  ;;  %v407_v48 = vmax.f32 %v343_v36, 0.0  ;;  %v344_v49 = vadd.f32 %v569_v4, %v273_v37  ;;  %v275_v50 = vadd.f32 %v211_v38, %v76_v33  ;;  %v214_v51 = vmul.f32 %v563_v2, %v143_v34 }
  0x40   :  { %471 = vst.msk [vmem:[#allocation2 + $0x1b0] sm:$0xff] %vm416_vm0, %v406_v42  ;;  %v345_v53 = vadd.f32 %v569_v4, %v274_v43  ;;  %v276_v54 = vadd.f32 %v212_v44, %v77_v39  ;;  %v277_v55 = vadd.f32 %v213_v45, %v78_v40  ;;  %v215_v56 = vmul.f32 %v563_v2, %v144_v41  ;;  %p509_p3 = por %p508_p2, %p507_p1 }
  0x41   :  { %472 = vst.msk [vmem:[#allocation2 + $0x1b8] sm:$0xff] %vm416_vm0, %v407_v48  ;;  %v408_v58 = vmax.f32 %v344_v49, 0.0  ;;  %v346_v59 = vadd.f32 %v569_v4, %v275_v50  ;;  %v278_v60 = vadd.f32 %v214_v51, %v79_v46  ;;  %v216_v61 = vmul.f32 %v563_v2, %v145_v47 }
  0x42   :  { %v409_v62 = vmax.f32 %v345_v53, 0.0  ;;  %v347_v63 = vadd.f32 %v569_v4, %v276_v54  ;;  %v348_v0 = vadd.f32 %v569_v4, %v277_v55  ;;  %v279_v1 = vadd.f32 %v215_v56, %v80_v52  ;;  %p510_p4 = pnand %p509_p3, %p503_p0 }
  0x43   :  { %473 = vst.msk [vmem:[#allocation2 + $0x1c0] sm:$0xff] %vm416_vm0, %v408_v58  ;;  %v410_v3 = vmax.f32 %v346_v59, 0.0  ;;  %v349_v5 = vadd.f32 %v569_v4, %v278_v60  ;;  %v280_v6 = vadd.f32 %v216_v61, %v81_v57 }
  0x44   :  { %474 = vst.msk [vmem:[#allocation2 + $0x1c8] sm:$0xff] %vm416_vm0, %v409_v62  ;;  %v411_v7 = vmax.f32 %v347_v63, 0.0  ;;  %v412_v8 = vmax.f32 %v348_v0, 0.0  ;;  %v350_v9 = vadd.f32 %v569_v4, %v279_v1 }
  0x45   :  { %475 = vst.msk [vmem:[#allocation2 + $0x1d0] sm:$0xff] %vm416_vm0, %v410_v3  ;;  %v413_v2 = vmax.f32 %v349_v5, 0.0  ;;  %v351_v10 = vadd.f32 %v569_v4, %v280_v6 }
  0x46   :  { %476 = vst.msk [vmem:[#allocation2 + $0x1d8] sm:$0xff] %vm416_vm0, %v411_v7  ;;  %477 = vst.msk [vmem:[#allocation2 + $0x1e0] sm:$0xff] %vm416_vm0, %v412_v8  ;;  %v414_v11 = vmax.f32 %v350_v9, 0.0 }
  0x47   :  { %478 = vst.msk [vmem:[#allocation2 + $0x1e8] sm:$0xff] %vm416_vm0, %v413_v2  ;;  %v415_v12 = vmax.f32 %v351_v10, 0.0 }
  0x48   :  { %479 = vst.msk [vmem:[#allocation2 + $0x1f0] sm:$0xff] %vm416_vm0, %v414_v11 }
  0x49   :  { %480 = vst.msk [vmem:[#allocation2 + $0x1f8] sm:$0xff] %vm416_vm0, %v415_v12 }
  0x4a   :  { %513 = shalt.err (!%p510_p4)
}
  0x4b   :  { %s514_s26 = scalar_lea.hbm %s1156_s4, 8192 }
  0x4c   :  { %p515_p5 = scmp.ne.s32.totalorder %s1156_s4, %s514_s26  ;;  %p518_p6 = scmp.lt.u32.totalorder %s514_s26, %s1156_s4 }
  0x4e   :  { %p520_p7 = pnand %p518_p6, %p515_p5 }
  0x50   :  { %523 = shalt.err (!%p520_p7)
}
  0x51   :  { %s527_s3 = smov 128   ;;  %s528_s30 = smov 8  }
  0x52   :  { %492 = dma.vmem_to_hbm [thread:$0]  %s487_s22, 8192, %s1156_s4, [#allocation3], %s527_s3, %s527_s3, %s528_s30  }
  0x53   :  { %524 = dma.done.wait [#allocation3], 8192  }
  0x54   :  { %525 = vsyncadd [#allocation3], 4294959104 }
  0x55   :  { %496 = vsyncpa [#allocation3], 1 }

// kernel: resnet_block_forward.4
= control target key start
LH: loop header
LB: loop body
LE: loop exit
PB: predicated region body
PF: predicated region fallthrough
CT: control target
= control target key end

     0   :  { %s4890_s18 = smov 0   ;;  %s6282_s0 = inlined_call_operand.vmem [shape: f32[2,18,18,32], index: 0, kind: input, shape index: {}]   ;;  %s6283_s1 = inlined_call_operand.vmem [shape: f32[288,32], index: 1, kind: input, shape index: {}]   ;;  %s6284_s2 = inlined_call_operand.vmem [shape: f32[1,32], index: 2, kind: input, shape index: {}]   ;;  %s6285_s3 = inlined_call_operand.vmem [shape: f32[2,256,32], index: 3, kind: output, shape index: {0}]   ;;  %s6286_s4 = inlined_call_operand.vmem [shape: f32[2,1,32], index: 4, kind: output, shape index: {1}]   ;;  %s6287_s5 = inlined_call_operand.vmem [shape: f32[2,1,32], index: 5, kind: output, shape index: {2}]  }
   0x1 LB: > { %s3383_s19 = sadd.s32 4294967295, %s4858_s18   ;;  %p3387_p0 = scmp.ge.s32.totalorder %s4858_s18, 1  ;;  %s4858_s18 = sphi %s4890_s18, %s16_s18  }
   0x2   : > { %p192_p1 = scmp.lt.s32.totalorder %s4858_s18, 3 }
   0x4   : > { %p193_p2 = pnand %p3387_p0, %p192_p1 }
   0x6   : > { %196 = sbr.rel (%p193_p2) target bundleno = 546 (0x222), region = 32 }
   0xd   : > { %v300_v0 = vld [vmem:[%s6283_s1 + $0x20] sm:$0xff]  ;;  %v301_v1 = vld [vmem:[%s6283_s1 + $0x28] sm:$0xff]  ;;  %p226_p3 = scmp.lt.s32.totalorder %s3383_s19, 1  ;;  %v302_v5 = vld [vmem:[%s6283_s1 + $0x30] sm:$0xff]  ;;  %vm380_vm0 = vcmask 1046528   ;;  %vm461_vm1 = vcmask 261120  }
   0xe   : > { %v312_v2 = vld [vmem:[%s6283_s1 + $0x80] sm:$0xff]  ;;  %v4511_v3 = vpack.c.bf16 %v301_v1, %v300_v0  ;;  %v313_v4 = vld [vmem:[%s6283_s1 + $0x88] sm:$0xff]  ;;  %v303_v6 = vld [vmem:[%s6283_s1 + $0x38] sm:$0xff]  ;;  %vm1040_vm2 = vcmask 1045504   ;;  %vm3174_vm3 = vcmask 253952  }
   0xf   : > { %v4916_v7 = vpack.c.bf16 %v313_v4, %v312_v2  ;;  %v4515_v8 = vpack.c.bf16 %v303_v6, %v302_v5  ;;  %v314_v9 = vld [vmem:[%s6283_s1 + $0x90] sm:$0xff]  ;;  %v315_v10 = vld [vmem:[%s6283_s1 + $0x98] sm:$0xff]  ;;  %s6467_s19 = smov (!%p226_p3, %s3383_s19), 1  ;;  %v296_v11 = vld [vmem:[%s6283_s1] sm:$0xff] }
  0x10   : > { %4512 = vmatprep.subr.bf16.mxu1 %v4511_v3  ;;  %v4929_v12 = vpack.c.bf16 %v315_v10, %v314_v9  ;;  %v297_v13 = vld [vmem:[%s6283_s1 + $0x8] sm:$0xff]  ;;  %v316_v14 = vld [vmem:[%s6283_s1 + $0xa0] sm:$0xff]  ;;  %s4843_s21 = smul.u32 432, %s6467_s19  ;;  %v318_v18 = vld [vmem:[%s6283_s1 + $0xb0] sm:$0xff]  ;;  %s238_s11 = scalar_lea.vmem %s6286_s4, %s6467_s19 }
  0x11   : > { %v317_v15 = vld [vmem:[%s6283_s1 + $0xa8] sm:$0xff]  ;;  %4544 = vmatprep.subr.bf16.mxu0 %v4916_v7  ;;  %4514 = vmatpush3.bf16.msra.mxu1 %v4511_v3  ;;  %v4519_v16 = vpack.c.bf16 %v297_v13, %v296_v11  ;;  %v319_v19 = vld [vmem:[%s6283_s1 + $0xb8] sm:$0xff]  ;;  %v298_v23 = vld [vmem:[%s6283_s1 + $0x10] sm:$0xff]  ;;  %s241_s14 = scalar_lea.vmem %s6287_s5, %s6467_s19 }
  0x12   : > { %6363 = vst [vmem:[#allocation2_spill] sm:$0xff] %v4929_v12  ;;  %4546 = vmatpush3.bf16.msra.mxu0 %v4916_v7  ;;  %4516 = vmatprep.subr.bf16.mxu1 %v4515_v8  ;;  %s4947_s24 = scalar_lea.vmem %s6282_s0, %s4843_s21  ;;  %v4551_v17 = vpack.c.bf16 %v317_v15, %v316_v14  ;;  %v299_v33 = vld [vmem:[%s6283_s1 + $0x18] sm:$0xff]  ;;  %v4555_v39 = vpack.c.bf16 %v319_v19, %v318_v18  ;;  %v320_v40 = vld [vmem:[%s6283_s1 + $0xc0] sm:$0xff]  ;;  %v321_v54 = vld [vmem:[%s6283_s1 + $0xc8] sm:$0xff] }
  0x13   : > { %4548 = vmatprep.subr.bf16.mxu0 %v4929_v12  ;;  %v4956_v20 = vld [vmem:[%s4947_s24] sm:$0xff]  ;;  %v4959_v21 = vld [vmem:[%s4947_s24 + $0x8] sm:$0xff]  ;;  %v4962_v22 = vld [vmem:[%s4947_s24 + $0x18] sm:$0xff]  ;;  %v4523_v53 = vpack.c.bf16 %v299_v33, %v298_v23  ;;  %v5053_v0 = vpack.c.bf16 %v321_v54, %v320_v40 }
  0x14   : > { %6364 = vst [vmem:[#allocation3_spill] sm:$0xff] %v4962_v22  ;;  %v381_v24 = vrot.slane %v4956_v20, 1  ;;  %v382_v25 = vrot.slane %v4959_v21, 1  ;;  %v4970_v26 = vld [vmem:[%s4947_s24 + $0x20] sm:$0xff]  ;;  %v386_v27 = vrot.slane %v4962_v22, 1  ;;  %v4983_v32 = vld [vmem:[%s4947_s24 + $0x30] sm:$0xff] }
  0x15   : > { %4518 = vmatpush3.bf16.msra.mxu1 %v4515_v8  ;;  %6365 = vst [vmem:[#allocation4_spill] sm:$0xff] %v4970_v26  ;;  %v4974_v28 = vld [vmem:[%s4947_s24 + $0x10] sm:$0x3]  ;;  %v387_v29 = vrot.slane %v4970_v26, 1  ;;  %v4980_v31 = vld [vmem:[%s4947_s24 + $0x28] sm:$0x3] }
  0x16   : > { %4550 = vmatpush3.bf16.msra.mxu0 %v4929_v12  ;;  %4520 = vmatprep.subr.bf16.mxu1 %v4519_v16  ;;  %v384_v30 = vrot.slane %v4974_v28, 1  ;;  %v383_v34 = vsel %vm380_vm0, %v381_v24, %v382_v25  ;;  %v389_v35 = vrot.slane %v4980_v31, 1  ;;  %v4991_v36 = vld [vmem:[%s4947_s24 + $0x38] sm:$0xff]  ;;  %v391_v37 = vrot.slane %v4983_v32, 1  ;;  %v4995_v38 = vld [vmem:[%s4947_s24 + $0x40] sm:$0x3] }
  0x17   : > { %4552 = vmatprep.subr.bf16.mxu0 %v4551_v17  ;;  %4015 = vmatprep.mubr.msk.f32.mxu1 %vm461_vm1, %v383_v34  ;;  %v388_v41 = vsel %vm380_vm0, %v386_v27, %v387_v29  ;;  %v392_v43 = vrot.slane %v4991_v36, 1  ;;  %v394_v44 = vrot.slane %v4995_v38, 1  ;;  %v5006_v45 = vld [vmem:[%s4947_s24 + $0x48] sm:$0xff]  ;;  %v5009_v46 = vld [vmem:[%s4947_s24 + $0x50] sm:$0xff]  ;;  %v5012_v47 = vld [vmem:[%s4947_s24 + $0x58] sm:$0x3] }
  0x18   : > { %v385_v42 = vsel %vm380_vm0, %v382_v25, %v384_v30  ;;  %4239 = vmatprep.mubr.msk.f32.mxu0 %vm461_vm1, %v388_v41  ;;  %v390_v48 = vsel %vm380_vm0, %v387_v29, %v389_v35  ;;  %v396_v49 = vrot.slane %v5006_v45, 1  ;;  %v397_v50 = vrot.slane %v5009_v46, 1  ;;  %v5020_v51 = vld [vmem:[%s4947_s24 + $0x60] sm:$0xff]  ;;  %v5023_v52 = vld [vmem:[%s4947_s24 + $0x68] sm:$0xff]  ;;  %v5051_v63 = vld [vmem:[%s4947_s24 + $0x70] sm:$0x3] }
  0x19   : > { %4016 = vmatmul.mubr.msk.f32.vlgmr.msra.gmra.mrb[0].mxu1 %vm461_vm1, %v385_v42  ;;  %4240 = vmatmul.mubr.msk.f32.vlgmr.msra.gmra.mrb[0].mxu0 %vm461_vm1, %v390_v48  ;;  %v5030_v55 = vsel %vm380_vm0, %v391_v37, %v392_v43  ;;  %v304_v56 = vld [vmem:[%s6283_s1 + $0x40] sm:$0xff]  ;;  %v305_v57 = vld [vmem:[%s6283_s1 + $0x48] sm:$0xff]  ;;  %v5040_v58 = vsel %vm380_vm0, %v392_v43, %v394_v44  ;;  %v399_v59 = vrot.slane %v5012_v47, 1  ;;  %v401_v61 = vrot.slane %v5020_v51, 1  ;;  %v5057_v1 = vld [vmem:[%s4947_s24 + $0x78] sm:$0xff] }
  0x1a   : > { %4522 = vmatpush3.bf16.msra.mxu1 %v4519_v16  ;;  %6366 = vst [vmem:[#allocation5_spill] sm:$0xff] %v5030_v55  ;;  %4554 = vmatpush3.bf16.msra.mxu0 %v4551_v17  ;;  %6367 = vst [vmem:[#allocation6_spill] sm:$0xff] %v5040_v58  ;;  %v5046_v60 = vsel %vm380_vm0, %v396_v49, %v397_v50  ;;  %v402_v62 = vrot.slane %v5023_v52, 1  ;;  %v5060_v2 = vld [vmem:[%s4947_s24 + $0x80] sm:$0xff]  ;;  %v5062_v3 = vpack.c.bf16 %v305_v57, %v304_v56  ;;  %v5080_v10 = vld [vmem:[%s4947_s24 + $0x88] sm:$0x3] }
  0x1b   : > { %4018 = vmatprep.mubr.msk.f32.mxu1 %vm461_vm1, %v388_v41  ;;  %4242 = vmatprep.mubr.msk.f32.mxu0 %vm461_vm1, %v5030_v55  ;;  %6368 = vst [vmem:[#allocation7_spill] sm:$0xff] %v5046_v60  ;;  %v5071_v4 = vsel %vm380_vm0, %v397_v50, %v399_v59  ;;  %v404_v5 = vrot.slane %v5051_v63, 1  ;;  %v406_v8 = vrot.slane %v5057_v1, 1  ;;  %v407_v9 = vrot.slane %v5060_v2, 1  ;;  %v5086_v11 = vld [vmem:[%s4947_s24 + $0x90] sm:$0xff]  ;;  %v5089_v13 = vld [vmem:[%s4947_s24 + $0x98] sm:$0xff] }
  0x1c   : > { %4556 = vmatprep.subr.bf16.mxu0 %v4555_v39  ;;  %4524 = vmatprep.subr.bf16.mxu1 %v4523_v53  ;;  %6369 = vst [vmem:[#allocation8_spill] sm:$0xff] %v5071_v4  ;;  %v5075_v6 = vsel %vm380_vm0, %v401_v61, %v402_v62  ;;  %v409_v15 = vrot.slane %v5080_v10, 1  ;;  %v411_v17 = vrot.slane %v5086_v11, 1  ;;  %v412_v18 = vrot.slane %v5089_v13, 1  ;;  %v5108_v19 = vld [vmem:[%s4947_s24 + $0xa0] sm:$0x3] }
  0x1d   : > { %4019 = vmatmul.mubr.msk.f32.gmra.mrb[2].mxu1 %vm461_vm1, %v390_v48  ;;  %4243 = vmatmul.mubr.msk.f32.gmra.mrb[2].mxu0 %vm461_vm1, %v5040_v58  ;;  %6370 = vst [vmem:[#allocation9_spill] sm:$0xff] %v5075_v6  ;;  %v5099_v14 = vsel %vm380_vm0, %v402_v62, %v404_v5  ;;  %v5103_v16 = vsel %vm380_vm0, %v406_v8, %v407_v9  ;;  %v5113_v23 = vld [vmem:[%s4947_s24 + $0xa8] sm:$0xff]  ;;  %v5116_v24 = vld [vmem:[%s4947_s24 + $0xb0] sm:$0xff]  ;;  %v414_v27 = vrot.slane %v5108_v19, 1  ;;  %v5134_v34 = vld [vmem:[%s4947_s24 + $0xb8] sm:$0x3] }
  0x1e   : > { %4021 = vmatprep.mubr.msk.f32.mxu1 %vm461_vm1, %v5030_v55  ;;  %4245 = vmatprep.mubr.msk.f32.mxu0 %vm461_vm1, %v5046_v60  ;;  %6371 = vst [vmem:[#allocation10_spill] sm:$0xff] %v5099_v14  ;;  %6372 = vst [vmem:[#allocation11_spill] sm:$0xff] %v5103_v16  ;;  %v5125_v25 = vsel %vm380_vm0, %v407_v9, %v409_v15  ;;  %v5129_v29 = vsel %vm380_vm0, %v411_v17, %v412_v18  ;;  %v416_v30 = vrot.slane %v5113_v23, 1  ;;  %v5139_v35 = vld [vmem:[%s4947_s24 + $0xc0] sm:$0xff]  ;;  %v5142_v37 = vld [vmem:[%s4947_s24 + $0xc8] sm:$0xff] }
  0x1f   : > { %4558 = vmatpush3.bf16.msra.mxu0 %v4555_v39  ;;  %4526 = vmatpush3.bf16.msra.mxu1 %v4523_v53  ;;  %6373 = vst [vmem:[#allocation12_spill] sm:$0xff] %v5125_v25  ;;  %6374 = vst [vmem:[#allocation13_spill] sm:$0xff] %v5129_v29  ;;  %v417_v33 = vrot.slane %v5116_v24, 1  ;;  %v5151_v39 = vsel %vm380_vm0, %v412_v18, %v414_v27  ;;  %v419_v40 = vrot.slane %v5134_v34, 1  ;;  %v421_v42 = vrot.slane %v5139_v35, 1  ;;  %v5180_v56 = vld [vmem:[%s4947_s24 + $0xd8] sm:$0xff] }
  0x20   : > { %4560 = vmatprep.subr.bf16.mxu0 %v5053_v0  ;;  %4528 = vmatprep.subr.bf16.mxu1 %v5062_v3  ;;  %6375 = vst [vmem:[#allocation14_spill] sm:$0xff] %v5151_v39  ;;  %v422_v43 = vrot.slane %v5142_v37, 1  ;;  %v5160_v44 = vld [vmem:[%s4947_s24 + $0xd0] sm:$0x3]  ;;  %v1046_v53 = vrot.slane %v4962_v22, 2  ;;  %v1047_v54 = vrot.slane %v4970_v26, 2 }
  0x21   : > { %4022 = vmatmul.mubr.msk.f32.gmra.mrb[4].mxu1 %vm461_vm1, %v5040_v58  ;;  %4246 = vmatmul.mubr.msk.f32.gmra.mrb[4].mxu0 %vm461_vm1, %v5071_v4  ;;  %v5155_v41 = vsel %vm380_vm0, %v416_v30, %v417_v33  ;;  %v5171_v48 = vsel %vm380_vm0, %v417_v33, %v419_v40  ;;  %v424_v49 = vrot.slane %v5160_v44, 1  ;;  %v5183_v57 = vld [vmem:[%s4947_s24 + $0xe0] sm:$0xff]  ;;  %v1049_v59 = vrot.slane %v4980_v31, 2  ;;  %v5200_v8 = vld [vmem:[%s4947_s24 + $0xe8] sm:$0x3]  ;;  %v5208_v17 = vld [vmem:[%s4947_s24 + $0xf0] sm:$0xff] }
  0x22   : > { %4024 = vmatprep.mubr.msk.f32.mxu1 %vm461_vm1, %v5046_v60  ;;  %4248 = vmatprep.mubr.msk.f32.mxu0 %vm461_vm1, %v5075_v6  ;;  %6376 = vst [vmem:[#allocation15_spill] sm:$0xff] %v5155_v41  ;;  %6377 = vst [vmem:[#allocation16_spill] sm:$0xff] %v5171_v48  ;;  %v5175_v50 = vsel %vm380_vm0, %v421_v42, %v422_v43  ;;  %v426_v62 = vrot.slane %v5180_v56, 1  ;;  %v427_v5 = vrot.slane %v5183_v57, 1  ;;  %v1051_v15 = vrot.slane %v4983_v32, 2  ;;  %v5211_v18 = vld [vmem:[%s4947_s24 + $0xf8] sm:$0xff] }
  0x23   : > { %6378 = vst [vmem:[#allocation17_spill] sm:$0xff] %v5175_v50  ;;  %v5195_v61 = vsel %vm380_vm0, %v422_v43, %v424_v49  ;;  %v5203_v9 = vsel %vm1040_vm2, %v1046_v53, %v1047_v54  ;;  %v1052_v31 = vrot.slane %v4991_v36, 2  ;;  %v322_v27 = vld [vmem:[%s6283_s1 + $0xd0] sm:$0xff]  ;;  %v323_v30 = vld [vmem:[%s6283_s1 + $0xd8] sm:$0xff]  ;;  %v429_v33 = vrot.slane %v5200_v8, 1 }
  0x24   : > { %6379 = vst [vmem:[#allocation18_spill] sm:$0xff] %v5195_v61  ;;  %v1054_v40 = vrot.slane %v4995_v38, 2  ;;  %v5230_v42 = vsel %vm1040_vm2, %v1047_v54, %v1049_v59  ;;  %v5233_v43 = vsel %vm380_vm0, %v426_v62, %v427_v5  ;;  %v431_v49 = vrot.slane %v5208_v17, 1  ;;  %v5238_v12 = vld [vmem:[%s4947_s24 + $0x100] sm:$0x3]  ;;  %v5249_v54 = vld [vmem:[%s4947_s24 + $0x110] sm:$0xff] }
  0x25   : > { %4025 = vmatmul.mubr.msk.f32.gmra.mrb[6].mxu1 %vm461_vm1, %v5071_v4  ;;  %4249 = vmatmul.mubr.msk.f32.gmra.mrb[6].mxu0 %vm461_vm1, %v5099_v14  ;;  %6380 = vst [vmem:[#allocation19_spill] sm:$0xff] %v5233_v43  ;;  %v432_v53 = vrot.slane %v5211_v18, 1  ;;  %v1056_v38 = vrot.slane %v5006_v45, 2  ;;  %v4563_v59 = vpack.c.bf16 %v323_v30, %v322_v27  ;;  %v5258_v62 = vsel %vm380_vm0, %v427_v5, %v429_v33  ;;  %v324_v27 = vld [vmem:[%s6283_s1 + $0xe0] sm:$0xff]  ;;  %v325_v30 = vld [vmem:[%s6283_s1 + $0xe8] sm:$0xff] }
  0x26   : > { %4027 = vmatprep.mubr.msk.f32.mxu1 %vm461_vm1, %v5075_v6  ;;  %4251 = vmatprep.mubr.msk.f32.mxu0 %vm461_vm1, %v5103_v16  ;;  %6381 = vst [vmem:[#allocation20_spill] sm:$0xff] %v5258_v62  ;;  %v5317_v6 = vld [vmem:[%s4947_s24 + $0x130] sm:$0x3]  ;;  %v1069_v4 = vrot.slane %v5080_v10, 2  ;;  %v5353_v58 = vld [vmem:[%s4947_s24 + $0x148] sm:$0x3] }
  0x27   : > { %v5274_v5 = vsel %vm380_vm0, %v431_v49, %v432_v53  ;;  %v5291_v49 = vld [vmem:[%s4947_s24 + $0x128] sm:$0xff]  ;;  %v1074_v55 = vrot.slane %v5108_v19, 2  ;;  %v1076_v19 = vrot.slane %v5113_v23, 2 }
  0x28   : > { %6383 = vst [vmem:[#allocation22_spill] sm:$0xff] %v5274_v5 }
  0x29   : > { %4028 = vmatmul.mubr.msk.f32.gmra.mrb[8].mxu1 %vm461_vm1, %v5099_v14  ;;  %4252 = vmatmul.mubr.msk.f32.gmra.mrb[8].mxu0 %vm461_vm1, %v5125_v25  ;;  %v1064_v14 = vrot.slane %v5051_v63, 2  ;;  %v1066_v63 = vrot.slane %v5057_v1, 2 }
  0x2a   : > { %4030 = vmatprep.mubr.msk.f32.mxu1 %vm461_vm1, %v5103_v16  ;;  %4254 = vmatprep.mubr.msk.f32.mxu0 %vm461_vm1, %v5129_v29 }
  0x2d   : > { %4031 = vmatmul.mubr.msk.f32.gmra.mrb[10].mxu1 %vm461_vm1, %v5125_v25  ;;  %4255 = vmatmul.mubr.msk.f32.gmra.mrb[10].mxu0 %vm461_vm1, %v5151_v39  ;;  %v5288_v25 = vld [vmem:[%s4947_s24 + $0x120] sm:$0xff] }
  0x2e   : > { %4033 = vmatprep.mubr.msk.f32.mxu1 %vm461_vm1, %v5129_v29  ;;  %4257 = vmatprep.mubr.msk.f32.mxu0 %vm461_vm1, %v5155_v41  ;;  %v1061_v29 = vrot.slane %v5020_v51, 2 }
  0x31   : > { %4034 = vmatmul.mubr.msk.f32.gmra.mrb[12].mxu1 %vm461_vm1, %v5151_v39  ;;  %4258 = vmatmul.mubr.msk.f32.gmra.mrb[12].mxu0 %vm461_vm1, %v5171_v48  ;;  %v434_v39 = vrot.slane %v5238_v12, 1 }
  0x32   : > { %4036 = vmatprep.mubr.msk.f32.mxu1 %vm461_vm1, %v5155_v41  ;;  %4260 = vmatprep.mubr.msk.f32.mxu0 %vm461_vm1, %v5175_v50  ;;  %v5246_v41 = vld [vmem:[%s4947_s24 + $0x108] sm:$0xff] }
  0x33   : > { %v436_v33 = vrot.slane %v5246_v41, 1 }
  0x35   : > { %4037 = vmatmul.mubr.msk.f32.gmra.mrb[14].mxu1 %vm461_vm1, %v5171_v48  ;;  %4261 = vmatmul.mubr.msk.f32.gmra.mrb[14].mxu0 %vm461_vm1, %v5195_v61  ;;  %v1057_v48 = vrot.slane %v5009_v46, 2 }
  0x36   : > { %4039 = vmatprep.mubr.msk.f32.mxu1 %vm461_vm1, %v5175_v50  ;;  %4295 = vmatprep.mubr.msk.f32.mxu0 %vm461_vm1, %v5203_v9  ;;  %v5241_v50 = vsel %vm1040_vm2, %v1051_v15, %v1052_v31  ;;  %v5261_v15 = vsel %vm1040_vm2, %v1052_v31, %v1054_v40  ;;  %v1059_v31 = vrot.slane %v5012_v47, 2  ;;  %v437_v40 = vrot.slane %v5249_v54, 1 }
  0x37   : > { %6382 = vst [vmem:[#allocation21_spill] sm:$0xff] %v5261_v15  ;;  %v5295_v47 = vpack.c.bf16 %v325_v30, %v324_v27 }
  0x38   : > { %v5309_v27 = vsel %vm1040_vm2, %v1057_v48, %v1059_v31  ;;  %v5312_v30 = vsel %vm380_vm0, %v436_v33, %v437_v40  ;;  %v5328_v31 = vld [vmem:[%s4947_s24 + $0x140] sm:$0xff]  ;;  %v444_v33 = vrot.slane %v5317_v6, 1 }
  0x39   : > { %4040 = vmatmul.mubr.msk.f32.gmra.mrb[16].mxu1 %vm461_vm1, %v5195_v61  ;;  %4296 = vmatmul.mubr.msk.f32.vlgmr.msra.gmra.mrb[0].mxu0 %vm461_vm1, %v5230_v42  ;;  %v5283_v61 = vsel %vm1040_vm2, %v1056_v38, %v1057_v48  ;;  %v5302_v38 = vsel %vm380_vm0, %v432_v53, %v434_v39  ;;  %6386 = vst [vmem:[#allocation25_spill] sm:$0xff] %v5309_v27  ;;  %6387 = vst [vmem:[#allocation26_spill] sm:$0xff] %v5312_v30  ;;  %v1067_v53 = vrot.slane %v5060_v2, 2  ;;  %v5325_v48 = vld [vmem:[%s4947_s24 + $0x138] sm:$0xff] }
  0x3a   : > { %4042 = vmatprep.mubr.msk.f32.mxu1 %vm461_vm1, %v5233_v43  ;;  %4562 = vmatpush3.bf16.msra.mxu0 %v5053_v0  ;;  %v5280_v43 = vld [vmem:[%s4947_s24 + $0x118] sm:$0x3]  ;;  %6384 = vst [vmem:[#allocation23_spill] sm:$0xff] %v5283_v61  ;;  %v1062_v0 = vrot.slane %v5023_v52, 2  ;;  %6385 = vst [vmem:[#allocation24_spill] sm:$0xff] %v5302_v38  ;;  %v446_v60 = vrot.slane %v5325_v48, 1 }
  0x3b   : > { %4298 = vmatprep.mubr.msk.f32.mxu0 %vm461_vm1, %v5241_v50  ;;  %4564 = vmatprep.subr.bf16.mxu0 %v4563_v59  ;;  %v439_v16 = vrot.slane %v5280_v43, 1 }
  0x3c   : > { %v5320_v39 = vsel %vm1040_vm2, %v1061_v29, %v1062_v0 }
  0x3d   : > { %4043 = vmatmul.mubr.msk.f32.gmra.mrb[18].mxu1 %vm461_vm1, %v5258_v62  ;;  %4299 = vmatmul.mubr.msk.f32.gmra.mrb[2].mxu0 %vm461_vm1, %v5261_v15  ;;  %v441_v62 = vrot.slane %v5288_v25, 1  ;;  %6388 = vst [vmem:[#allocation27_spill] sm:$0xff] %v5320_v39  ;;  %v5338_v29 = vsel %vm380_vm0, %v437_v40, %v439_v16  ;;  %v5356_v16 = vsel %vm1040_vm2, %v1066_v63, %v1067_v53  ;;  %v1072_v40 = vrot.slane %v5089_v13, 2  ;;  %v5423_v15 = vld [vmem:[%s4947_s24 + $0x178] sm:$0x3] }
  0x3e   : > { %4045 = vmatprep.mubr.msk.f32.mxu1 %vm461_vm1, %v5274_v5  ;;  %4301 = vmatprep.mubr.msk.f32.mxu0 %vm461_vm1, %v5283_v61  ;;  %v442_v5 = vrot.slane %v5291_v49, 1  ;;  %6389 = vst [vmem:[#allocation28_spill] sm:$0xff] %v5338_v29  ;;  %6392 = vst [vmem:[#allocation31_spill] sm:$0xff] %v5356_v16  ;;  %v449_v63 = vrot.slane %v5353_v58, 1 }
  0x3f   : > { %4566 = vmatpush3.bf16.msra.mxu0 %v4563_v59  ;;  %v5341_v59 = vsel %vm1040_vm2, %v1062_v0, %v1064_v14  ;;  %v1071_v14 = vrot.slane %v5086_v11, 2  ;;  %v5361_v0 = vld [vmem:[%s4947_s24 + $0x150] sm:$0xff] }
  0x40   : > { %4568 = vmatprep.subr.bf16.mxu0 %v5295_v47  ;;  %6390 = vst [vmem:[#allocation29_spill] sm:$0xff] %v5341_v59  ;;  %v5373_v10 = vsel %vm380_vm0, %v442_v5, %v444_v33  ;;  %v1077_v33 = vrot.slane %v5116_v24, 2 }
  0x41   : > { %4046 = vmatmul.mubr.msk.f32.gmra.mrb[20].mxu1 %vm461_vm1, %v5302_v38  ;;  %4302 = vmatmul.mubr.msk.f32.gmra.mrb[4].mxu0 %vm461_vm1, %v5309_v27  ;;  %v5347_v38 = vsel %vm380_vm0, %v441_v62, %v442_v5  ;;  %v5364_v62 = vld [vmem:[%s4947_s24 + $0x158] sm:$0xff]  ;;  %6393 = vst [vmem:[#allocation32_spill] sm:$0xff] %v5373_v10  ;;  %v5388_v27 = vld [vmem:[%s4947_s24 + $0x160] sm:$0x3]  ;;  %v5391_v5 = vsel %vm1040_vm2, %v1071_v14, %v1072_v40 }
  0x42   : > { %4048 = vmatprep.mubr.msk.f32.mxu1 %vm461_vm1, %v5312_v30  ;;  %4304 = vmatprep.mubr.msk.f32.mxu0 %vm461_vm1, %v5320_v39  ;;  %6391 = vst [vmem:[#allocation30_spill] sm:$0xff] %v5347_v38  ;;  %v447_v30 = vrot.slane %v5328_v31, 1  ;;  %v5380_v39 = vsel %vm1040_vm2, %v1067_v53, %v1069_v4  ;;  %v5399_v4 = vld [vmem:[%s4947_s24 + $0x170] sm:$0xff]  ;;  %v5411_v53 = vsel %vm1040_vm2, %v1072_v40, %v1074_v55  ;;  %v454_v14 = vrot.slane %v5388_v27, 1 }
  0x43   : > { %6394 = vst [vmem:[#allocation33_spill] sm:$0xff] %v5380_v39  ;;  %6397 = vst [vmem:[#allocation36_spill] sm:$0xff] %v5399_v4  ;;  %v1081_v55 = vrot.slane %v5139_v35, 2  ;;  %v1082_v40 = vrot.slane %v5142_v37, 2 }
  0x44   : > { %6399 = vst [vmem:[#allocation38_spill] sm:$0xff] %v5411_v53 }
  0x45   : > { %4049 = vmatmul.mubr.msk.f32.gmra.mrb[22].mxu1 %vm461_vm1, %v5338_v29  ;;  %4305 = vmatmul.mubr.msk.f32.gmra.mrb[6].mxu0 %vm461_vm1, %v5341_v59  ;;  %v5383_v29 = vsel %vm380_vm0, %v446_v60, %v447_v30  ;;  %v451_v59 = vrot.slane %v5361_v0, 1  ;;  %v5408_v60 = vsel %vm380_vm0, %v447_v30, %v449_v63  ;;  %v5426_v30 = vsel %vm1040_vm2, %v1076_v19, %v1077_v33 }
  0x46   : > { %4051 = vmatprep.mubr.msk.f32.mxu1 %vm461_vm1, %v5347_v38  ;;  %4307 = vmatprep.mubr.msk.f32.mxu0 %vm461_vm1, %v5356_v16  ;;  %6395 = vst [vmem:[#allocation34_spill] sm:$0xff] %v5383_v29  ;;  %v452_v38 = vrot.slane %v5364_v62, 1  ;;  %v5396_v16 = vld [vmem:[%s4947_s24 + $0x168] sm:$0xff]  ;;  %6398 = vst [vmem:[#allocation37_spill] sm:$0xff] %v5408_v60 }
  0x47   : > { %6396 = vst [vmem:[#allocation35_spill] sm:$0xff] %v5396_v16 }
  0x48   : > { %v5417_v61 = vsel %vm380_vm0, %v451_v59, %v452_v38  ;;  %v459_v59 = vrot.slane %v5423_v15, 1 }
  0x49   : > { %4052 = vmatmul.mubr.msk.f32.gmra.mrb[24].mxu1 %vm461_vm1, %v5373_v10  ;;  %4308 = vmatmul.mubr.msk.f32.gmra.mrb[8].mxu0 %vm461_vm1, %v5380_v39  ;;  %6400 = vst [vmem:[#allocation39_spill] sm:$0xff] %v5417_v61  ;;  %v1079_v10 = vrot.slane %v5134_v34, 2  ;;  %v456_v39 = vrot.slane %v5396_v16, 1  ;;  %v5437_v34 = vsel %vm380_vm0, %v452_v38, %v454_v14  ;;  %v1087_v38 = vrot.slane %v5183_v57, 2 }
  0x4a   : > { %4054 = vmatprep.mubr.msk.f32.mxu1 %vm461_vm1, %v5383_v29  ;;  %4310 = vmatprep.mubr.msk.f32.mxu0 %vm461_vm1, %v5391_v5  ;;  %v457_v29 = vrot.slane %v5399_v4, 1  ;;  %6401 = vst [vmem:[#allocation40_spill] sm:$0xff] %v5437_v34  ;;  %v1091_v14 = vrot.slane %v5208_v17, 2 }
  0x4b   : > { %v5443_v63 = vsel %vm1040_vm2, %v1077_v33, %v1079_v10  ;;  %v1089_v10 = vrot.slane %v5200_v8, 2  ;;  %v1094_v8 = vrot.slane %v5238_v12, 2 }
  0x4c   : > { %6402 = vst [vmem:[#allocation41_spill] sm:$0xff] %v5443_v63  ;;  %v5446_v19 = vsel %vm380_vm0, %v456_v39, %v457_v29  ;;  %v5461_v39 = vsel %vm380_vm0, %v457_v29, %v459_v59  ;;  %v306_v29 = vld [vmem:[%s6283_s1 + $0x50] sm:$0xff]  ;;  %v1096_v59 = vrot.slane %v5246_v41, 2 }
  0x4d   : > { %4055 = vmatmul.mubr.msk.f32.gmra.mrb[26].mxu1 %vm461_vm1, %v5408_v60  ;;  %4311 = vmatmul.mubr.msk.f32.gmra.mrb[10].mxu0 %vm461_vm1, %v5411_v53  ;;  %6403 = vst [vmem:[#allocation42_spill] sm:$0xff] %v5446_v19  ;;  %v1084_v60 = vrot.slane %v5160_v44, 2  ;;  %v5450_v53 = vsel %vm1040_vm2, %v1081_v55, %v1082_v40  ;;  %6404 = vst [vmem:[#allocation43_spill] sm:$0xff] %v5461_v39  ;;  %v1092_v55 = vrot.slane %v5211_v18, 2 }
  0x4e   : > { %4057 = vmatprep.mubr.msk.f32.mxu1 %vm461_vm1, %v5417_v61  ;;  %4313 = vmatprep.mubr.msk.f32.mxu0 %vm461_vm1, %v5426_v30  ;;  %v1086_v61 = vrot.slane %v5180_v56, 2 }
  0x4f   : > { %v5466_v44 = vsel %vm1040_vm2, %v1082_v40, %v1084_v60  ;;  %v307_v60 = vld [vmem:[%s6283_s1 + $0x58] sm:$0xff]  ;;  %v5493_v40 = vsel %vm1040_vm2, %v1091_v14, %v1092_v55  ;;  %v5513_v12 = vsel %vm1040_vm2, %v1092_v55, %v1094_v8  ;;  %v1104_v55 = vrot.slane %v5317_v6, 2 }
  0x50   : > { %v5470_v33 = vsel %vm1040_vm2, %v1086_v61, %v1087_v38  ;;  %v5489_v61 = vsel %vm1040_vm2, %v1087_v38, %v1089_v10  ;;  %v309_v38 = vld [vmem:[%s6283_s1 + $0x68] sm:$0xff]  ;;  %v1099_v10 = vrot.slane %v5280_v43, 2  ;;  %v1106_v8 = vrot.slane %v5325_v48, 2 }
  0x51   : > { %4058 = vmatmul.mubr.msk.f32.gmra.mrb[28].mxu1 %vm461_vm1, %v5437_v34  ;;  %4314 = vmatmul.mubr.msk.f32.gmra.mrb[12].mxu0 %vm461_vm1, %v5443_v63  ;;  %v308_v34 = vld [vmem:[%s6283_s1 + $0x60] sm:$0xff] }
  0x52   : > { %4060 = vmatprep.mubr.msk.f32.mxu1 %vm461_vm1, %v5446_v19  ;;  %4316 = vmatprep.mubr.msk.f32.mxu0 %vm461_vm1, %v5450_v53  ;;  %v4531_v19 = vpack.c.bf16 %v307_v60, %v306_v29  ;;  %v1101_v29 = vrot.slane %v5288_v25, 2  ;;  %v5521_v60 = vpack.c.bf16 %v309_v38, %v308_v34  ;;  %v1111_v38 = vrot.slane %v5361_v0, 2 }
  0x55   : > { %4061 = vmatmul.mubr.msk.f32.gmra.mrb[30].mxu1 %vm461_vm1, %v5461_v39  ;;  %4317 = vmatmul.mubr.msk.f32.gmra.mrb[14].mxu0 %vm461_vm1, %v5466_v44  ;;  %v1097_v39 = vrot.slane %v5249_v54, 2 }
  0x56   : > { %4071 = vmatprep.mubr.msk.f32.mxu1 %vm461_vm1, %v4956_v20  ;;  %4319 = vmatprep.mubr.msk.f32.mxu0 %vm461_vm1, %v5470_v33 }
  0x57   : > { %v5517_v14 = vsel %vm1040_vm2, %v1096_v59, %v1097_v39  ;;  %v5532_v43 = vsel %vm1040_vm2, %v1097_v39, %v1099_v10  ;;  %v1107_v59 = vrot.slane %v5328_v31, 2  ;;  %v1112_v10 = vrot.slane %v5364_v62, 2 }
  0x59   : > { %4072 = vmatmul.mubr.msk.f32.vlgmr.msra.gmra.mrb[0].mxu1 %vm461_vm1, %v4959_v21  ;;  %4320 = vmatmul.mubr.msk.f32.gmra.mrb[16].mxu0 %vm461_vm1, %v5489_v61  ;;  %v5554_v39 = vsel %vm1040_vm2, %v1106_v8, %v1107_v59  ;;  %v1117_v8 = vrot.slane %v5399_v4, 2 }
  0x5a   : > { %4530 = vmatpush3.bf16.msra.mxu1 %v5062_v3  ;;  %4074 = vmatprep.mubr.msk.f32.mxu1 %vm461_vm1, %v4962_v22  ;;  %v1102_v3 = vrot.slane %v5291_v49, 2  ;;  %6406 = vst [vmem:[#allocation45_spill] sm:$0xff] %v5554_v39  ;;  %v5581_v22 = vld [vmem:[%s4947_s24 + $0x188] sm:$0xff] }
  0x5b   : > { %4322 = vmatprep.mubr.msk.f32.mxu0 %vm461_vm1, %v5493_v40  ;;  %4532 = vmatprep.subr.bf16.mxu1 %v4531_v19 }
  0x5c   : > { %v5536_v34 = vsel %vm1040_vm2, %v1101_v29, %v1102_v3  ;;  %v5550_v6 = vsel %vm1040_vm2, %v1102_v3, %v1104_v55  ;;  %v1114_v29 = vrot.slane %v5388_v27, 2  ;;  %v5571_v3 = vsel %vm1040_vm2, %v1111_v38, %v1112_v10 }
  0x5d   : > { %4075 = vmatmul.mubr.msk.f32.gmra.mrb[2].mxu1 %vm461_vm1, %v4970_v26  ;;  %4323 = vmatmul.mubr.msk.f32.gmra.mrb[18].mxu0 %vm461_vm1, %v5513_v12  ;;  %6405 = vst [vmem:[#allocation44_spill] sm:$0xff] %v5550_v6  ;;  %6407 = vst [vmem:[#allocation46_spill] sm:$0xff] %v5571_v3  ;;  %v1116_v55 = vrot.slane %v5396_v16, 2  ;;  %v5578_v26 = vld [vmem:[%s4947_s24 + $0x180] sm:$0xff] }
  0x5e   : > { %4077 = vmatprep.mubr.msk.f32.mxu1 %vm461_vm1, %v4983_v32  ;;  %4325 = vmatprep.mubr.msk.f32.mxu0 %vm461_vm1, %v5517_v14  ;;  %v5590_v27 = vsel %vm1040_vm2, %v1112_v10, %v1114_v29  ;;  %v1972_v38 = vrot.slane %v5578_v26, 2 }
  0x5f   : > { %4534 = vmatpush3.bf16.msra.mxu1 %v4531_v19  ;;  %v1109_v19 = vrot.slane %v5353_v58, 2  ;;  %6408 = vst [vmem:[#allocation47_spill] sm:$0xff] %v5590_v27 }
  0x60   : > { %4536 = vmatprep.subr.bf16.mxu1 %v5521_v60 }
  0x61   : > { %4078 = vmatmul.mubr.msk.f32.gmra.mrb[4].mxu1 %vm461_vm1, %v4991_v36  ;;  %4326 = vmatmul.mubr.msk.f32.gmra.mrb[20].mxu0 %vm461_vm1, %v5532_v43  ;;  %v5567_v58 = vsel %vm1040_vm2, %v1107_v59, %v1109_v19  ;;  %v1119_v59 = vrot.slane %v5423_v15, 2  ;;  %v5594_v19 = vsel %vm1040_vm2, %v1116_v55, %v1117_v8 }
  0x62   : > { %4080 = vmatprep.mubr.msk.f32.mxu1 %vm461_vm1, %v5006_v45  ;;  %4328 = vmatprep.mubr.msk.f32.mxu0 %vm461_vm1, %v5536_v34  ;;  %6409 = vst [vmem:[#allocation48_spill] sm:$0xff] %v5594_v19 }
  0x63   : > { %v5610_v15 = vsel %vm1040_vm2, %v1117_v8, %v1119_v59  ;;  %v326_v8 = vld [vmem:[%s6283_s1 + $0xf0] sm:$0xff]  ;;  %v327_v59 = vld [vmem:[%s6283_s1 + $0xf8] sm:$0xff] }
  0x64   : > { %6410 = vst [vmem:[#allocation49_spill] sm:$0xff] %v5610_v15 }
  0x65   : > { %4081 = vmatmul.mubr.msk.f32.gmra.mrb[6].mxu1 %vm461_vm1, %v5009_v46  ;;  %4329 = vmatmul.mubr.msk.f32.gmra.mrb[22].mxu0 %vm461_vm1, %v5550_v6  ;;  %v5599_v6 = vld [vmem:[%s4947_s24 + $0x190] sm:$0x3] }
  0x66   : > { %4083 = vmatprep.mubr.msk.f32.mxu1 %vm461_vm1, %v5020_v51  ;;  %4331 = vmatprep.mubr.msk.f32.mxu0 %vm461_vm1, %v5554_v39  ;;  %v1973_v39 = vrot.slane %v5581_v22, 2  ;;  %v1975_v10 = vrot.slane %v5599_v6, 2 }
  0x68   : > { %v5614_v29 = vsel %vm1040_vm2, %v1972_v38, %v1973_v39  ;;  %v5625_v55 = vsel %vm1040_vm2, %v1973_v39, %v1975_v10  ;;  %v4571_v39 = vpack.c.bf16 %v327_v59, %v326_v8  ;;  %v328_v38 = vld [vmem:[%s6283_s1 + $0x100] sm:$0xff]  ;;  %v329_v10 = vld [vmem:[%s6283_s1 + $0x108] sm:$0xff]  ;;  %v1042_v59 = vrot.slane %v4959_v21, 2  ;;  %v311_v21 = vld [vmem:[%s6283_s1 + $0x78] sm:$0xff] }
  0x69   : > { %4084 = vmatmul.mubr.msk.f32.gmra.mrb[8].mxu1 %vm461_vm1, %v5023_v52  ;;  %4332 = vmatmul.mubr.msk.f32.gmra.mrb[24].mxu0 %vm461_vm1, %v5567_v58  ;;  %6411 = vst [vmem:[#allocation50_spill] sm:$0xff] %v5614_v29  ;;  %6412 = vst [vmem:[#allocation51_spill] sm:$0xff] %v5625_v55  ;;  %v5656_v8 = vpack.c.bf16 %v329_v10, %v328_v38 }
  0x6a   : > { %4086 = vmatprep.mubr.msk.f32.mxu1 %vm461_vm1, %v5057_v1  ;;  %4334 = vmatprep.mubr.msk.f32.mxu0 %vm461_vm1, %v5571_v3 }
  0x6d   : > { %4087 = vmatmul.mubr.msk.f32.gmra.mrb[10].mxu1 %vm461_vm1, %v5060_v2  ;;  %4335 = vmatmul.mubr.msk.f32.gmra.mrb[26].mxu0 %vm461_vm1, %v5590_v27 }
  0x6e   : > { %4089 = vmatprep.mubr.msk.f32.mxu1 %vm461_vm1, %v5086_v11  ;;  %4337 = vmatprep.mubr.msk.f32.mxu0 %vm461_vm1, %v5594_v19 }
  0x71   : > { %4090 = vmatmul.mubr.msk.f32.gmra.mrb[12].mxu1 %vm461_vm1, %v5089_v13  ;;  %4338 = vmatmul.mubr.msk.f32.gmra.mrb[28].mxu0 %vm461_vm1, %v5610_v15 }
  0x72   : > { %4092 = vmatprep.mubr.msk.f32.mxu1 %vm461_vm1, %v5113_v23  ;;  %4340 = vmatprep.mubr.msk.f32.mxu0 %vm461_vm1, %v5614_v29  ;;  %v6421_v29 = vld [vmem:[#allocation5_spill] sm:$0xff] }
  0x75   : > { %4093 = vmatmul.mubr.msk.f32.gmra.mrb[14].mxu1 %vm461_vm1, %v5116_v24  ;;  %4341 = vmatmul.mubr.msk.f32.gmra.mrb[30].mxu0 %vm461_vm1, %v5625_v55  ;;  %v331_v55 = vld [vmem:[%s6283_s1 + $0x118] sm:$0xff] }
  0x76   : > { %4095 = vmatprep.mubr.msk.f32.mxu1 %vm461_vm1, %v5139_v35  ;;  %4351 = vmatprep.mubr.msk.f32.mxu0 %vm461_vm1, %v4983_v32 }
  0x79   : > { %4096 = vmatmul.mubr.msk.f32.gmra.mrb[16].mxu1 %vm461_vm1, %v5142_v37  ;;  %4352 = vmatmul.mubr.msk.f32.vlgmr.msra.gmra.mrb[0].mxu0 %vm461_vm1, %v4991_v36 }
  0x7a   : > { %4098 = vmatprep.mubr.msk.f32.mxu1 %vm461_vm1, %v5180_v56  ;;  %4570 = vmatpush3.bf16.msra.mxu0 %v5295_v47  ;;  %v1041_v47 = vrot.slane %v4956_v20, 2  ;;  %v310_v20 = vld [vmem:[%s6283_s1 + $0x70] sm:$0xff] }
  0x7b   : > { %4354 = vmatprep.mubr.msk.f32.mxu0 %vm461_vm1, %v5006_v45  ;;  %4572 = vmatprep.subr.bf16.mxu0 %v4571_v39  ;;  %v4539_v10 = vpack.c.bf16 %v311_v21, %v310_v20  ;;  %v5775_v20 = vld [vmem:[%s4947_s24 + $0x198] sm:$0xff]  ;;  %v6420_v21 = vld [vmem:[#allocation38_spill] sm:$0xff] }
  0x7c   : > { %v1043_v38 = vsel %vm1040_vm2, %v1041_v47, %v1042_v59  ;;  %v6416_v47 = vld [vmem:[#allocation27_spill] sm:$0xff] }
  0x7d   : > { %4099 = vmatmul.mubr.msk.f32.gmra.mrb[18].mxu1 %vm461_vm1, %v5183_v57  ;;  %4355 = vmatmul.mubr.msk.f32.gmra.mrb[2].mxu0 %vm461_vm1, %v5009_v46 }
  0x7e   : > { %4101 = vmatprep.mubr.msk.f32.mxu1 %vm461_vm1, %v5208_v17  ;;  %4357 = vmatprep.mubr.msk.f32.mxu0 %vm461_vm1, %v5020_v51 }
  0x7f   : > { %4574 = vmatpush3.bf16.msra.mxu0 %v4571_v39  ;;  %v1044_v39 = vrot.slane %v4974_v28, 2 }
  0x80   : > { %4576 = vmatprep.subr.bf16.mxu0 %v5656_v8 }
  0x81   : > { %4102 = vmatmul.mubr.msk.f32.gmra.mrb[20].mxu1 %vm461_vm1, %v5211_v18  ;;  %4358 = vmatmul.mubr.msk.f32.gmra.mrb[4].mxu0 %vm461_vm1, %v5023_v52  ;;  %v1045_v28 = vsel %vm1040_vm2, %v1042_v59, %v1044_v39  ;;  %v6417_v59 = vld [vmem:[#allocation29_spill] sm:$0xff]  ;;  %v6418_v39 = vld [vmem:[#allocation31_spill] sm:$0xff] }
  0x82   : > { %4104 = vmatprep.mubr.msk.f32.mxu1 %vm461_vm1, %v5246_v41  ;;  %4360 = vmatprep.mubr.msk.f32.mxu0 %vm461_vm1, %v5057_v1 }
  0x85   : > { %4105 = vmatmul.mubr.msk.f32.gmra.mrb[22].mxu1 %vm461_vm1, %v5249_v54  ;;  %4361 = vmatmul.mubr.msk.f32.gmra.mrb[6].mxu0 %vm461_vm1, %v5060_v2 }
  0x86   : > { %4107 = vmatprep.mubr.msk.f32.mxu1 %vm461_vm1, %v5288_v25  ;;  %4363 = vmatprep.mubr.msk.f32.mxu0 %vm461_vm1, %v5086_v11 }
  0x89   : > { %4108 = vmatmul.mubr.msk.f32.gmra.mrb[24].mxu1 %vm461_vm1, %v5291_v49  ;;  %4364 = vmatmul.mubr.msk.f32.gmra.mrb[8].mxu0 %vm461_vm1, %v5089_v13 }
  0x8a   : > { %4110 = vmatprep.mubr.msk.f32.mxu1 %vm461_vm1, %v5325_v48  ;;  %4366 = vmatprep.mubr.msk.f32.mxu0 %vm461_vm1, %v5113_v23 }
  0x8d   : > { %4111 = vmatmul.mubr.msk.f32.gmra.mrb[26].mxu1 %vm461_vm1, %v5328_v31  ;;  %4367 = vmatmul.mubr.msk.f32.gmra.mrb[10].mxu0 %vm461_vm1, %v5116_v24 }
  0x8e   : > { %4113 = vmatprep.mubr.msk.f32.mxu1 %vm461_vm1, %v5361_v0  ;;  %4369 = vmatprep.mubr.msk.f32.mxu0 %vm461_vm1, %v5139_v35 }
  0x91   : > { %4114 = vmatmul.mubr.msk.f32.gmra.mrb[28].mxu1 %vm461_vm1, %v5364_v62  ;;  %4370 = vmatmul.mubr.msk.f32.gmra.mrb[12].mxu0 %vm461_vm1, %v5142_v37 }
  0x92   : > { %4116 = vmatprep.mubr.msk.f32.mxu1 %vm461_vm1, %v5396_v16  ;;  %4372 = vmatprep.mubr.msk.f32.mxu0 %vm461_vm1, %v5180_v56 }
  0x95   : > { %4117 = vmatmul.mubr.msk.f32.gmra.mrb[30].mxu1 %vm461_vm1, %v5399_v4  ;;  %4373 = vmatmul.mubr.msk.f32.gmra.mrb[14].mxu0 %vm461_vm1, %v5183_v57 }
  0x96   : > { %4127 = vmatprep.mubr.msk.f32.mxu1 %vm461_vm1, %v1043_v38  ;;  %4375 = vmatprep.mubr.msk.f32.mxu0 %vm461_vm1, %v5208_v17  ;;  %v6419_v38 = vld [vmem:[#allocation33_spill] sm:$0xff] }
  0x99   : > { %4128 = vmatmul.mubr.msk.f32.vlgmr.msra.gmra.mrb[0].mxu1 %vm461_vm1, %v1045_v28  ;;  %4376 = vmatmul.mubr.msk.f32.gmra.mrb[16].mxu0 %vm461_vm1, %v5211_v18  ;;  %v5786_v28 = vld [vmem:[%s4947_s24 + $0x1a0] sm:$0xff] }
  0x9a   : > { %4538 = vmatpush3.bf16.msra.mxu1 %v5521_v60  ;;  %4130 = vmatprep.mubr.msk.f32.mxu1 %vm461_vm1, %v5203_v9  ;;  %v6413_v9 = vld [vmem:[#allocation21_spill] sm:$0xff] }
  0x9b   : > { %4378 = vmatprep.mubr.msk.f32.mxu0 %vm461_vm1, %v5246_v41  ;;  %4540 = vmatprep.subr.bf16.mxu1 %v4539_v10  ;;  %v6415_v60 = vld [vmem:[#allocation25_spill] sm:$0xff] }
  0x9d   : > { %4131 = vmatmul.mubr.msk.f32.gmra.mrb[2].mxu1 %vm461_vm1, %v5230_v42  ;;  %4379 = vmatmul.mubr.msk.f32.gmra.mrb[18].mxu0 %vm461_vm1, %v5249_v54  ;;  %v6414_v42 = vld [vmem:[#allocation23_spill] sm:$0xff] }
  0x9e   : > { %4133 = vmatprep.mubr.msk.f32.mxu1 %vm461_vm1, %v5241_v50  ;;  %4381 = vmatprep.mubr.msk.f32.mxu0 %vm461_vm1, %v5288_v25 }
  0x9f   : > { %4542 = vmatpush3.bf16.msra.mxu1 %v4539_v10  ;;  %v330_v10 = vld [vmem:[%s6283_s1 + $0x110] sm:$0xff] }
  0xa0   : > { %4583 = vmatprep.subr.bf16.mxu1 %v4916_v7 }
  0xa1   : > { %4134 = vmatmul.mubr.msk.f32.gmra.mrb[4].mxu1 %vm461_vm1, %v6413_v9  ;;  %4382 = vmatmul.mubr.msk.f32.gmra.mrb[20].mxu0 %vm461_vm1, %v5291_v49 }
  0xa2   : > { %4136 = vmatprep.mubr.msk.f32.mxu1 %vm461_vm1, %v6414_v42  ;;  %4384 = vmatprep.mubr.msk.f32.mxu0 %vm461_vm1, %v5325_v48 }
  0xa5   : > { %4137 = vmatmul.mubr.msk.f32.gmra.mrb[6].mxu1 %vm461_vm1, %v6415_v60  ;;  %4385 = vmatmul.mubr.msk.f32.gmra.mrb[22].mxu0 %vm461_vm1, %v5328_v31 }
  0xa6   : > { %4139 = vmatprep.mubr.msk.f32.mxu1 %vm461_vm1, %v6416_v47  ;;  %4387 = vmatprep.mubr.msk.f32.mxu0 %vm461_vm1, %v5361_v0 }
  0xa9   : > { %4140 = vmatmul.mubr.msk.f32.gmra.mrb[8].mxu1 %vm461_vm1, %v6417_v59  ;;  %4388 = vmatmul.mubr.msk.f32.gmra.mrb[24].mxu0 %vm461_vm1, %v5364_v62 }
  0xaa   : > { %4142 = vmatprep.mubr.msk.f32.mxu1 %vm461_vm1, %v6418_v39  ;;  %4390 = vmatprep.mubr.msk.f32.mxu0 %vm461_vm1, %v5396_v16  ;;  %v6422_v16 = vld [vmem:[#allocation6_spill] sm:$0xff] }
  0xad   : > { %4143 = vmatmul.mubr.msk.f32.gmra.mrb[10].mxu1 %vm461_vm1, %v6419_v38  ;;  %4391 = vmatmul.mubr.msk.f32.gmra.mrb[26].mxu0 %vm461_vm1, %v5399_v4  ;;  %v4579_v4 = vpack.c.bf16 %v331_v55, %v330_v10  ;;  %v6425_v55 = vld [vmem:[#allocation9_spill] sm:$0xff]  ;;  %v6430_v10 = vld [vmem:[#allocation44_spill] sm:$0xff] }
  0xae   : > { %4145 = vmatprep.mubr.msk.f32.mxu1 %vm461_vm1, %v5391_v5  ;;  %4393 = vmatprep.mubr.msk.f32.mxu0 %vm461_vm1, %v5578_v26 }
  0xb1   : > { %4146 = vmatmul.mubr.msk.f32.gmra.mrb[12].mxu1 %vm461_vm1, %v6420_v21  ;;  %4394 = vmatmul.mubr.msk.f32.gmra.mrb[28].mxu0 %vm461_vm1, %v5581_v22 }
  0xb2   : > { %4148 = vmatprep.mubr.msk.f32.mxu1 %vm461_vm1, %v5426_v30  ;;  %4396 = vmatprep.mubr.msk.f32.mxu0 %vm461_vm1, %v5775_v20 }
  0xb5   : > { %4149 = vmatmul.mubr.msk.f32.gmra.mrb[14].mxu1 %vm461_vm1, %v5443_v63  ;;  %4397 = vmatmul.mubr.msk.f32.gmra.mrb[30].mxu0 %vm461_vm1, %v5786_v28  ;;  %v6423_v63 = vld [vmem:[#allocation7_spill] sm:$0xff] }
  0xb6   : > { %4151 = vmatprep.mubr.msk.f32.mxu1 %vm461_vm1, %v5450_v53  ;;  %4407 = vmatprep.mubr.msk.f32.mxu0 %vm461_vm1, %v6421_v29  ;;  %v6424_v29 = vld [vmem:[#allocation8_spill] sm:$0xff] }
  0xb9   : > { %4152 = vmatmul.mubr.msk.f32.gmra.mrb[16].mxu1 %vm461_vm1, %v5466_v44  ;;  %4408 = vmatmul.mubr.msk.f32.vlgmr.msra.gmra.mrb[0].mxu0 %vm461_vm1, %v6422_v16  ;;  %v6426_v16 = vld [vmem:[#allocation10_spill] sm:$0xff] }
  0xba   : > { %4154 = vmatprep.mubr.msk.f32.mxu1 %vm461_vm1, %v5470_v33  ;;  %4578 = vmatpush3.bf16.msra.mxu0 %v5656_v8  ;;  %v6428_v8 = vld [vmem:[#allocation12_spill] sm:$0xff] }
  0xbb   : > { %4410 = vmatprep.mubr.msk.f32.mxu0 %vm461_vm1, %v6423_v63  ;;  %4580 = vmatprep.subr.bf16.mxu0 %v4579_v4  ;;  %v6427_v63 = vld [vmem:[#allocation11_spill] sm:$0xff] }
  0xbd   : > { %4155 = vmatmul.mubr.msk.f32.gmra.mrb[18].mxu1 %vm461_vm1, %v5489_v61  ;;  %4411 = vmatmul.mubr.msk.f32.gmra.mrb[2].mxu0 %vm461_vm1, %v6424_v29  ;;  %v6431_v29 = vld [vmem:[#allocation14_spill] sm:$0xff] }
  0xbe   : > { %4157 = vmatprep.mubr.msk.f32.mxu1 %vm461_vm1, %v5493_v40  ;;  %4413 = vmatprep.mubr.msk.f32.mxu0 %vm461_vm1, %v6425_v55  ;;  %v6432_v55 = vld [vmem:[#allocation45_spill] sm:$0xff] }
  0xbf   : > { %4582 = vmatpush3.bf16.msra.mxu0 %v4579_v4  ;;  %v6429_v4 = vld [vmem:[#allocation13_spill] sm:$0xff] }
  0xc1   : > { %4158 = vmatmul.mubr.msk.f32.gmra.mrb[20].mxu1 %vm461_vm1, %v5513_v12  ;;  %4414 = vmatmul.mubr.msk.f32.gmra.mrb[4].mxu0 %vm461_vm1, %v6426_v16  ;;  %v6433_v16 = vld [vmem:[#allocation15_spill] sm:$0xff] }
  0xc2   : > { %4160 = vmatprep.mubr.msk.f32.mxu1 %vm461_vm1, %v5517_v14  ;;  %4416 = vmatprep.mubr.msk.f32.mxu0 %vm461_vm1, %v6427_v63  ;;  %v6434_v63 = vld [vmem:[#allocation16_spill] sm:$0xff] }
  0xc5   : > { %4161 = vmatmul.mubr.msk.f32.gmra.mrb[22].mxu1 %vm461_vm1, %v5532_v43  ;;  %4417 = vmatmul.mubr.msk.f32.gmra.mrb[6].mxu0 %vm461_vm1, %v6428_v8  ;;  %v6435_v8 = vld [vmem:[#allocation17_spill] sm:$0xff] }
  0xc6   : > { %4163 = vmatprep.mubr.msk.f32.mxu1 %vm461_vm1, %v5536_v34  ;;  %4419 = vmatprep.mubr.msk.f32.mxu0 %vm461_vm1, %v6429_v4  ;;  %v6436_v4 = vld [vmem:[#allocation18_spill] sm:$0xff] }
  0xc9   : > { %4164 = vmatmul.mubr.msk.f32.gmra.mrb[24].mxu1 %vm461_vm1, %v6430_v10  ;;  %4420 = vmatmul.mubr.msk.f32.gmra.mrb[8].mxu0 %vm461_vm1, %v6431_v29  ;;  %v6437_v29 = vld [vmem:[#allocation19_spill] sm:$0xff] }
  0xca   : > { %4166 = vmatprep.mubr.msk.f32.mxu1 %vm461_vm1, %v6432_v55  ;;  %4422 = vmatprep.mubr.msk.f32.mxu0 %vm461_vm1, %v6433_v16  ;;  %v6438_v16 = vld [vmem:[#allocation20_spill] sm:$0xff] }
  0xcd   : > { %4167 = vmatmul.mubr.msk.f32.gmra.mrb[26].mxu1 %vm461_vm1, %v5567_v58  ;;  %4423 = vmatmul.mubr.msk.f32.gmra.mrb[10].mxu0 %vm461_vm1, %v6434_v63  ;;  %v6439_v63 = vld [vmem:[#allocation3_spill] sm:$0xff] }
  0xce   : > { %4169 = vmatprep.mubr.msk.f32.mxu1 %vm461_vm1, %v5571_v3  ;;  %4425 = vmatprep.mubr.msk.f32.mxu0 %vm461_vm1, %v6435_v8  ;;  %v6440_v8 = vld [vmem:[#allocation22_spill] sm:$0xff] }
  0xd1   : > { %4170 = vmatmul.mubr.msk.f32.gmra.mrb[28].mxu1 %vm461_vm1, %v5590_v27  ;;  %4426 = vmatmul.mubr.msk.f32.gmra.mrb[12].mxu0 %vm461_vm1, %v6436_v4  ;;  %v6441_v27 = vld [vmem:[#allocation4_spill] sm:$0xff] }
  0xd2   : > { %4172 = vmatprep.mubr.msk.f32.mxu1 %vm461_vm1, %v5594_v19  ;;  %4428 = vmatprep.mubr.msk.f32.mxu0 %vm461_vm1, %v6437_v29  ;;  %v6442_v4 = vld [vmem:[#allocation24_spill] sm:$0xff]  ;;  %v6444_v19 = vld [vmem:[#allocation2_spill] sm:$0xff] }
  0xd5   : > { %4173 = vmatmul.mubr.msk.f32.gmra.mrb[30].mxu1 %vm461_vm1, %v5610_v15  ;;  %4429 = vmatmul.mubr.msk.f32.gmra.mrb[14].mxu0 %vm461_vm1, %v6438_v16  ;;  %v6443_v15 = vld [vmem:[#allocation26_spill] sm:$0xff] }
  0xd6   : > { %4183 = vmatprep.mubr.msk.f32.mxu1 %vm461_vm1, %v6439_v63  ;;  %4431 = vmatprep.mubr.msk.f32.mxu0 %vm461_vm1, %v6440_v8  ;;  %v6445_v63 = vld [vmem:[#allocation28_spill] sm:$0xff] }
  0xd9   : > { %4184 = vmatmul.mubr.msk.f32.vlgmr.msra.gmra.mrb[0].mxu1 %vm461_vm1, %v6441_v27  ;;  %4432 = vmatmul.mubr.msk.f32.gmra.mrb[16].mxu0 %vm461_vm1, %v6442_v4  ;;  %v1706_v27 = vrot.slane %v5578_v26, 1 }
  0xda   : > { %4585 = vmatpush3.bf16.msra.mxu1 %v4916_v7  ;;  %4186 = vmatprep.mubr.msk.f32.mxu1 %vm461_vm1, %v4983_v32  ;;  %v6446_v7 = vld [vmem:[#allocation30_spill] sm:$0xff]  ;;  %v6447_v32 = vld [vmem:[#allocation32_spill] sm:$0xff] }
  0xdb   : > { %4434 = vmatprep.mubr.msk.f32.mxu0 %vm461_vm1, %v6443_v15  ;;  %4584 = vmatprep.subr.bf16.mxu1 %v6444_v19 }
  0xdd   : > { %4187 = vmatmul.mubr.msk.f32.gmra.mrb[2].mxu1 %vm461_vm1, %v4991_v36  ;;  %4435 = vmatmul.mubr.msk.f32.gmra.mrb[18].mxu0 %vm461_vm1, %v6445_v63  ;;  %v6448_v36 = vld [vmem:[#allocation34_spill] sm:$0xff] }
  0xde   : > { %4189 = vmatprep.mubr.msk.f32.mxu1 %vm461_vm1, %v5006_v45  ;;  %4437 = vmatprep.mubr.msk.f32.mxu0 %vm461_vm1, %v6446_v7  ;;  %v6449_v45 = vld [vmem:[#allocation37_spill] sm:$0xff] }
  0xdf   : > { %4586 = vmatpush3.bf16.msra.mxu1 %v6444_v19  ;;  %v6451_v19 = vld [vmem:[#allocation40_spill] sm:$0xff] }
  0xe1   : > { %4190 = vmatmul.mubr.msk.f32.gmra.mrb[4].mxu1 %vm461_vm1, %v5009_v46  ;;  %4438 = vmatmul.mubr.msk.f32.gmra.mrb[20].mxu0 %vm461_vm1, %v6447_v32  ;;  %v6450_v46 = vld [vmem:[#allocation39_spill] sm:$0xff] }
  0xe2   : > { %4192 = vmatprep.mubr.msk.f32.mxu1 %vm461_vm1, %v5020_v51  ;;  %4440 = vmatprep.mubr.msk.f32.mxu0 %vm461_vm1, %v6448_v36  ;;  %v1707_v51 = vrot.slane %v5581_v22, 1  ;;  %v5919_v36 = vld [vmem:[%s4947_s24 + $0x1a8] sm:$0x3]  ;;  %s3682_s24 = sshll.u32 %s6467_s19, 8 }
  0xe3   : > { %s6101_s8 = scalar_lea.vmem %s6285_s3, %s3682_s24 }
  0xe4   : > { %v5916_v3 = vsel %vm380_vm0, %v1706_v27, %v1707_v51 }
  0xe5   : > { %4193 = vmatmul.mubr.msk.f32.gmra.mrb[6].mxu1 %vm461_vm1, %v5023_v52  ;;  %4441 = vmatmul.mubr.msk.f32.gmra.mrb[22].mxu0 %vm461_vm1, %v6449_v45  ;;  %v6452_v52 = vld [vmem:[#allocation42_spill] sm:$0xff]  ;;  %v2503_v45 = vrot.slane %v5786_v28, 1 }
  0xe6   : > { %4195 = vmatprep.mubr.msk.f32.mxu1 %vm461_vm1, %v5057_v1  ;;  %4443 = vmatprep.mubr.msk.f32.mxu0 %vm461_vm1, %v6450_v46  ;;  %v1709_v1 = vrot.slane %v5599_v6, 1  ;;  %v2502_v46 = vrot.slane %v5775_v20, 1  ;;  %v2505_v6 = vrot.slane %v5919_v36, 1 }
  0xe8   : > { %v2504_v27 = vsel %vm380_vm0, %v2502_v46, %v2503_v45 }
  0xe9   : > { %4196 = vmatmul.mubr.msk.f32.gmra.mrb[8].mxu1 %vm461_vm1, %v5060_v2  ;;  %4444 = vmatmul.mubr.msk.f32.gmra.mrb[24].mxu0 %vm461_vm1, %v6451_v19  ;;  %v6453_v2 = vld [vmem:[#allocation43_spill] sm:$0xff] }
  0xea   : > { %4198 = vmatprep.mubr.msk.f32.mxu1 %vm461_vm1, %v5086_v11  ;;  %4446 = vmatprep.mubr.msk.f32.mxu0 %vm461_vm1, %v6452_v52  ;;  %v5930_v11 = vsel %vm380_vm0, %v1707_v51, %v1709_v1 }
  0xed   : > { %4199 = vmatmul.mubr.msk.f32.gmra.mrb[10].mxu1 %vm461_vm1, %v5089_v13  ;;  %4447 = vmatmul.mubr.msk.f32.gmra.mrb[26].mxu0 %vm461_vm1, %v6453_v2  ;;  %v2506_v13 = vsel %vm380_vm0, %v2503_v45, %v2505_v6 }
  0xee   : > { %4201 = vmatprep.mubr.msk.f32.mxu1 %vm461_vm1, %v5113_v23  ;;  %4449 = vmatprep.mubr.msk.f32.mxu0 %vm461_vm1, %v5916_v3  ;;  %v6454_v23 = vld [vmem:[#allocation41_spill] sm:$0xff] }
  0xf1   : > { %4202 = vmatmul.mubr.msk.f32.gmra.mrb[12].mxu1 %vm461_vm1, %v5116_v24  ;;  %4450 = vmatmul.mubr.msk.f32.gmra.mrb[28].mxu0 %vm461_vm1, %v5930_v11  ;;  %v6455_v24 = vld [vmem:[#allocation35_spill] sm:$0xff] }
  0xf2   : > { %4204 = vmatprep.mubr.msk.f32.mxu1 %vm461_vm1, %v5139_v35  ;;  %4452 = vmatprep.mubr.msk.f32.mxu0 %vm461_vm1, %v2504_v27  ;;  %v6459_v35 = vld [vmem:[#allocation37_spill] sm:$0xff] }
  0xf5   : > { %4205 = vmatmul.mubr.msk.f32.gmra.mrb[14].mxu1 %vm461_vm1, %v5142_v37  ;;  %4453 = vmatmul.mubr.msk.f32.gmra.mrb[30].mxu0 %vm461_vm1, %v2506_v13  ;;  %v6460_v37 = vld [vmem:[#allocation47_spill] sm:$0xff] }
  0xf6   : > { %4207 = vmatprep.mubr.msk.f32.mxu1 %vm461_vm1, %v5180_v56  ;;  %4463 = vmatprep.mubr.msk.f32.mxu0 %vm461_vm1, %v5241_v50  ;;  %v6462_v50 = vld [vmem:[#allocation48_spill] sm:$0xff]  ;;  %v2768_v56 = vrot.slane %v5775_v20, 2 }
  0xf9   : > { %4208 = vmatmul.mubr.msk.f32.gmra.mrb[16].mxu1 %vm461_vm1, %v5183_v57  ;;  %4464 = vmatmul.mubr.msk.f32.vlgmr.msra.gmra.mrb[0].mxu0 %vm461_vm1, %v6413_v9  ;;  %v2769_v57 = vrot.slane %v5786_v28, 2 }
  0xfa   : > { %4210 = vmatprep.mubr.msk.f32.mxu1 %vm461_vm1, %v5208_v17  ;;  %4466 = vmatprep.mubr.msk.f32.mxu0 %vm461_vm1, %v6414_v42  ;;  %v6463_v17 = vld [vmem:[#allocation49_spill] sm:$0xff]  ;;  %v6096_v42 = vld [vmem:[%s6284_s2] ss:$0 sm:$0xff] }
  0xfd   : > { %4211 = vmatmul.mubr.msk.f32.gmra.mrb[18].mxu1 %vm461_vm1, %v5211_v18  ;;  %4467 = vmatmul.mubr.msk.f32.gmra.mrb[2].mxu0 %vm461_vm1, %v6415_v60  ;;  %v6464_v18 = vld [vmem:[#allocation50_spill] sm:$0xff] }
  0xfe   : > { %4213 = vmatprep.mubr.msk.f32.mxu1 %vm461_vm1, %v5246_v41  ;;  %4469 = vmatprep.mubr.msk.f32.mxu0 %vm461_vm1, %v6416_v47  ;;  %v6461_v41 = vld [vmem:[#allocation39_spill] sm:$0xff] }
 0x101   : > { %4214 = vmatmul.mubr.msk.f32.gmra.mrb[20].mxu1 %vm461_vm1, %v5249_v54  ;;  %4470 = vmatmul.mubr.msk.f32.gmra.mrb[4].mxu0 %vm461_vm1, %v6417_v59  ;;  %v2771_v54 = vrot.slane %v5919_v36, 2 }
 0x102   : > { %4216 = vmatprep.mubr.msk.f32.mxu1 %vm461_vm1, %v5288_v25  ;;  %4472 = vmatprep.mubr.msk.f32.mxu0 %vm461_vm1, %v6418_v39  ;;  %v6456_v25 = vld [vmem:[#allocation36_spill] sm:$0xff] }
 0x105   : > { %4217 = vmatmul.mubr.msk.f32.gmra.mrb[22].mxu1 %vm461_vm1, %v5291_v49  ;;  %4473 = vmatmul.mubr.msk.f32.gmra.mrb[6].mxu0 %vm461_vm1, %v6419_v38  ;;  %v2770_v49 = vsel %vm1040_vm2, %v2768_v56, %v2769_v57 }
 0x106   : > { %4219 = vmatprep.mubr.msk.f32.mxu1 %vm461_vm1, %v5325_v48  ;;  %4475 = vmatprep.mubr.msk.f32.mxu0 %vm461_vm1, %v5391_v5  ;;  %v6465_v48 = vld [vmem:[#allocation51_spill] sm:$0xff] }
 0x109   : > { %4220 = vmatmul.mubr.msk.f32.gmra.mrb[24].mxu1 %vm461_vm1, %v5328_v31  ;;  %4476 = vmatmul.mubr.msk.f32.gmra.mrb[8].mxu0 %vm461_vm1, %v6420_v21  ;;  %v2772_v31 = vsel %vm1040_vm2, %v2769_v57, %v2771_v54 }
 0x10a   : > { %4222 = vmatprep.mubr.msk.f32.mxu1 %vm461_vm1, %v5361_v0  ;;  %4478 = vmatprep.mubr.msk.f32.mxu0 %vm461_vm1, %v5426_v30 }
 0x10d   : > { %4223 = vmatmul.mubr.msk.f32.gmra.mrb[26].mxu1 %vm461_vm1, %v5364_v62  ;;  %4479 = vmatmul.mubr.msk.f32.gmra.mrb[10].mxu0 %vm461_vm1, %v6454_v23 }
 0x10e   : > { %4225 = vmatprep.mubr.msk.f32.mxu1 %vm461_vm1, %v6455_v24  ;;  %4481 = vmatprep.mubr.msk.f32.mxu0 %vm461_vm1, %v5450_v53 }
 0x111   : > { %4226 = vmatmul.mubr.msk.f32.gmra.mrb[28].mxu1 %vm461_vm1, %v6456_v25  ;;  %4482 = vmatmul.mubr.msk.f32.gmra.mrb[12].mxu0 %vm461_vm1, %v5466_v44 }
 0x112   : > { %4228 = vmatprep.mubr.msk.f32.mxu1 %vm461_vm1, %v5578_v26  ;;  %4484 = vmatprep.mubr.msk.f32.mxu0 %vm461_vm1, %v5470_v33  ;;  %v6458_v26 = vld [vmem:[#allocation46_spill] sm:$0xff] }
 0x115   : > { %4229 = vmatmul.mubr.msk.f32.gmra.mrb[30].mxu1 %vm461_vm1, %v5581_v22  ;;  %4485 = vmatmul.mubr.msk.f32.gmra.mrb[14].mxu0 %vm461_vm1, %v5489_v61  ;;  %v6457_v22 = vld [vmem:[#allocation34_spill] sm:$0xff] }
 0x116   : > { %4263 = vmatprep.mubr.msk.f32.mxu1 %vm461_vm1, %v6437_v29  ;;  %4487 = vmatprep.mubr.msk.f32.mxu0 %vm461_vm1, %v5493_v40 }
 0x119   : > { %4264 = vmatmul.mubr.msk.f32.vlgmr.msra.gmra.mrb[16].mxu1 %vm461_vm1, %v6438_v16  ;;  %4488 = vmatmul.mubr.msk.f32.gmra.mrb[16].mxu0 %vm461_vm1, %v5513_v12 }
 0x11a   : > { %4266 = vmatprep.mubr.msk.f32.mxu1 %vm461_vm1, %v6440_v8  ;;  %4490 = vmatprep.mubr.msk.f32.mxu0 %vm461_vm1, %v5517_v14 }
 0x11d   : > { %4267 = vmatmul.mubr.msk.f32.gmra.mrb[18].mxu1 %vm461_vm1, %v6442_v4  ;;  %4491 = vmatmul.mubr.msk.f32.gmra.mrb[18].mxu0 %vm461_vm1, %v5532_v43 }
 0x11e   : > { %4269 = vmatprep.mubr.msk.f32.mxu1 %vm461_vm1, %v6443_v15  ;;  %4493 = vmatprep.mubr.msk.f32.mxu0 %vm461_vm1, %v5536_v34 }
 0x121   : > { %4270 = vmatmul.mubr.msk.f32.gmra.mrb[20].mxu1 %vm461_vm1, %v6445_v63  ;;  %4494 = vmatmul.mubr.msk.f32.gmra.mrb[20].mxu0 %vm461_vm1, %v6430_v10 }
 0x122   : > { %4272 = vmatprep.mubr.msk.f32.mxu1 %vm461_vm1, %v6446_v7  ;;  %4496 = vmatprep.mubr.msk.f32.mxu0 %vm461_vm1, %v6432_v55 }
 0x125   : > { %4273 = vmatmul.mubr.msk.f32.gmra.mrb[22].mxu1 %vm461_vm1, %v6447_v32  ;;  %4497 = vmatmul.mubr.msk.f32.gmra.mrb[22].mxu0 %vm461_vm1, %v5567_v58 }
 0x126   : > { %4275 = vmatprep.mubr.msk.f32.mxu1 %vm461_vm1, %v6457_v22  ;;  %4499 = vmatprep.mubr.msk.f32.mxu0 %vm461_vm1, %v6458_v26 }
 0x129   : > { %4276 = vmatmul.mubr.msk.f32.gmra.mrb[24].mxu1 %vm461_vm1, %v6459_v35  ;;  %4500 = vmatmul.mubr.msk.f32.gmra.mrb[24].mxu0 %vm461_vm1, %v6460_v37 }
 0x12a   : > { %4278 = vmatprep.mubr.msk.f32.mxu1 %vm461_vm1, %v6461_v41  ;;  %4502 = vmatprep.mubr.msk.f32.mxu0 %vm461_vm1, %v6462_v50 }
 0x12d   : > { %4279 = vmatmul.mubr.msk.f32.gmra.mrb[26].mxu1 %vm461_vm1, %v6451_v19  ;;  %4503 = vmatmul.mubr.msk.f32.gmra.mrb[26].mxu0 %vm461_vm1, %v6463_v17 }
 0x12e   : > { %4281 = vmatprep.mubr.msk.f32.mxu1 %vm461_vm1, %v6452_v52  ;;  %4505 = vmatprep.mubr.msk.f32.mxu0 %vm461_vm1, %v6464_v18 }
 0x131   : > { %4282 = vmatmul.mubr.msk.f32.gmra.mrb[28].mxu1 %vm461_vm1, %v6453_v2  ;;  %4506 = vmatmul.mubr.msk.f32.gmra.mrb[28].mxu0 %vm461_vm1, %v6465_v48 }
 0x132   : > { %4284 = vmatprep.mubr.msk.f32.mxu1 %vm461_vm1, %v5916_v3  ;;  %4508 = vmatprep.mubr.msk.f32.mxu0 %vm461_vm1, %v2770_v49 }
 0x135   : > { %4285 = vmatmul.mubr.msk.f32.gmra.mrb[30].mxu1 %vm461_vm1, %v5930_v11  ;;  %4509 = vmatmul.mubr.msk.f32.gmra.mrb[30].mxu0 %vm461_vm1, %v2772_v31 }
 0x1ac   : > { %v4185_v0 = vpop.f32.mrb[0].mxu1 }
 0x1ad   : > { %v1514_v62 = vpop.f32.mrb[1].mxu1 }
 0x1b0   : > { %v4188_v5 = vpop.f32.mrb[2].mxu1 }
 0x1b1   : > { %v1524_v53 = vpop.f32.mrb[3].mxu1 }
 0x1b4   : > { %v4191_v30 = vpop.f32.mrb[4].mxu1 }
 0x1b5   : > { %v1534_v44 = vpop.f32.mrb[5].mxu1 }
 0x1b8   : > { %v4194_v33 = vpop.f32.mrb[6].mxu1 }
 0x1b9   : > { %v1544_v61 = vpop.f32.mrb[7].mxu1 }
 0x1bc   : > { %v6076_v40 = vpop.f32.mrb[8].mxu1 }
 0x1bd   : > { %v6078_v12 = vpop.f32.mrb[9].mxu1 }
 0x1c0   : > { %v6080_v14 = vpop.f32.mrb[10].mxu1 }
 0x1c1   : > { %v6082_v43 = vpop.f32.mrb[11].mxu1 }
 0x1c4   : > { %v6084_v34 = vpop.f32.mrb[12].mxu1 }
 0x1c5   : > { %v6086_v58 = vpop.f32.mrb[13].mxu1 }
 0x1c8   : > { %v6088_v3 = vpop.f32.mrb[14].mxu1 }
 0x1c9   : > { %v6090_v15 = vpop.f32.mrb[15].mxu1 }
 0x1cc   : > { %v4465_v9 = vpop.f32.mrb[0].mxu0 }
 0x1cd   : > { %v4587_v60 = vadd.f32 %v4465_v9, %v4185_v0  ;;  %v2843_v47 = vpop.f32.mrb[1].mxu0 }
 0x1ce   : > { %v4588_v59 = vadd.f32 %v2843_v47, %v1514_v62 }
 0x1cf   : > { %v3042_v39 = vadd.f32 %v4587_v60, %v6096_v42 }
 0x1d0   : > { %v3041_v38 = vadd.f32 %v4588_v59, %v6096_v42  ;;  %v4468_v20 = vpop.f32.mrb[2].mxu0 }
 0x1d1   : > { %3074 = vst.msk [vmem:[%s6101_s8 + $0x8] sm:$0xff] %vm461_vm1, %v3042_v39  ;;  %v3106_v21 = vsel %vm461_vm1, %v3042_v39, 0.0  ;;  %v3177_v28 = vmul.f32 %v3042_v39, %v3042_v39  ;;  %v4589_v10 = vadd.f32 %v4468_v20, %v4188_v5  ;;  %v2853_v55 = vpop.f32.mrb[3].mxu0 }
 0x1d2   : > { %3073 = vst.msk [vmem:[%s6101_s8] sm:$0xff] %vm461_vm1, %v3041_v38  ;;  %v3105_v29 = vsel %vm461_vm1, %v3041_v38, 0.0  ;;  %v3176_v16 = vmul.f32 %v3041_v38, %v3041_v38  ;;  %v4590_v8 = vadd.f32 %v2853_v55, %v1524_v53 }
 0x1d3   : > { %v3209_v4 = vsel %vm461_vm1, %v3177_v28, 0.0  ;;  %v3107_v63 = vadd.f32 %v3106_v21, %v3105_v29  ;;  %v3044_v7 = vadd.f32 %v4589_v10, %v6096_v42 }
 0x1d4   : > { %v3208_v32 = vsel %vm461_vm1, %v3176_v16, 0.0  ;;  %v3043_v36 = vadd.f32 %v4590_v8, %v6096_v42  ;;  %v4471_v45 = vpop.f32.mrb[4].mxu0 }
 0x1d5   : > { %v3210_v46 = vadd.f32 %v3209_v4, %v3208_v32  ;;  %3076 = vst.msk [vmem:[%s6101_s8 + $0x18] sm:$0xff] %vm461_vm1, %v3044_v7  ;;  %v3179_v51 = vmul.f32 %v3044_v7, %v3044_v7  ;;  %v4591_v19 = vadd.f32 %v4471_v45, %v4191_v30  ;;  %v2863_v52 = vpop.f32.mrb[5].mxu0  ;;  %v3110_v13 = vsel %vm461_vm1, %v3044_v7, 0.0 }
 0x1d6   : > { %3075 = vst.msk [vmem:[%s6101_s8 + $0x10] sm:$0xff] %vm461_vm1, %v3043_v36  ;;  %v3108_v1 = vsel %vm461_vm1, %v3043_v36, 0.0  ;;  %v3178_v2 = vmul.f32 %v3043_v36, %v3043_v36  ;;  %v4592_v11 = vadd.f32 %v2863_v52, %v1534_v44 }
 0x1d7   : > { %v3109_v6 = vadd.f32 %v3108_v1, %v3107_v63  ;;  %v3046_v27 = vadd.f32 %v4591_v19, %v6096_v42  ;;  %v3213_v22 = vsel %vm461_vm1, %v3179_v51, 0.0 }
 0x1d8   : > { %v3211_v23 = vsel %vm461_vm1, %v3178_v2, 0.0  ;;  %v3045_v24 = vadd.f32 %v4592_v11, %v6096_v42  ;;  %v4474_v25 = vpop.f32.mrb[6].mxu0 }
 0x1d9   : > { %v3212_v26 = vadd.f32 %v3211_v23, %v3210_v46  ;;  %3078 = vst.msk [vmem:[%s6101_s8 + $0x28] sm:$0xff] %vm461_vm1, %v3046_v27  ;;  %v3181_v35 = vmul.f32 %v3046_v27, %v3046_v27  ;;  %v3111_v37 = vadd.f32 %v3110_v13, %v3109_v6  ;;  %v2873_v41 = vpop.f32.mrb[7].mxu0  ;;  %v4593_v57 = vadd.f32 %v4474_v25, %v4194_v33 }
 0x1da   : > { %3077 = vst.msk [vmem:[%s6101_s8 + $0x20] sm:$0xff] %vm461_vm1, %v3045_v24  ;;  %v3112_v50 = vsel %vm461_vm1, %v3045_v24, 0.0  ;;  %v3180_v56 = vmul.f32 %v3045_v24, %v3045_v24  ;;  %v4594_v17 = vadd.f32 %v2873_v41, %v1544_v61  ;;  %v3114_v49 = vsel %vm461_vm1, %v3046_v27, 0.0 }
 0x1db   : > { %v3113_v18 = vadd.f32 %v3112_v50, %v3111_v37  ;;  %v3214_v54 = vadd.f32 %v3213_v22, %v3212_v26  ;;  %v3048_v31 = vadd.f32 %v4593_v57, %v6096_v42  ;;  %v3217_v33 = vsel %vm461_vm1, %v3181_v35, 0.0 }
 0x1dc   : > { %v3215_v48 = vsel %vm461_vm1, %v3180_v56, 0.0  ;;  %v3047_v0 = vadd.f32 %v4594_v17, %v6096_v42  ;;  %v4477_v62 = vpop.f32.mrb[8].mxu0 }
 0x1dd   : > { %v3216_v5 = vadd.f32 %v3215_v48, %v3214_v54  ;;  %v3115_v53 = vadd.f32 %v3114_v49, %v3113_v18  ;;  %v4595_v30 = vadd.f32 %v4477_v62, %v6076_v40  ;;  %v2883_v44 = vpop.f32.mrb[9].mxu0  ;;  %3080 = vst.msk [vmem:[%s6101_s8 + $0x38] sm:$0xff] %vm461_vm1, %v3048_v31  ;;  %v3183_v61 = vmul.f32 %v3048_v31, %v3048_v31 }
 0x1de   : > { %3079 = vst.msk [vmem:[%s6101_s8 + $0x30] sm:$0xff] %vm461_vm1, %v3047_v0  ;;  %v3116_v9 = vsel %vm461_vm1, %v3047_v0, 0.0  ;;  %v3182_v60 = vmul.f32 %v3047_v0, %v3047_v0  ;;  %v4596_v38 = vadd.f32 %v2883_v44, %v6078_v12  ;;  %v3118_v21 = vsel %vm461_vm1, %v3048_v31, 0.0 }
 0x1df   : > { %v3117_v47 = vadd.f32 %v3116_v9, %v3115_v53  ;;  %v3218_v59 = vadd.f32 %v3217_v33, %v3216_v5  ;;  %v3050_v39 = vadd.f32 %v4595_v30, %v6096_v42  ;;  %v3221_v28 = vsel %vm461_vm1, %v3183_v61, 0.0 }
 0x1e0   : > { %v3219_v40 = vsel %vm461_vm1, %v3182_v60, 0.0  ;;  %v4480_v20 = vpop.f32.mrb[10].mxu0  ;;  %v3049_v55 = vadd.f32 %v4596_v38, %v6096_v42 }
 0x1e1   : > { %v3220_v10 = vadd.f32 %v3219_v40, %v3218_v59  ;;  %3082 = vst.msk [vmem:[%s6101_s8 + $0x48] sm:$0xff] %vm461_vm1, %v3050_v39  ;;  %v2893_v29 = vpop.f32.mrb[11].mxu0  ;;  %v3185_v16 = vmul.f32 %v3050_v39, %v3050_v39  ;;  %v3119_v8 = vadd.f32 %v3118_v21, %v3117_v47  ;;  %v4597_v4 = vadd.f32 %v4480_v20, %v6080_v14 }
 0x1e2   : > { %v4598_v12 = vadd.f32 %v2893_v29, %v6082_v43  ;;  %3081 = vst.msk [vmem:[%s6101_s8 + $0x40] sm:$0xff] %vm461_vm1, %v3049_v55  ;;  %v3120_v63 = vsel %vm461_vm1, %v3049_v55, 0.0  ;;  %v3184_v7 = vmul.f32 %v3049_v55, %v3049_v55  ;;  %v3122_v19 = vsel %vm461_vm1, %v3050_v39, 0.0 }
 0x1e3   : > { %v3222_v32 = vadd.f32 %v3221_v28, %v3220_v10  ;;  %v3121_v36 = vadd.f32 %v3120_v63, %v3119_v8  ;;  %v3052_v45 = vadd.f32 %v4597_v4, %v6096_v42  ;;  %v3225_v1 = vsel %vm461_vm1, %v3185_v16, 0.0 }
 0x1e4   : > { %v3051_v46 = vadd.f32 %v4598_v12, %v6096_v42  ;;  %v4483_v51 = vpop.f32.mrb[12].mxu0  ;;  %v3223_v14 = vsel %vm461_vm1, %v3184_v7, 0.0 }
 0x1e5   : > { %v4599_v52 = vadd.f32 %v4483_v51, %v6084_v34  ;;  %v2903_v43 = vpop.f32.mrb[13].mxu0  ;;  %v3224_v2 = vadd.f32 %v3223_v14, %v3222_v32  ;;  %3084 = vst.msk [vmem:[%s6101_s8 + $0x58] sm:$0xff] %vm461_vm1, %v3052_v45  ;;  %v3187_v11 = vmul.f32 %v3052_v45, %v3052_v45  ;;  %v3123_v6 = vadd.f32 %v3122_v19, %v3121_v36 }
 0x1e6   : > { %3083 = vst.msk [vmem:[%s6101_s8 + $0x50] sm:$0xff] %vm461_vm1, %v3051_v46  ;;  %v3124_v27 = vsel %vm461_vm1, %v3051_v46, 0.0  ;;  %v3186_v13 = vmul.f32 %v3051_v46, %v3051_v46  ;;  %v4600_v24 = vadd.f32 %v2903_v43, %v6086_v58  ;;  %v3126_v26 = vsel %vm461_vm1, %v3052_v45, 0.0 }
 0x1e7   : > { %v3054_v23 = vadd.f32 %v4599_v52, %v6096_v42  ;;  %v3125_v34 = vadd.f32 %v3124_v27, %v3123_v6  ;;  %v3226_v25 = vadd.f32 %v3225_v1, %v3224_v2  ;;  %v3229_v58 = vsel %vm461_vm1, %v3187_v11, 0.0 }
 0x1e8   : > { %v4486_v22 = vpop.f32.mrb[14].mxu0  ;;  %v3227_v35 = vsel %vm461_vm1, %v3186_v13, 0.0  ;;  %v3053_v41 = vadd.f32 %v4600_v24, %v6096_v42 }
 0x1e9   : > { %3086 = vst.msk [vmem:[%s6101_s8 + $0x68] sm:$0xff] %vm461_vm1, %v3054_v23  ;;  %v3189_v37 = vmul.f32 %v3054_v23, %v3054_v23  ;;  %v2913_v50 = vpop.f32.mrb[15].mxu0  ;;  %v3228_v56 = vadd.f32 %v3227_v35, %v3226_v25  ;;  %v3127_v57 = vadd.f32 %v3126_v26, %v3125_v34  ;;  %v4601_v17 = vadd.f32 %v4486_v22, %v6088_v3 }
 0x1ea   : > { %v4602_v18 = vadd.f32 %v2913_v50, %v6090_v15  ;;  %3085 = vst.msk [vmem:[%s6101_s8 + $0x60] sm:$0xff] %vm461_vm1, %v3053_v41  ;;  %v3128_v54 = vsel %vm461_vm1, %v3053_v41, 0.0  ;;  %v3188_v49 = vmul.f32 %v3053_v41, %v3053_v41  ;;  %v3130_v15 = vsel %vm461_vm1, %v3054_v23, 0.0 }
 0x1eb   : > { %v3129_v31 = vadd.f32 %v3128_v54, %v3127_v57  ;;  %v3230_v0 = vadd.f32 %v3229_v58, %v3228_v56  ;;  %v3056_v62 = vadd.f32 %v4601_v17, %v6096_v42  ;;  %v3233_v61 = vsel %vm461_vm1, %v3189_v37, 0.0 }
 0x1ec   : > { %v4265_v48 = vpop.f32.mrb[16].mxu1  ;;  %v3055_v5 = vadd.f32 %v4602_v18, %v6096_v42  ;;  %v4489_v53 = vpop.f32.mrb[16].mxu0  ;;  %v3231_v30 = vsel %vm461_vm1, %v3188_v49, 0.0 }
 0x1ed   : > { %v1861_v3 = vpop.f32.mrb[17].mxu1  ;;  %v4603_v44 = vadd.f32 %v4489_v53, %v4265_v48  ;;  %v2923_v33 = vpop.f32.mrb[17].mxu0  ;;  %v3232_v9 = vadd.f32 %v3231_v30, %v3230_v0  ;;  %3088 = vst.msk [vmem:[%s6101_s8 + $0x78] sm:$0xff] %vm461_vm1, %v3056_v62  ;;  %v3191_v60 = vmul.f32 %v3056_v62, %v3056_v62  ;;  %v3131_v47 = vadd.f32 %v3130_v15, %v3129_v31 }
 0x1ee   : > { %3087 = vst.msk [vmem:[%s6101_s8 + $0x70] sm:$0xff] %vm461_vm1, %v3055_v5  ;;  %v3132_v59 = vsel %vm461_vm1, %v3055_v5, 0.0  ;;  %v3190_v39 = vmul.f32 %v3055_v5, %v3055_v5  ;;  %v4604_v40 = vadd.f32 %v2923_v33, %v1861_v3  ;;  %v3134_v29 = vsel %vm461_vm1, %v3056_v62, 0.0 }
 0x1ef   : > { %v3058_v38 = vadd.f32 %v4603_v44, %v6096_v42  ;;  %v3133_v21 = vadd.f32 %v3132_v59, %v3131_v47  ;;  %v3234_v28 = vadd.f32 %v3233_v61, %v3232_v9  ;;  %v3237_v45 = vsel %vm461_vm1, %v3191_v60, 0.0 }
 0x1f0   : > { %v4268_v20 = vpop.f32.mrb[18].mxu1  ;;  %v4492_v10 = vpop.f32.mrb[18].mxu0  ;;  %v3235_v16 = vsel %vm461_vm1, %v3190_v39, 0.0  ;;  %v3057_v4 = vadd.f32 %v4604_v40, %v6096_v42 }
 0x1f1   : > { %v1871_v55 = vpop.f32.mrb[19].mxu1  ;;  %3090 = vst.msk [vmem:[%s6101_s8 + $0x88] sm:$0xff] %vm461_vm1, %v3058_v38  ;;  %v3193_v8 = vmul.f32 %v3058_v38, %v3058_v38  ;;  %v2933_v12 = vpop.f32.mrb[19].mxu0  ;;  %v3236_v63 = vadd.f32 %v3235_v16, %v3234_v28  ;;  %v3135_v7 = vadd.f32 %v3134_v29, %v3133_v21  ;;  %v4605_v32 = vadd.f32 %v4492_v10, %v4268_v20 }
 0x1f2   : > { %v4606_v36 = vadd.f32 %v2933_v12, %v1871_v55  ;;  %3089 = vst.msk [vmem:[%s6101_s8 + $0x80] sm:$0xff] %vm461_vm1, %v3057_v4  ;;  %v3136_v46 = vsel %vm461_vm1, %v3057_v4, 0.0  ;;  %v3192_v51 = vmul.f32 %v3057_v4, %v3057_v4  ;;  %v3138_v6 = vsel %vm461_vm1, %v3058_v38, 0.0 }
 0x1f3   : > { %v3137_v14 = vadd.f32 %v3136_v46, %v3135_v7  ;;  %v3238_v52 = vadd.f32 %v3237_v45, %v3236_v63  ;;  %v3060_v43 = vadd.f32 %v4605_v32, %v6096_v42  ;;  %v3241_v24 = vsel %vm461_vm1, %v3193_v8, 0.0 }
 0x1f4   : > { %v4271_v19 = vpop.f32.mrb[20].mxu1  ;;  %v3059_v1 = vadd.f32 %v4606_v36, %v6096_v42  ;;  %v4495_v2 = vpop.f32.mrb[20].mxu0  ;;  %v3239_v27 = vsel %vm461_vm1, %v3192_v51, 0.0 }
 0x1f5   : > { %v1881_v11 = vpop.f32.mrb[21].mxu1  ;;  %v4607_v13 = vadd.f32 %v4495_v2, %v4271_v19  ;;  %v2943_v23 = vpop.f32.mrb[21].mxu0  ;;  %v3240_v34 = vadd.f32 %v3239_v27, %v3238_v52  ;;  %3092 = vst.msk [vmem:[%s6101_s8 + $0x98] sm:$0xff] %vm461_vm1, %v3060_v43  ;;  %v3195_v25 = vmul.f32 %v3060_v43, %v3060_v43  ;;  %v3139_v22 = vadd.f32 %v3138_v6, %v3137_v14 }
 0x1f6   : > { %3091 = vst.msk [vmem:[%s6101_s8 + $0x90] sm:$0xff] %vm461_vm1, %v3059_v1  ;;  %v3140_v26 = vsel %vm461_vm1, %v3059_v1, 0.0  ;;  %v3194_v35 = vmul.f32 %v3059_v1, %v3059_v1  ;;  %v4608_v41 = vadd.f32 %v2943_v23, %v1881_v11  ;;  %v3142_v58 = vsel %vm461_vm1, %v3060_v43, 0.0 }
 0x1f7   : > { %v3062_v37 = vadd.f32 %v4607_v13, %v6096_v42  ;;  %v3141_v56 = vadd.f32 %v3140_v26, %v3139_v22  ;;  %v3242_v57 = vadd.f32 %v3241_v24, %v3240_v34  ;;  %v3245_v3 = vsel %vm461_vm1, %v3195_v25, 0.0 }
 0x1f8   : > { %v4274_v50 = vpop.f32.mrb[22].mxu1  ;;  %v4498_v17 = vpop.f32.mrb[22].mxu0  ;;  %v3243_v54 = vsel %vm461_vm1, %v3194_v35, 0.0  ;;  %v3061_v48 = vadd.f32 %v4608_v41, %v6096_v42 }
 0x1f9   : > { %v1891_v18 = vpop.f32.mrb[23].mxu1  ;;  %3094 = vst.msk [vmem:[%s6101_s8 + $0xa8] sm:$0xff] %vm461_vm1, %v3062_v37  ;;  %v3197_v49 = vmul.f32 %v3062_v37, %v3062_v37  ;;  %v2953_v31 = vpop.f32.mrb[23].mxu0  ;;  %v3244_v0 = vadd.f32 %v3243_v54, %v3242_v57  ;;  %v3143_v62 = vadd.f32 %v3142_v58, %v3141_v56  ;;  %v4609_v5 = vadd.f32 %v4498_v17, %v4274_v50 }
 0x1fa   : > { %v4610_v53 = vadd.f32 %v2953_v31, %v1891_v18  ;;  %3093 = vst.msk [vmem:[%s6101_s8 + $0xa0] sm:$0xff] %vm461_vm1, %v3061_v48  ;;  %v3144_v15 = vsel %vm461_vm1, %v3061_v48, 0.0  ;;  %v3196_v30 = vmul.f32 %v3061_v48, %v3061_v48  ;;  %v3146_v39 = vsel %vm461_vm1, %v3062_v37, 0.0 }
 0x1fb   : > { %v3145_v33 = vadd.f32 %v3144_v15, %v3143_v62  ;;  %v3246_v61 = vadd.f32 %v3245_v3, %v3244_v0  ;;  %v3064_v9 = vadd.f32 %v4609_v5, %v6096_v42  ;;  %v3249_v21 = vsel %vm461_vm1, %v3197_v49, 0.0 }
 0x1fc   : > { %v4277_v44 = vpop.f32.mrb[24].mxu1  ;;  %v3063_v60 = vadd.f32 %v4610_v53, %v6096_v42  ;;  %v4501_v47 = vpop.f32.mrb[24].mxu0  ;;  %v3247_v38 = vsel %vm461_vm1, %v3196_v30, 0.0 }
 0x1fd   : > { %v1901_v59 = vpop.f32.mrb[25].mxu1  ;;  %v4611_v40 = vadd.f32 %v4501_v47, %v4277_v44  ;;  %v2963_v20 = vpop.f32.mrb[25].mxu0  ;;  %v3248_v28 = vadd.f32 %v3247_v38, %v3246_v61  ;;  %3096 = vst.msk [vmem:[%s6101_s8 + $0xb8] sm:$0xff] %vm461_vm1, %v3064_v9  ;;  %v3199_v10 = vmul.f32 %v3064_v9, %v3064_v9  ;;  %v3147_v55 = vadd.f32 %v3146_v39, %v3145_v33 }
 0x1fe   : > { %3095 = vst.msk [vmem:[%s6101_s8 + $0xb0] sm:$0xff] %vm461_vm1, %v3063_v60  ;;  %v3148_v29 = vsel %vm461_vm1, %v3063_v60, 0.0  ;;  %v3198_v16 = vmul.f32 %v3063_v60, %v3063_v60  ;;  %v4612_v4 = vadd.f32 %v2963_v20, %v1901_v59  ;;  %v3150_v45 = vsel %vm461_vm1, %v3064_v9, 0.0 }
 0x1ff   : > { %v3066_v8 = vadd.f32 %v4611_v40, %v6096_v42  ;;  %v3149_v63 = vadd.f32 %v3148_v29, %v3147_v55  ;;  %v3250_v7 = vadd.f32 %v3249_v21, %v3248_v28  ;;  %v3253_v11 = vsel %vm461_vm1, %v3199_v10, 0.0 }
 0x200   : > { %v4280_v12 = vpop.f32.mrb[26].mxu1  ;;  %v4504_v32 = vpop.f32.mrb[26].mxu0  ;;  %v3251_v46 = vsel %vm461_vm1, %v3198_v16, 0.0  ;;  %v3065_v19 = vadd.f32 %v4612_v4, %v6096_v42 }
 0x201   : > { %v1911_v36 = vpop.f32.mrb[27].mxu1  ;;  %3098 = vst.msk [vmem:[%s6101_s8 + $0xc8] sm:$0xff] %vm461_vm1, %v3066_v8  ;;  %v3201_v51 = vmul.f32 %v3066_v8, %v3066_v8  ;;  %v2973_v14 = vpop.f32.mrb[27].mxu0  ;;  %v3252_v52 = vadd.f32 %v3251_v46, %v3250_v7  ;;  %v3151_v43 = vadd.f32 %v3150_v45, %v3149_v63  ;;  %v4613_v1 = vadd.f32 %v4504_v32, %v4280_v12 }
 0x202   : > { %v4614_v2 = vadd.f32 %v2973_v14, %v1911_v36  ;;  %3097 = vst.msk [vmem:[%s6101_s8 + $0xc0] sm:$0xff] %vm461_vm1, %v3065_v19  ;;  %v3152_v6 = vsel %vm461_vm1, %v3065_v19, 0.0  ;;  %v3200_v27 = vmul.f32 %v3065_v19, %v3065_v19  ;;  %v3154_v35 = vsel %vm461_vm1, %v3066_v8, 0.0 }
 0x203   : > { %v3153_v23 = vadd.f32 %v3152_v6, %v3151_v43  ;;  %v3254_v24 = vadd.f32 %v3253_v11, %v3252_v52  ;;  %v3068_v34 = vadd.f32 %v4613_v1, %v6096_v42  ;;  %v3257_v56 = vsel %vm461_vm1, %v3201_v51, 0.0 }
 0x204   : > { %v4283_v13 = vpop.f32.mrb[28].mxu1  ;;  %v3067_v25 = vadd.f32 %v4614_v2, %v6096_v42  ;;  %v4507_v22 = vpop.f32.mrb[28].mxu0  ;;  %v3255_v37 = vsel %vm461_vm1, %v3200_v27, 0.0 }
 0x205   : > { %v1921_v26 = vpop.f32.mrb[29].mxu1  ;;  %v4615_v41 = vadd.f32 %v4507_v22, %v4283_v13  ;;  %v2983_v50 = vpop.f32.mrb[29].mxu0  ;;  %v3256_v57 = vadd.f32 %v3255_v37, %v3254_v24  ;;  %3100 = vst.msk [vmem:[%s6101_s8 + $0xd8] sm:$0xff] %vm461_vm1, %v3068_v34  ;;  %v3203_v17 = vmul.f32 %v3068_v34, %v3068_v34  ;;  %v3155_v18 = vadd.f32 %v3154_v35, %v3153_v23 }
 0x206   : > { %3099 = vst.msk [vmem:[%s6101_s8 + $0xd0] sm:$0xff] %vm461_vm1, %v3067_v25  ;;  %v3156_v58 = vsel %vm461_vm1, %v3067_v25, 0.0  ;;  %v3202_v54 = vmul.f32 %v3067_v25, %v3067_v25  ;;  %v4616_v48 = vadd.f32 %v2983_v50, %v1921_v26  ;;  %v3158_v3 = vsel %vm461_vm1, %v3068_v34, 0.0 }
 0x207   : > { %v3070_v49 = vadd.f32 %v4615_v41, %v6096_v42  ;;  %v3157_v0 = vadd.f32 %v3156_v58, %v3155_v18  ;;  %v3258_v62 = vadd.f32 %v3257_v56, %v3256_v57  ;;  %v3261_v47 = vsel %vm461_vm1, %v3203_v17, 0.0 }
 0x208   : > { %v4286_v31 = vpop.f32.mrb[30].mxu1  ;;  %v4510_v5 = vpop.f32.mrb[30].mxu0  ;;  %v3259_v15 = vsel %vm461_vm1, %v3202_v54, 0.0  ;;  %v3069_v30 = vadd.f32 %v4616_v48, %v6096_v42 }
 0x209   : > { %v1931_v53 = vpop.f32.mrb[31].mxu1  ;;  %3102 = vst.msk [vmem:[%s6101_s8 + $0xe8] sm:$0xff] %vm461_vm1, %v3070_v49  ;;  %v2993_v44 = vpop.f32.mrb[31].mxu0  ;;  %v3260_v33 = vadd.f32 %v3259_v15, %v3258_v62  ;;  %v3159_v61 = vadd.f32 %v3158_v3, %v3157_v0  ;;  %v4617_v9 = vadd.f32 %v4510_v5, %v4286_v31  ;;  %v3205_v59 = vmul.f32 %v3070_v49, %v3070_v49 }
 0x20a   : > { %v4618_v60 = vadd.f32 %v2993_v44, %v1931_v53  ;;  %3101 = vst.msk [vmem:[%s6101_s8 + $0xe0] sm:$0xff] %vm461_vm1, %v3069_v30  ;;  %v3160_v39 = vsel %vm461_vm1, %v3069_v30, 0.0  ;;  %v3204_v38 = vmul.f32 %v3069_v30, %v3069_v30  ;;  %v3162_v10 = vsel %vm461_vm1, %v3070_v49, 0.0 }
 0x20b   : > { %v3161_v40 = vadd.f32 %v3160_v39, %v3159_v61  ;;  %v3262_v20 = vadd.f32 %v3261_v47, %v3260_v33  ;;  %v3072_v21 = vadd.f32 %v4617_v9, %v6096_v42  ;;  %v3265_v8 = vsel %vm461_vm1, %v3205_v59, 0.0 }
 0x20c   : > { %v3071_v28 = vadd.f32 %v4618_v60, %v6096_v42  ;;  %v3263_v55 = vsel %vm461_vm1, %v3204_v38, 0.0 }
 0x20d   : > { %v3264_v29 = vadd.f32 %v3263_v55, %v3262_v20  ;;  %3104 = vst.msk [vmem:[%s6101_s8 + $0xf8] sm:$0xff] %vm461_vm1, %v3072_v21  ;;  %v3163_v16 = vadd.f32 %v3162_v10, %v3161_v40  ;;  %v3207_v4 = vmul.f32 %v3072_v21, %v3072_v21  ;;  %v3166_v42 = vsel %vm461_vm1, %v3072_v21, 0.0 }
 0x20e   : > { %3103 = vst.msk [vmem:[%s6101_s8 + $0xf0] sm:$0xff] %vm461_vm1, %v3071_v28  ;;  %v3164_v12 = vsel %vm461_vm1, %v3071_v28, 0.0  ;;  %v3206_v63 = vmul.f32 %v3071_v28, %v3071_v28 }
 0x20f   : > { %v3165_v7 = vadd.f32 %v3164_v12, %v3163_v16  ;;  %v3266_v32 = vadd.f32 %v3265_v8, %v3264_v29  ;;  %v3269_v51 = vsel %vm461_vm1, %v3207_v4, 0.0 }
 0x210   : > { %v3267_v36 = vsel %vm461_vm1, %v3206_v63, 0.0 }
 0x211   : > { %v3167_v45 = vadd.f32 %v3166_v42, %v3165_v7  ;;  %v3268_v46 = vadd.f32 %v3267_v36, %v3266_v32 }
 0x213   : > { %v3168_v19 = vrot.slane %v3167_v45, 4  ;;  %v3270_v14 = vadd.f32 %v3269_v51, %v3268_v46 }
 0x215   : > { %v3169_v52 = vadd.f32 %v3168_v19, %v3167_v45  ;;  %v3271_v43 = vrot.slane %v3270_v14, 4 }
 0x217   : > { %v3170_v1 = vrot.slane %v3169_v52, 2  ;;  %v3272_v2 = vadd.f32 %v3271_v43, %v3270_v14 }
 0x219   : > { %v3171_v11 = vadd.f32 %v3170_v1, %v3169_v52  ;;  %v3273_v6 = vrot.slane %v3272_v2, 2 }
 0x21b   : > { %v3172_v27 = vrot.slane %v3171_v11, 1  ;;  %v3274_v13 = vadd.f32 %v3273_v6, %v3272_v2 }
 0x21d   : > { %v3173_v23 = vadd.f32 %v3172_v27, %v3171_v11  ;;  %v3275_v24 = vrot.slane %v3274_v13, 1 }
 0x21f   : > { %3175 = vst.msk [vmem:[%s238_s11] sm:$0x1] %vm3174_vm3, %v3173_v23  ;;  %v3276_v34 = vadd.f32 %v3275_v24, %v3274_v13 }
 0x221   : > { %3277 = vst.msk [vmem:[%s241_s14] sm:$0x1] %vm3174_vm3, %v3276_v34 }
 0x222 PF: > { %s16_s18 = sadd.s32 1, %s4858_s18  }
 0x223   : > { %p13_p4 = scmp.ge.s32.totalorder %s16_s18, 4  }
 0x225   :  { %15 = sbr.rel (!%p13_p4) target bundleno = 1 (0x1), region = 86 }

</bundles_post_ra>
